<compile_context>
chip_gen: v6e
topology: v6e:2x2x1
jax: 0.10.0
libtpu: 0.0.40
codegen_flags: <defaults>
</compile_context>

<pallas_src>
import functools

import jax
import jax.numpy as jnp
from jax.experimental import pallas as pl
from jax.experimental.pallas import tpu as pltpu

EPS = 1e-5


# --------------------------------------------------------------------------
# in-kernel helpers
# --------------------------------------------------------------------------
def _conv3x3_folded(xs, w_ref):
    """3x3 'valid' conv via im2col of the kx taps.

    xs:    (R, Wp, Cin) bf16 values, carrying a 1-pixel border on each side of
           both spatial axes relative to the desired output.
    w_ref: (3, 3*Cin, Cout) bf16 VMEM ref, laid out as [ky][kx*Cin + ci, co].
    returns (R-2, Wp-2, Cout) float32 (MXU accumulates in f32).
    """
    R, Wp, _ = xs.shape
    Ro, Wo = R - 2, Wp - 2
    # Fold the three kx taps into the contraction dim: K = 3*Cin -> 3 matmuls
    # instead of 9 tiny ones (3x deeper MXU contraction, fewer slice copies).
    xcat = jnp.concatenate(
        [xs[:, 0:Wo, :], xs[:, 1:Wo + 1, :], xs[:, 2:Wo + 2, :]], axis=-1)
    out = None
    for ky in range(3):
        part = jax.lax.dot_general(
            xcat[ky:ky + Ro], w_ref[ky],
            dimension_numbers=(((2,), (0,)), ((), ())),
            preferred_element_type=jnp.float32)
        out = part if out is None else out + part
    return out


def _partial_stats(y, weight=None):
    """Per-channel (sum, sum_of_squares) of y (R, W, C) -> (2, C) float32."""
    yw = y if weight is None else y * weight
    ssum = jnp.sum(jnp.sum(yw, axis=0), axis=0, keepdims=True)       # (1, C)
    ssq = jnp.sum(jnp.sum(yw * y, axis=0), axis=0, keepdims=True)    # (1, C)
    return jnp.concatenate([ssum, ssq], axis=0)                      # (2, C)


# --------------------------------------------------------------------------
# kernels
# --------------------------------------------------------------------------
def _pass1_kernel(x_ref, w1_ref, y1_ref, s1_ref):
    """conv1 over one overlapping row slab + partial BN1 stats.

    x_ref:  (1, TH+4, W+4, Cin) bf16  overlapping tile of the 2-pixel-padded input
    y1_ref: (1, TH+2, W+2, C1)  bf16  conv1 slab incl. 1 halo row/col each side
    s1_ref: (1, 2, C1)          f32   per-tile (sum, sumsq) over owned pixels
    """
    y = _conv3x3_folded(x_ref[0], w1_ref)                  # (TH+2, W+2, C1) f32
    R, Wp, C1 = y.shape
    # Only the slab interior (rows 1..TH, cols 1..W) is owned by this tile;
    # halo / pad positions must not contribute to the batch statistics.
    r = jax.lax.broadcasted_iota(jnp.int32, (R, Wp, C1), 0)
    c = jax.lax.broadcasted_iota(jnp.int32, (R, Wp, C1), 1)
    own = ((r >= 1) & (r <= R - 2) & (c >= 1) & (c <= Wp - 2)).astype(jnp.float32)
    s1_ref[0] = _partial_stats(y, own)
    y1_ref[0] = y.astype(y1_ref.dtype)


def _pass2_kernel(y1_ref, sc1_ref, sh1_ref, w2_ref, y2_ref, s2_ref):
    """BN1(affine)+ReLU on the haloed slab, conv2, partial BN2 stats.

    y1_ref:  (1, TH+2, W+2, C1) bf16  conv1 slab from pass 1
    sc1/sh1: (1, C1) f32              folded BN1 scale / shift (global stats)
    y2_ref:  (1, TH, W, C2) bf16      conv2 output tile
    s2_ref:  (1, 2, C2) f32           per-tile (sum, sumsq)
    """
    t = pl.program_id(1)
    ys = y1_ref[0].astype(jnp.float32)
    R, Wp, C1 = ys.shape
    TH, W = R - 2, Wp - 2
    H = pl.num_programs(1) * TH
    h = jnp.maximum(ys * sc1_ref[0, :] + sh1_ref[0, :], 0.0)    # BN1 + ReLU, f32
    # conv2's zero-padding ring: halo rows outside the image and the left/right
    # pad columns must be exactly zero *after* BN+ReLU.
    r = jax.lax.broadcasted_iota(jnp.int32, (R, Wp, C1), 0)
    c = jax.lax.broadcasted_iota(jnp.int32, (R, Wp, C1), 1)
    grow = t * TH - 1 + r                                        # global image row
    valid = (grow >= 0) & (grow < H) & (c >= 1) & (c <= W)
    h = jnp.where(valid, h, 0.0).astype(jnp.bfloat16)
    y = _conv3x3_folded(h, w2_ref)                               # (TH, W, C2) f32
    s2_ref[0] = _partial_stats(y)
    y2_ref[0] = y.astype(y2_ref.dtype)


def _pass3_kernel(y2_ref, sc2_ref, sh2_ref, o_ref):
    """BN2(affine) + ReLU -> final output tile."""
    y = y2_ref[0].astype(jnp.float32)
    o_ref[0] = jnp.maximum(y * sc2_ref[0, :] + sh2_ref[0, :], 0.0).astype(o_ref.dtype)


# --------------------------------------------------------------------------
# wrapper
# --------------------------------------------------------------------------
def _weight_to_mat(w):
    """PyTorch conv weight (Cout, Cin, 3, 3) -> (3, 3*Cin, Cout) bf16,
    matching the kx-folded im2col layout of _conv3x3_folded."""
    cout, cin = w.shape[0], w.shape[1]
    wk = jnp.transpose(w, (2, 3, 1, 0))                    # (ky, kx, Cin, Cout)
    return wk.reshape(3, 3 * cin, cout).astype(jnp.bfloat16)


def _bn_scale_shift(partial_stats, gamma, beta, count):
    """Reduce per-tile (sum, sumsq) partials -> folded BN scale/shift (1, C) f32."""
    s = jnp.sum(partial_stats, axis=0)                     # (2, C)
    mean = s[0] / count
    var = s[1] / count - mean * mean                       # biased, as PyTorch
    inv = jax.lax.rsqrt(var + EPS)
    scale = gamma * inv
    shift = beta - mean * scale
    c = gamma.shape[0]
    return (scale.astype(jnp.float32).reshape(1, c),
            shift.astype(jnp.float32).reshape(1, c))


def _pick_row_tile(H, W, C1, C2, budget_bytes=12 * 1024 * 1024):
    """Largest divisor of H whose per-step VMEM footprint (heaviest pass, with
    double-buffered I/O blocks) stays under budget. Conservative enough for
    v7x's 64 MiB physical / 32 MiB default-scoped VMEM."""
    best = 1
    for th in range(1, H + 1):
        if H % th:
            continue
        slab = (th + 2) * (W + 2)
        est = (2 * slab * C1 * 2        # y1 slab (bf16), double buffered
               + slab * C1 * 4          # h in f32
               + slab * 3 * C1 * 2      # kx-folded im2col patch (bf16)
               + th * W * C2 * 4        # f32 conv2 accumulator
               + 2 * th * W * C2 * 2    # y2 output block (bf16), double buffered
               + 9 * C1 * C2 * 2)       # conv2 weights (bf16)
        if est <= budget_bytes:
            best = th
    return best


@functools.partial(jax.jit, static_argnames=("row_tile",))
def conv_block_forward(x_nchw, params, row_tile=None):
    """conv_block forward. x_nchw: (N, C, H, W) f32 -> (N, 4C, H, W) f32.

    params = (w1, b1, g1, be1, w2, b2, g2, be2), PyTorch shapes.
    NOTE: conv biases b1/b2 are accepted but unused — a per-channel constant
    added before training-mode BatchNorm cancels exactly in y - mean(y).
    """
    w1, _b1, g1, be1, w2, _b2, g2, be2 = params
    N, C, H, W = x_nchw.shape
    C1, C2 = 2 * C, 4 * C

    TH = _pick_row_tile(H, W, C1, C2) if row_tile is None else row_tile
    assert H % TH == 0, (H, TH)
    nt = H // TH
    bf16, f32 = jnp.bfloat16, jnp.float32

    # ---- glue (XLA): NCHW -> NHWC, bf16, pad by 2, overlapping row tiles ----
    # TODO(synk): fold the transpose/pad/halo of x into the pass-1 DMA path
    # (Element-offset index_map) instead of materializing the (small, bf16)
    # pre-tiled input in HBM.
    x = jnp.transpose(x_nchw, (0, 2, 3, 1)).astype(bf16)
    x_pad = jnp.pad(x, ((0, 0), (2, 2), (2, 2), (0, 0)))
    x_tiles = jnp.stack(
        [x_pad[:, t * TH:t * TH + TH + 4] for t in range(nt)], axis=1
    ).reshape(N * nt, TH + 4, W + 4, C)

    w1m = _weight_to_mat(w1)                               # (3, 3*C,  C1)
    w2m = _weight_to_mat(w2)                               # (3, 3*C1, C2)

    cparams = pltpu.CompilerParams(
        dimension_semantics=("parallel", "parallel"),      # megacore on v7x
        vmem_limit_bytes=32 * 1024 * 1024)

    # -------------------- pass 1: conv1 + partial BN1 stats ------------------
    y1_slabs, st1 = pl.pallas_call(
        _pass1_kernel,
        grid=(N, nt),
        in_specs=[
            pl.BlockSpec((1, TH + 4, W + 4, C),
                         lambda n, t, nt=nt: (n * nt + t, 0, 0, 0)),
            pl.BlockSpec((3, 3 * C, C1), lambda n, t: (0, 0, 0)),
        ],
        out_specs=(
            pl.BlockSpec((1, TH + 2, W + 2, C1),
                         lambda n, t, nt=nt: (n * nt + t, 0, 0, 0)),
            pl.BlockSpec((1, 2, C1), lambda n, t, nt=nt: (n * nt + t, 0, 0)),
        ),
        out_shape=(
            jax.ShapeDtypeStruct((N * nt, TH + 2, W + 2, C1), bf16),
            jax.ShapeDtypeStruct((N * nt, 2, C1), f32),
        ),
        compiler_params=cparams,
        cost_estimate=pl.CostEstimate(
            flops=2 * N * H * W * 9 * C * C1,
            transcendentals=0,
            bytes_accessed=(N * nt * (TH + 4) * (W + 4) * C * 2
                            + 9 * C * C1 * 2
                            + N * nt * (TH + 2) * (W + 2) * C1 * 2
                            + N * nt * 2 * C1 * 4)),
    )(x_tiles, w1m)

    count = jnp.float32(N * H * W)
    sc1, sh1 = _bn_scale_shift(st1, g1, be1, count)

    # ------------- pass 2: BN1 + ReLU, conv2, partial BN2 stats --------------
    y2, st2 = pl.pallas_call(
        _pass2_kernel,
        grid=(N, nt),
        in_specs=[
            pl.BlockSpec((1, TH + 2, W + 2, C1),
                         lambda n, t, nt=nt: (n * nt + t, 0, 0, 0)),
            pl.BlockSpec((1, C1), lambda n, t: (0, 0)),
            pl.BlockSpec((1, C1), lambda n, t: (0, 0)),
            pl.BlockSpec((3, 3 * C1, C2), lambda n, t: (0, 0, 0)),
        ],
        out_specs=(
            pl.BlockSpec((1, TH, W, C2), lambda n, t: (n, t, 0, 0)),
            pl.BlockSpec((1, 2, C2), lambda n, t, nt=nt: (n * nt + t, 0, 0)),
        ),
        out_shape=(
            jax.ShapeDtypeStruct((N, H, W, C2), bf16),
            jax.ShapeDtypeStruct((N * nt, 2, C2), f32),
        ),
        compiler_params=cparams,
        cost_estimate=pl.CostEstimate(
            flops=2 * N * H * W * 9 * C1 * C2,
            transcendentals=0,
            bytes_accessed=(N * nt * (TH + 2) * (W + 2) * C1 * 2
                            + 9 * C1 * C2 * 2
                            + N * H * W * C2 * 2
                            + N * nt * 2 * C2 * 4)),
    )(y1_slabs, sc1, sh1, w2m)

    sc2, sh2 = _bn_scale_shift(st2, g2, be2, count)

    # ---------------------- pass 3: BN2 + ReLU + store -----------------------
    out_nhwc = pl.pallas_call(
        _pass3_kernel,
        grid=(N, nt),
        in_specs=[
            pl.BlockSpec((1, TH, W, C2), lambda n, t: (n, t, 0, 0)),
            pl.BlockSpec((1, C2), lambda n, t: (0, 0)),
            pl.BlockSpec((1, C2), lambda n, t: (0, 0)),
        ],
        out_specs=pl.BlockSpec((1, TH, W, C2), lambda n, t: (n, t, 0, 0)),
        out_shape=jax.ShapeDtypeStruct((N, H, W, C2), f32),
        compiler_params=cparams,
        cost_estimate=pl.CostEstimate(
            flops=2 * N * H * W * C2,
            transcendentals=0,
            bytes_accessed=N * H * W * C2 * (2 + 4)),
    )(y2, sc2, sh2)

    # TODO(synk): for tiny-C test configs the (..., C2) lane dim is mostly
    # masked; a (N, H, W*C2) lane-dense layout for passes 2/3 would help there
    # (real UNet channel counts are >=128, where this is moot).
    return jnp.transpose(out_nhwc, (0, 3, 1, 2))           # NHWC -> NCHW


# --------------------------------------------------------------------------
# pure-JAX references
# --------------------------------------------------------------------------
def _ref_forward_mimic(x_nchw, params):
    """Reference mimicking the kernel's numerics: bf16 MXU operands, bf16
    intermediate storage, f32 stats/affine, biases dropped (exact cancellation
    under training-mode BN)."""
    w1, _b1, g1, be1, w2, _b2, g2, be2 = params
    bf16, f32 = jnp.bfloat16, jnp.float32

    def conv(x_nhwc, w_oihw):
        return jax.lax.conv_general_dilated(
            x_nhwc.astype(bf16), w_oihw.astype(bf16), (1, 1), ((1, 1), (1, 1)),
            dimension_numbers=('NHWC', 'OIHW', 'NHWC'),
            preferred_element_type=f32)

    def bn_affine(y_f32, g, b):
        n = y_f32.shape[0] * y_f32.shape[1] * y_f32.shape[2]
        mean = jnp.sum(y_f32, axis=(0, 1, 2)) / n
        var = jnp.sum(y_f32 * y_f32, axis=(0, 1, 2)) / n - mean * mean
        inv = jax.lax.rsqrt(var + EPS)
        return g * inv, b - mean * g * inv

    x = jnp.transpose(x_nchw, (0, 2, 3, 1)).astype(f32)
    y1 = conv(x, w1)
    sc1, sh1 = bn_affine(y1, g1, be1)
    h1 = jnp.maximum(y1.astype(bf16).astype(f32) * sc1 + sh1, 0.0)
    y2 = conv(h1, w2)
    sc2, sh2 = bn_affine(y2, g2, be2)
    out = jnp.maximum(y2.astype(bf16).astype(f32) * sc2 + sh2, 0.0)
    return jnp.transpose(out, (0, 3, 1, 2))


def _ref_forward_f32(x_nchw, params):
    """Exact f32 PyTorch-semantics reference (conv biases included)."""
    w1, b1, g1, be1, w2, b2, g2, be2 = params

    def block(x, w, b, g, be):
        y = jax.lax.conv_general_dilated(
            x, w, (1, 1), ((1, 1), (1, 1)),
            dimension_numbers=('NCHW', 'OIHW', 'NCHW')) + b[None, :, None, None]
        mean = jnp.mean(y, axis=(0, 2, 3), keepdims=True)
        var = jnp.mean((y - mean) ** 2, axis=(0, 2, 3), keepdims=True)
        yhat = (y - mean) * jax.lax.rsqrt(var + EPS)
        return jnp.maximum(yhat * g[None, :, None, None] + be[None, :, None, None], 0.0)

    return block(block(x_nchw, w1, b1, g1, be1), w2, b2, g2, be2)


# --------------------------------------------------------------------------
if __name__ == "__main__":
    key = jax.random.PRNGKey(0)
    N, C, H, W = 2, 4, 16, 16
    C1, C2 = 2 * C, 4 * C

    ks = jax.random.split(key, 9)
    x = jax.random.normal(ks[0], (N, C, H, W), jnp.float32)
    w1 = 0.2 * jax.random.normal(ks[1], (C1, C, 3, 3), jnp.float32)
    b1 = 0.1 * jax.random.normal(ks[2], (C1,), jnp.float32)
    g1 = 1.0 + 0.1 * jax.random.normal(ks[3], (C1,), jnp.float32)
    be1 = 0.1 * jax.random.normal(ks[4], (C1,), jnp.float32)
    w2 = 0.2 * jax.random.normal(ks[5], (C2, C1, 3, 3), jnp.float32)
    b2 = 0.1 * jax.random.normal(ks[6], (C2,), jnp.float32)
    g2 = 1.0 + 0.1 * jax.random.normal(ks[7], (C2,), jnp.float32)
    be2 = 0.1 * jax.random.normal(ks[8], (C2,), jnp.float32)
    params = (w1, b1, g1, be1, w2, b2, g2, be2)

    # row_tile=8 -> grid (N=2, nt=2): exercises the tiled, multi-tile BN path.
    out = jax.block_until_ready(conv_block_forward(x, params, row_tile=8))
    assert out.shape == (N, C2, H, W), out.shape

    # Tight check vs a reference that mimics the kernel numerics
    # (bf16 MXU operands / intermediates, f32 stats).
    ref = jax.block_until_ready(_ref_forward_mimic(x, params))
    err = float(jnp.max(jnp.abs(out - ref)))
    assert jnp.allclose(out, ref, atol=1e-2, rtol=1e-2), err

    # Loose sanity check vs exact f32 PyTorch semantics (incl. the conv biases
    # the kernel drops); remaining differences are bf16 MXU-operand rounding.
    ref32 = jax.block_until_ready(_ref_forward_f32(x, params))
    err32 = float(jnp.max(jnp.abs(out - ref32)))
    assert jnp.allclose(out, ref32, atol=1e-1, rtol=1e-1), err32

    print("KERNEL_OK")
</pallas_src>

<mosaic_0001>
module attributes {stable_mosaic.version = 11 : i64} {
  func.func @_pass1_kernel(%arg0: i32, %arg1: i32, %arg2: memref<1x12x20x4xbf16, #tpu.memory_space<vmem>>, %arg3: memref<3x12x8xbf16, #tpu.memory_space<vmem>>, %arg4: memref<1x10x18x8xbf16, #tpu.memory_space<vmem>>, %arg5: memref<1x2x8xf32, #tpu.memory_space<vmem>>) attributes {dimension_semantics = [#tpu.dimension_semantics<parallel>, #tpu.dimension_semantics<parallel>], iteration_bounds = array<i64: 2, 2>, scalar_prefetch = 0 : i64, scratch_operands = 0 : i64, tpu.core_type = #tpu.core_type<tc>, window_params = [{transform_indices = @transform_0, window_bounds = array<i64: 1, 12, 20, 4>}, {pipeline_mode = #tpu.pipeline_mode<synchronous>, transform_indices = @transform_1, window_bounds = array<i64: 3, 12, 8>}, {transform_indices = @transform_2, window_bounds = array<i64: 1, 10, 18, 8>}, {transform_indices = @transform_3, window_bounds = array<i64: 1, 2, 8>}]} {
    %c0 = arith.constant 0 : index
    %c0_0 = arith.constant 0 : index
    %c0_1 = arith.constant 0 : index
    %c0_2 = arith.constant 0 : index
    %0 = vector.load %arg2[%c0, %c0_0, %c0_1, %c0_2] : memref<1x12x20x4xbf16, #tpu.memory_space<vmem>>, vector<1x12x20x4xbf16>
    %1 = vector.shape_cast %0 : vector<1x12x20x4xbf16> to vector<12x20x4xbf16>
    %2 = vector.extract_strided_slice %1 {offsets = [0, 0, 0], sizes = [12, 18, 4], strides = [1, 1, 1]} : vector<12x20x4xbf16> to vector<12x18x4xbf16>
    %3 = vector.extract_strided_slice %1 {offsets = [0, 1, 0], sizes = [12, 18, 4], strides = [1, 1, 1]} : vector<12x20x4xbf16> to vector<12x18x4xbf16>
    %4 = vector.extract_strided_slice %1 {offsets = [0, 2, 0], sizes = [12, 18, 4], strides = [1, 1, 1]} : vector<12x20x4xbf16> to vector<12x18x4xbf16>
    %5 = tpu.concatenate %2, %3, %4 in 2 : vector<12x18x4xbf16>, vector<12x18x4xbf16>, vector<12x18x4xbf16> -> vector<12x18x12xbf16>
    %6 = vector.extract_strided_slice %5 {offsets = [0, 0, 0], sizes = [10, 18, 12], strides = [1, 1, 1]} : vector<12x18x12xbf16> to vector<10x18x12xbf16>
    %c0_3 = arith.constant 0 : index
    %c0_4 = arith.constant 0 : index
    %c0_5 = arith.constant 0 : index
    %7 = vector.load %arg3[%c0_3, %c0_4, %c0_5] : memref<3x12x8xbf16, #tpu.memory_space<vmem>>, vector<1x12x8xbf16>
    %8 = vector.shape_cast %7 : vector<1x12x8xbf16> to vector<12x8xbf16>
    %cst = arith.constant dense<0.000000e+00> : vector<10x18x8xf32>
    %9 = tpu.matmul %6, %8, %cst {dimension_numbers = #tpu.dot_dimension_numbers<[2], [0], [0, 1], [1], [0, 0, 0, 1, 1, 1], [], []>} : vector<10x18x12xbf16>, vector<12x8xbf16>, vector<10x18x8xf32> -> vector<10x18x8xf32>
    %10 = vector.extract_strided_slice %5 {offsets = [1, 0, 0], sizes = [10, 18, 12], strides = [1, 1, 1]} : vector<12x18x12xbf16> to vector<10x18x12xbf16>
    %c1 = arith.constant 1 : index
    %c0_6 = arith.constant 0 : index
    %c0_7 = arith.constant 0 : index
    %11 = vector.load %arg3[%c1, %c0_6, %c0_7] : memref<3x12x8xbf16, #tpu.memory_space<vmem>>, vector<1x12x8xbf16>
    %12 = vector.shape_cast %11 : vector<1x12x8xbf16> to vector<12x8xbf16>
    %cst_8 = arith.constant dense<0.000000e+00> : vector<10x18x8xf32>
    %13 = tpu.matmul %10, %12, %cst_8 {dimension_numbers = #tpu.dot_dimension_numbers<[2], [0], [0, 1], [1], [0, 0, 0, 1, 1, 1], [], []>} : vector<10x18x12xbf16>, vector<12x8xbf16>, vector<10x18x8xf32> -> vector<10x18x8xf32>
    %14 = arith.addf %9, %13 : vector<10x18x8xf32>
    %15 = vector.extract_strided_slice %5 {offsets = [2, 0, 0], sizes = [10, 18, 12], strides = [1, 1, 1]} : vector<12x18x12xbf16> to vector<10x18x12xbf16>
    %c2 = arith.constant 2 : index
    %c0_9 = arith.constant 0 : index
    %c0_10 = arith.constant 0 : index
    %16 = vector.load %arg3[%c2, %c0_9, %c0_10] : memref<3x12x8xbf16, #tpu.memory_space<vmem>>, vector<1x12x8xbf16>
    %17 = vector.shape_cast %16 : vector<1x12x8xbf16> to vector<12x8xbf16>
    %cst_11 = arith.constant dense<0.000000e+00> : vector<10x18x8xf32>
    %18 = tpu.matmul %15, %17, %cst_11 {dimension_numbers = #tpu.dot_dimension_numbers<[2], [0], [0, 1], [1], [0, 0, 0, 1, 1, 1], [], []>} : vector<10x18x12xbf16>, vector<12x8xbf16>, vector<10x18x8xf32> -> vector<10x18x8xf32>
    %19 = arith.addf %14, %18 : vector<10x18x8xf32>
    %20 = tpu.iota {dimensions = array<i32: 0>} : vector<10x18x8xi32>
    %21 = tpu.iota {dimensions = array<i32: 1>} : vector<10x18x8xi32>
    %c1_i32 = arith.constant 1 : i32
    %22 = vector.broadcast %c1_i32 : i32 to vector<10x18x8xi32>
    %23 = arith.cmpi sge, %20, %22 : vector<10x18x8xi32>
    %c8_i32 = arith.constant 8 : i32
    %24 = vector.broadcast %c8_i32 : i32 to vector<10x18x8xi32>
    %25 = arith.cmpi sle, %20, %24 : vector<10x18x8xi32>
    %26 = arith.andi %23, %25 : vector<10x18x8xi1>
    %c1_i32_12 = arith.constant 1 : i32
    %27 = vector.broadcast %c1_i32_12 : i32 to vector<10x18x8xi32>
    %28 = arith.cmpi sge, %21, %27 : vector<10x18x8xi32>
    %29 = arith.andi %26, %28 : vector<10x18x8xi1>
    %c16_i32 = arith.constant 16 : i32
    %30 = vector.broadcast %c16_i32 : i32 to vector<10x18x8xi32>
    %31 = arith.cmpi sle, %21, %30 : vector<10x18x8xi32>
    %32 = arith.andi %29, %31 : vector<10x18x8xi1>
    %33 = arith.extui %32 : vector<10x18x8xi1> to vector<10x18x8xi32>
    %34 = arith.sitofp %33 : vector<10x18x8xi32> to vector<10x18x8xf32>
    %35 = arith.mulf %19, %34 : vector<10x18x8xf32>
    %cst_13 = arith.constant dense<0.000000e+00> : vector<18x8xf32>
    %36 = vector.multi_reduction <add>, %35, %cst_13 [0] : vector<10x18x8xf32> to vector<18x8xf32>
    %cst_14 = arith.constant dense<0.000000e+00> : vector<8xf32>
    %37 = vector.multi_reduction <add>, %36, %cst_14 [0] : vector<18x8xf32> to vector<8xf32>
    %38 = vector.shape_cast %37 : vector<8xf32> to vector<1x8xf32>
    %39 = arith.mulf %35, %19 : vector<10x18x8xf32>
    %cst_15 = arith.constant dense<0.000000e+00> : vector<18x8xf32>
    %40 = vector.multi_reduction <add>, %39, %cst_15 [0] : vector<10x18x8xf32> to vector<18x8xf32>
    %cst_16 = arith.constant dense<0.000000e+00> : vector<8xf32>
    %41 = vector.multi_reduction <add>, %40, %cst_16 [0] : vector<18x8xf32> to vector<8xf32>
    %42 = vector.shape_cast %41 : vector<8xf32> to vector<1x8xf32>
    %43 = tpu.concatenate %38, %42 in 0 : vector<1x8xf32>, vector<1x8xf32> -> vector<2x8xf32>
    %c0_17 = arith.constant 0 : index
    %c0_18 = arith.constant 0 : index
    %c0_19 = arith.constant 0 : index
    %44 = vector.load %arg5[%c0_17, %c0_18, %c0_19] : memref<1x2x8xf32, #tpu.memory_space<vmem>>, vector<1x2x8xf32>
    %45 = vector.shape_cast %44 : vector<1x2x8xf32> to vector<2x8xf32>
    %46 = vector.shape_cast %43 : vector<2x8xf32> to vector<1x2x8xf32>
    tpu.vector_store %arg5[%c0_17, %c0_18, %c0_19], %46 {strides = array<i32>} : memref<1x2x8xf32, #tpu.memory_space<vmem>>, vector<1x2x8xf32>,
    %47 = arith.truncf %19 : vector<10x18x8xf32> to vector<10x18x8xbf16>
    %c0_20 = arith.constant 0 : index
    %c0_21 = arith.constant 0 : index
    %c0_22 = arith.constant 0 : index
    %c0_23 = arith.constant 0 : index
    %48 = vector.load %arg4[%c0_20, %c0_21, %c0_22, %c0_23] : memref<1x10x18x8xbf16, #tpu.memory_space<vmem>>, vector<1x10x18x8xbf16>
    %49 = vector.shape_cast %48 : vector<1x10x18x8xbf16> to vector<10x18x8xbf16>
    %50 = vector.shape_cast %47 : vector<10x18x8xbf16> to vector<1x10x18x8xbf16>
    tpu.vector_store %arg4[%c0_20, %c0_21, %c0_22, %c0_23], %50 {strides = array<i32>} : memref<1x10x18x8xbf16, #tpu.memory_space<vmem>>, vector<1x10x18x8xbf16>,
    return
  }
  func.func @transform_0(%arg0: i32, %arg1: i32) -> (i32, i32, i32, i32) {
    %c2_i32 = arith.constant 2 : i32
    %0 = arith.muli %arg0, %c2_i32 : i32
    %1 = arith.addi %0, %arg1 : i32
    %c0_i32 = arith.constant 0 : i32
    %c0_i32_0 = arith.constant 0 : i32
    %c0_i32_1 = arith.constant 0 : i32
    %c0_i32_2 = arith.constant 0 : i32
    return %1, %c0_i32, %c0_i32_0, %c0_i32_1 : i32, i32, i32, i32
  }
  func.func @transform_1(%arg0: i32, %arg1: i32) -> (i32, i32, i32) {
    %c0_i32 = arith.constant 0 : i32
    %c0_i32_0 = arith.constant 0 : i32
    %c0_i32_1 = arith.constant 0 : i32
    %c0_i32_2 = arith.constant 0 : i32
    return %c0_i32, %c0_i32_0, %c0_i32_1 : i32, i32, i32
  }
  func.func @transform_2(%arg0: i32, %arg1: i32) -> (i32, i32, i32, i32) {
    %c2_i32 = arith.constant 2 : i32
    %0 = arith.muli %arg0, %c2_i32 : i32
    %1 = arith.addi %0, %arg1 : i32
    %c0_i32 = arith.constant 0 : i32
    %c0_i32_0 = arith.constant 0 : i32
    %c0_i32_1 = arith.constant 0 : i32
    %c0_i32_2 = arith.constant 0 : i32
    return %1, %c0_i32, %c0_i32_0, %c0_i32_1 : i32, i32, i32, i32
  }
  func.func @transform_3(%arg0: i32, %arg1: i32) -> (i32, i32, i32) {
    %c2_i32 = arith.constant 2 : i32
    %0 = arith.muli %arg0, %c2_i32 : i32
    %1 = arith.addi %0, %arg1 : i32
    %c0_i32 = arith.constant 0 : i32
    %c0_i32_0 = arith.constant 0 : i32
    %c0_i32_1 = arith.constant 0 : i32
    return %1, %c0_i32, %c0_i32_0 : i32, i32, i32
  }
}

module attributes {stable_mosaic.version = 11 : i64} {
  func.func @_pass2_kernel(%arg0: i32, %arg1: i32, %arg2: memref<1x10x18x8xbf16, #tpu.memory_space<vmem>>, %arg3: memref<1x8xf32, #tpu.memory_space<vmem>>, %arg4: memref<1x8xf32, #tpu.memory_space<vmem>>, %arg5: memref<3x24x16xbf16, #tpu.memory_space<vmem>>, %arg6: memref<1x8x16x16xbf16, #tpu.memory_space<vmem>>, %arg7: memref<1x2x16xf32, #tpu.memory_space<vmem>>) attributes {dimension_semantics = [#tpu.dimension_semantics<parallel>, #tpu.dimension_semantics<parallel>], iteration_bounds = array<i64: 2, 2>, scalar_prefetch = 0 : i64, scratch_operands = 0 : i64, tpu.core_type = #tpu.core_type<tc>, window_params = [{transform_indices = @transform_0, window_bounds = array<i64: 1, 10, 18, 8>}, {pipeline_mode = #tpu.pipeline_mode<synchronous>, transform_indices = @transform_1, window_bounds = array<i64: 1, 8>}, {pipeline_mode = #tpu.pipeline_mode<synchronous>, transform_indices = @transform_2, window_bounds = array<i64: 1, 8>}, {pipeline_mode = #tpu.pipeline_mode<synchronous>, transform_indices = @transform_3, window_bounds = array<i64: 3, 24, 16>}, {transform_indices = @transform_4, window_bounds = array<i64: 1, 8, 16, 16>}, {transform_indices = @transform_5, window_bounds = array<i64: 1, 2, 16>}]} {
    %c0 = arith.constant 0 : index
    %c0_0 = arith.constant 0 : index
    %c0_1 = arith.constant 0 : index
    %c0_2 = arith.constant 0 : index
    %0 = vector.load %arg2[%c0, %c0_0, %c0_1, %c0_2] : memref<1x10x18x8xbf16, #tpu.memory_space<vmem>>, vector<1x10x18x8xbf16>
    %1 = vector.shape_cast %0 : vector<1x10x18x8xbf16> to vector<10x18x8xbf16>
    %2 = arith.extf %1 : vector<10x18x8xbf16> to vector<10x18x8xf32>
    %c0_3 = arith.constant 0 : index
    %c0_4 = arith.constant 0 : index
    %3 = vector.load %arg3[%c0_3, %c0_4] : memref<1x8xf32, #tpu.memory_space<vmem>>, vector<1x8xf32>
    %4 = vector.shape_cast %3 : vector<1x8xf32> to vector<8xf32>
    %5 = vector.shape_cast %4 : vector<8xf32> to vector<1x1x8xf32>
    %6 = vector.broadcast %5 : vector<1x1x8xf32> to vector<10x18x8xf32>
    %7 = arith.mulf %2, %6 : vector<10x18x8xf32>
    %c0_5 = arith.constant 0 : index
    %c0_6 = arith.constant 0 : index
    %8 = vector.load %arg4[%c0_5, %c0_6] : memref<1x8xf32, #tpu.memory_space<vmem>>, vector<1x8xf32>
    %9 = vector.shape_cast %8 : vector<1x8xf32> to vector<8xf32>
    %10 = vector.shape_cast %9 : vector<8xf32> to vector<1x1x8xf32>
    %11 = vector.broadcast %10 : vector<1x1x8xf32> to vector<10x18x8xf32>
    %12 = arith.addf %7, %11 : vector<10x18x8xf32>
    %cst = arith.constant 0.000000e+00 : f32
    %13 = vector.broadcast %cst : f32 to vector<10x18x8xf32>
    %14 = arith.maximumf %12, %13 : vector<10x18x8xf32>
    %15 = tpu.iota {dimensions = array<i32: 0>} : vector<10x18x8xi32>
    %16 = tpu.iota {dimensions = array<i32: 1>} : vector<10x18x8xi32>
    %c8_i32 = arith.constant 8 : i32
    %17 = arith.muli %arg1, %c8_i32 : i32
    %c1_i32 = arith.constant 1 : i32
    %18 = arith.subi %17, %c1_i32 : i32
    %19 = vector.broadcast %18 : i32 to vector<10x18x8xi32>
    %20 = arith.addi %19, %15 : vector<10x18x8xi32>
    %c0_i32 = arith.constant 0 : i32
    %21 = vector.broadcast %c0_i32 : i32 to vector<10x18x8xi32>
    %22 = arith.cmpi sge, %20, %21 : vector<10x18x8xi32>
    %c16_i32 = arith.constant 16 : i32
    %23 = vector.broadcast %c16_i32 : i32 to vector<10x18x8xi32>
    %24 = arith.cmpi slt, %20, %23 : vector<10x18x8xi32>
    %25 = arith.andi %22, %24 : vector<10x18x8xi1>
    %c1_i32_7 = arith.constant 1 : i32
    %26 = vector.broadcast %c1_i32_7 : i32 to vector<10x18x8xi32>
    %27 = arith.cmpi sge, %16, %26 : vector<10x18x8xi32>
    %28 = arith.andi %25, %27 : vector<10x18x8xi1>
    %c16_i32_8 = arith.constant 16 : i32
    %29 = vector.broadcast %c16_i32_8 : i32 to vector<10x18x8xi32>
    %30 = arith.cmpi sle, %16, %29 : vector<10x18x8xi32>
    %31 = arith.andi %28, %30 : vector<10x18x8xi1>
    %cst_9 = arith.constant 0.000000e+00 : f32
    %32 = vector.broadcast %cst_9 : f32 to vector<10x18x8xf32>
    %33 = arith.select %31, %14, %32 : vector<10x18x8xi1>, vector<10x18x8xf32>
    %34 = arith.truncf %33 : vector<10x18x8xf32> to vector<10x18x8xbf16>
    %35 = vector.extract_strided_slice %34 {offsets = [0, 0, 0], sizes = [10, 16, 8], strides = [1, 1, 1]} : vector<10x18x8xbf16> to vector<10x16x8xbf16>
    %36 = vector.extract_strided_slice %34 {offsets = [0, 1, 0], sizes = [10, 16, 8], strides = [1, 1, 1]} : vector<10x18x8xbf16> to vector<10x16x8xbf16>
    %37 = vector.extract_strided_slice %34 {offsets = [0, 2, 0], sizes = [10, 16, 8], strides = [1, 1, 1]} : vector<10x18x8xbf16> to vector<10x16x8xbf16>
    %38 = tpu.concatenate %35, %36, %37 in 2 : vector<10x16x8xbf16>, vector<10x16x8xbf16>, vector<10x16x8xbf16> -> vector<10x16x24xbf16>
    %39 = vector.extract_strided_slice %38 {offsets = [0, 0, 0], sizes = [8, 16, 24], strides = [1, 1, 1]} : vector<10x16x24xbf16> to vector<8x16x24xbf16>
    %c0_10 = arith.constant 0 : index
    %c0_11 = arith.constant 0 : index
    %c0_12 = arith.constant 0 : index
    %40 = vector.load %arg5[%c0_10, %c0_11, %c0_12] : memref<3x24x16xbf16, #tpu.memory_space<vmem>>, vector<1x24x16xbf16>
    %41 = vector.shape_cast %40 : vector<1x24x16xbf16> to vector<24x16xbf16>
    %cst_13 = arith.constant dense<0.000000e+00> : vector<8x16x16xf32>
    %42 = tpu.matmul %39, %41, %cst_13 {dimension_numbers = #tpu.dot_dimension_numbers<[2], [0], [0, 1], [1], [0, 0, 0, 1, 1, 1], [], []>} : vector<8x16x24xbf16>, vector<24x16xbf16>, vector<8x16x16xf32> -> vector<8x16x16xf32>
    %43 = vector.extract_strided_slice %38 {offsets = [1, 0, 0], sizes = [8, 16, 24], strides = [1, 1, 1]} : vector<10x16x24xbf16> to vector<8x16x24xbf16>
    %c1 = arith.constant 1 : index
    %c0_14 = arith.constant 0 : index
    %c0_15 = arith.constant 0 : index
    %44 = vector.load %arg5[%c1, %c0_14, %c0_15] : memref<3x24x16xbf16, #tpu.memory_space<vmem>>, vector<1x24x16xbf16>
    %45 = vector.shape_cast %44 : vector<1x24x16xbf16> to vector<24x16xbf16>
    %cst_16 = arith.constant dense<0.000000e+00> : vector<8x16x16xf32>
    %46 = tpu.matmul %43, %45, %cst_16 {dimension_numbers = #tpu.dot_dimension_numbers<[2], [0], [0, 1], [1], [0, 0, 0, 1, 1, 1], [], []>} : vector<8x16x24xbf16>, vector<24x16xbf16>, vector<8x16x16xf32> -> vector<8x16x16xf32>
    %47 = arith.addf %42, %46 : vector<8x16x16xf32>
    %48 = vector.extract_strided_slice %38 {offsets = [2, 0, 0], sizes = [8, 16, 24], strides = [1, 1, 1]} : vector<10x16x24xbf16> to vector<8x16x24xbf16>
    %c2 = arith.constant 2 : index
    %c0_17 = arith.constant 0 : index
    %c0_18 = arith.constant 0 : index
    %49 = vector.load %arg5[%c2, %c0_17, %c0_18] : memref<3x24x16xbf16, #tpu.memory_space<vmem>>, vector<1x24x16xbf16>
    %50 = vector.shape_cast %49 : vector<1x24x16xbf16> to vector<24x16xbf16>
    %cst_19 = arith.constant dense<0.000000e+00> : vector<8x16x16xf32>
    %51 = tpu.matmul %48, %50, %cst_19 {dimension_numbers = #tpu.dot_dimension_numbers<[2], [0], [0, 1], [1], [0, 0, 0, 1, 1, 1], [], []>} : vector<8x16x24xbf16>, vector<24x16xbf16>, vector<8x16x16xf32> -> vector<8x16x16xf32>
    %52 = arith.addf %47, %51 : vector<8x16x16xf32>
    %cst_20 = arith.constant dense<0.000000e+00> : vector<16x16xf32>
    %53 = vector.multi_reduction <add>, %52, %cst_20 [0] : vector<8x16x16xf32> to vector<16x16xf32>
    %cst_21 = arith.constant dense<0.000000e+00> : vector<16xf32>
    %54 = vector.multi_reduction <add>, %53, %cst_21 [0] : vector<16x16xf32> to vector<16xf32>
    %55 = vector.shape_cast %54 : vector<16xf32> to vector<1x16xf32>
    %56 = arith.mulf %52, %52 : vector<8x16x16xf32>
    %cst_22 = arith.constant dense<0.000000e+00> : vector<16x16xf32>
    %57 = vector.multi_reduction <add>, %56, %cst_22 [0] : vector<8x16x16xf32> to vector<16x16xf32>
    %cst_23 = arith.constant dense<0.000000e+00> : vector<16xf32>
    %58 = vector.multi_reduction <add>, %57, %cst_23 [0] : vector<16x16xf32> to vector<16xf32>
    %59 = vector.shape_cast %58 : vector<16xf32> to vector<1x16xf32>
    %60 = tpu.concatenate %55, %59 in 0 : vector<1x16xf32>, vector<1x16xf32> -> vector<2x16xf32>
    %c0_24 = arith.constant 0 : index
    %c0_25 = arith.constant 0 : index
    %c0_26 = arith.constant 0 : index
    %61 = vector.load %arg7[%c0_24, %c0_25, %c0_26] : memref<1x2x16xf32, #tpu.memory_space<vmem>>, vector<1x2x16xf32>
    %62 = vector.shape_cast %61 : vector<1x2x16xf32> to vector<2x16xf32>
    %63 = vector.shape_cast %60 : vector<2x16xf32> to vector<1x2x16xf32>
    tpu.vector_store %arg7[%c0_24, %c0_25, %c0_26], %63 {strides = array<i32>} : memref<1x2x16xf32, #tpu.memory_space<vmem>>, vector<1x2x16xf32>,
    %64 = arith.truncf %52 : vector<8x16x16xf32> to vector<8x16x16xbf16>
    %c0_27 = arith.constant 0 : index
    %c0_28 = arith.constant 0 : index
    %c0_29 = arith.constant 0 : index
    %c0_30 = arith.constant 0 : index
    %65 = vector.load %arg6[%c0_27, %c0_28, %c0_29, %c0_30] : memref<1x8x16x16xbf16, #tpu.memory_space<vmem>>, vector<1x8x16x16xbf16>
    %66 = vector.shape_cast %65 : vector<1x8x16x16xbf16> to vector<8x16x16xbf16>
    %67 = vector.shape_cast %64 : vector<8x16x16xbf16> to vector<1x8x16x16xbf16>
    tpu.vector_store %arg6[%c0_27, %c0_28, %c0_29, %c0_30], %67 {strides = array<i32>} : memref<1x8x16x16xbf16, #tpu.memory_space<vmem>>, vector<1x8x16x16xbf16>,
    return
  }
  func.func @transform_0(%arg0: i32, %arg1: i32) -> (i32, i32, i32, i32) {
    %c2_i32 = arith.constant 2 : i32
    %0 = arith.muli %arg0, %c2_i32 : i32
    %1 = arith.addi %0, %arg1 : i32
    %c0_i32 = arith.constant 0 : i32
    %c0_i32_0 = arith.constant 0 : i32
    %c0_i32_1 = arith.constant 0 : i32
    %c0_i32_2 = arith.constant 0 : i32
    return %1, %c0_i32, %c0_i32_0, %c0_i32_1 : i32, i32, i32, i32
  }
  func.func @transform_1(%arg0: i32, %arg1: i32) -> (i32, i32) {
    %c0_i32 = arith.constant 0 : i32
    %c0_i32_0 = arith.constant 0 : i32
    %c0_i32_1 = arith.constant 0 : i32
    return %c0_i32, %c0_i32_0 : i32, i32
  }
  func.func @transform_2(%arg0: i32, %arg1: i32) -> (i32, i32) {
    %c0_i32 = arith.constant 0 : i32
    %c0_i32_0 = arith.constant 0 : i32
    %c0_i32_1 = arith.constant 0 : i32
    return %c0_i32, %c0_i32_0 : i32, i32
  }
  func.func @transform_3(%arg0: i32, %arg1: i32) -> (i32, i32, i32) {
    %c0_i32 = arith.constant 0 : i32
    %c0_i32_0 = arith.constant 0 : i32
    %c0_i32_1 = arith.constant 0 : i32
    %c0_i32_2 = arith.constant 0 : i32
    return %c0_i32, %c0_i32_0, %c0_i32_1 : i32, i32, i32
  }
  func.func @transform_4(%arg0: i32, %arg1: i32) -> (i32, i32, i32, i32) {
    %c0_i32 = arith.constant 0 : i32
    %c0_i32_0 = arith.constant 0 : i32
    %c0_i32_1 = arith.constant 0 : i32
    return %arg0, %arg1, %c0_i32, %c0_i32_0 : i32, i32, i32, i32
  }
  func.func @transform_5(%arg0: i32, %arg1: i32) -> (i32, i32, i32) {
    %c2_i32 = arith.constant 2 : i32
    %0 = arith.muli %arg0, %c2_i32 : i32
    %1 = arith.addi %0, %arg1 : i32
    %c0_i32 = arith.constant 0 : i32
    %c0_i32_0 = arith.constant 0 : i32
    %c0_i32_1 = arith.constant 0 : i32
    return %1, %c0_i32, %c0_i32_0 : i32, i32, i32
  }
}

module attributes {stable_mosaic.version = 11 : i64} {
  func.func @_pass3_kernel(%arg0: i32, %arg1: i32, %arg2: memref<1x8x16x16xbf16, #tpu.memory_space<vmem>>, %arg3: memref<1x16xf32, #tpu.memory_space<vmem>>, %arg4: memref<1x16xf32, #tpu.memory_space<vmem>>, %arg5: memref<1x8x16x16xf32, #tpu.memory_space<vmem>>) attributes {dimension_semantics = [#tpu.dimension_semantics<parallel>, #tpu.dimension_semantics<parallel>], iteration_bounds = array<i64: 2, 2>, scalar_prefetch = 0 : i64, scratch_operands = 0 : i64, tpu.core_type = #tpu.core_type<tc>, window_params = [{transform_indices = @transform_0, window_bounds = array<i64: 1, 8, 16, 16>}, {pipeline_mode = #tpu.pipeline_mode<synchronous>, transform_indices = @transform_1, window_bounds = array<i64: 1, 16>}, {pipeline_mode = #tpu.pipeline_mode<synchronous>, transform_indices = @transform_2, window_bounds = array<i64: 1, 16>}, {transform_indices = @transform_3, window_bounds = array<i64: 1, 8, 16, 16>}]} {
    %c0 = arith.constant 0 : index
    %c0_0 = arith.constant 0 : index
    %c0_1 = arith.constant 0 : index
    %c0_2 = arith.constant 0 : index
    %0 = vector.load %arg2[%c0, %c0_0, %c0_1, %c0_2] : memref<1x8x16x16xbf16, #tpu.memory_space<vmem>>, vector<1x8x16x16xbf16>
    %1 = vector.shape_cast %0 : vector<1x8x16x16xbf16> to vector<8x16x16xbf16>
    %2 = arith.extf %1 : vector<8x16x16xbf16> to vector<8x16x16xf32>
    %c0_3 = arith.constant 0 : index
    %c0_4 = arith.constant 0 : index
    %3 = vector.load %arg3[%c0_3, %c0_4] : memref<1x16xf32, #tpu.memory_space<vmem>>, vector<1x16xf32>
    %4 = vector.shape_cast %3 : vector<1x16xf32> to vector<16xf32>
    %5 = vector.shape_cast %4 : vector<16xf32> to vector<1x1x16xf32>
    %6 = vector.broadcast %5 : vector<1x1x16xf32> to vector<8x16x16xf32>
    %7 = arith.mulf %2, %6 : vector<8x16x16xf32>
    %c0_5 = arith.constant 0 : index
    %c0_6 = arith.constant 0 : index
    %8 = vector.load %arg4[%c0_5, %c0_6] : memref<1x16xf32, #tpu.memory_space<vmem>>, vector<1x16xf32>
    %9 = vector.shape_cast %8 : vector<1x16xf32> to vector<16xf32>
    %10 = vector.shape_cast %9 : vector<16xf32> to vector<1x1x16xf32>
    %11 = vector.broadcast %10 : vector<1x1x16xf32> to vector<8x16x16xf32>
    %12 = arith.addf %7, %11 : vector<8x16x16xf32>
    %cst = arith.constant 0.000000e+00 : f32
    %13 = vector.broadcast %cst : f32 to vector<8x16x16xf32>
    %14 = arith.maximumf %12, %13 : vector<8x16x16xf32>
    %c0_7 = arith.constant 0 : index
    %c0_8 = arith.constant 0 : index
    %c0_9 = arith.constant 0 : index
    %c0_10 = arith.constant 0 : index
    %15 = vector.load %arg5[%c0_7, %c0_8, %c0_9, %c0_10] : memref<1x8x16x16xf32, #tpu.memory_space<vmem>>, vector<1x8x16x16xf32>
    %16 = vector.shape_cast %15 : vector<1x8x16x16xf32> to vector<8x16x16xf32>
    %17 = vector.shape_cast %14 : vector<8x16x16xf32> to vector<1x8x16x16xf32>
    tpu.vector_store %arg5[%c0_7, %c0_8, %c0_9, %c0_10], %17 {strides = array<i32>} : memref<1x8x16x16xf32, #tpu.memory_space<vmem>>, vector<1x8x16x16xf32>,
    return
  }
  func.func @transform_0(%arg0: i32, %arg1: i32) -> (i32, i32, i32, i32) {
    %c0_i32 = arith.constant 0 : i32
    %c0_i32_0 = arith.constant 0 : i32
    %c0_i32_1 = arith.constant 0 : i32
    return %arg0, %arg1, %c0_i32, %c0_i32_0 : i32, i32, i32, i32
  }
  func.func @transform_1(%arg0: i32, %arg1: i32) -> (i32, i32) {
    %c0_i32 = arith.constant 0 : i32
    %c0_i32_0 = arith.constant 0 : i32
    %c0_i32_1 = arith.constant 0 : i32
    return %c0_i32, %c0_i32_0 : i32, i32
  }
  func.func @transform_2(%arg0: i32, %arg1: i32) -> (i32, i32) {
    %c0_i32 = arith.constant 0 : i32
    %c0_i32_0 = arith.constant 0 : i32
    %c0_i32_1 = arith.constant 0 : i32
    return %c0_i32, %c0_i32_0 : i32, i32
  }
  func.func @transform_3(%arg0: i32, %arg1: i32) -> (i32, i32, i32, i32) {
    %c0_i32 = arith.constant 0 : i32
    %c0_i32_0 = arith.constant 0 : i32
    %c0_i32_1 = arith.constant 0 : i32
    return %arg0, %arg1, %c0_i32, %c0_i32_0 : i32, i32, i32, i32
  }
}

</mosaic_0001>

<bundles_post_ra>
// kernel: conv_block_forward.5
= control target key start
LH: loop header
LB: loop body
LE: loop exit
PB: predicated region body
PF: predicated region fallthrough
CT: control target
= control target key end

     0   :  { %s581_s12 = smov 0   ;;  %s583_s13 = smov 0   ;;  %s722_s0 = inlined_call_operand.vmem [shape: bf16[2,16,16,16], index: 0, kind: input, shape index: {}]   ;;  %s723_s1 = inlined_call_operand.vmem [shape: f32[1,16], index: 1, kind: input, shape index: {}]   ;;  %s724_s2 = inlined_call_operand.vmem [shape: f32[1,16], index: 2, kind: input, shape index: {}]   ;;  %s725_s3 = inlined_call_operand.vmem [shape: f32[2,16,16,16], index: 3, kind: output, shape index: {}]  }
   0x1   :  { %s585_s14 = smov 0   ;;  %s587_s15 = smov 0  }
   0x2   :  { %s589_s16 = smov 0  }
   0x3 LB: > { %s22_s17 = sadd.s32 1, %s551_s14  ;;  %s25_s18 = sadd.s32 1, %s555_s15  ;;  %s559_s16 = sphi %s589_s16, %s13_s16   ;;  %s555_s15 = sphi %s587_s15, %s729_s15   ;;  %s551_s14 = sphi %s585_s14, %s728_s14   ;;  %s547_s13 = sphi %s583_s13, %s727_s13   ;;  %s543_s12 = sphi %s581_s12, %s726_s12  }
   0x4   : > { %p23_p0 = scmp.ge.s32.totalorder %s22_s17, 2  ;;  %p429_p1 = scmp.ge.s32.totalorder %s559_s16, 1 }
   0x5   : > { %p159_p2 = scmp.lt.s32.totalorder %s559_s16, 5 }
   0x6   : > { %s731_s17 = smov (%p23_p0, %s22_s17), 0  ;;  %s733_s18 = smov (!%p23_p0, %s25_s18), %s555_s15 }
   0x7   : > { %p160_p3 = pnand %p429_p1, %p159_p2  ;;  %p27_p4 = scmp.ge.s32.totalorder %s733_s18, 2 }
   0x8   : > { %s430_s19 = sshll.u32 (!%p160_p3), %s543_s12, 3  ;;  %p194_p5 = scmp.lt.s32.totalorder (!%p160_p3), %s547_s13, 1 }
   0x9   : > { %s735_s18 = smov (%p27_p4, %s733_s18), 0  ;;  %163 = sbr.rel (%p160_p3) target bundleno = 40 (0x28), region = 32 }
   0xa   : > { %p196_p6 = scmp.lt.s32.totalorder (!%p160_p3), %s430_s19, 15 }
   0xe   : > { %s737_s13 = smov (!%p194_p5, %s547_s13), 1  ;;  %s739_s19 = smov (!%p196_p6, %s430_s19), 15  ;;  %v622_v0 = vld [vmem:[%s723_s1] ss:$0 sm:$0xff]  ;;  %vm309_vm0 = vcmask 130048  }
   0xf   : > { %s432_s20 = sshll.u32 %s737_s13, 5  ;;  %s431_s21 = sshll.u32 %s739_s19, 1  ;;  %v631_v9 = vld [vmem:[%s724_s2] ss:$0 sm:$0xff] }
  0x10   : > { %s611_s22 = sadd.s32 %s432_s20, %s431_s21 }
  0x11   : > { %s433_s23 = sshll.u32 %s611_s22, 2  ;;  %s437_s4 = sshll.u32 %s611_s22, 3 }
  0x12   : > { %s617_s26 = scalar_lea.vmem %s722_s0, %s433_s23  ;;  %s649_s7 = scalar_lea.vmem %s725_s3, %s437_s4 }
  0x13   : > { %v443_v1 = vld [vmem:[%s617_s26] sm:$0xff]   ;;  %v474_v2 = vld [vmem:[%s617_s26 + $0x8] sm:$0xff]   ;;  %v475_v3 = vld [vmem:[%s617_s26 + $0x10] sm:$0xff]  }
  0x14   : > { %v444_v4 = vunpack.c.l.bf16 %v443_v1  ;;  %v445_v5 = vunpack.c.h.bf16 %v443_v1  ;;  %v448_v6 = vunpack.c.l.bf16 %v474_v2  ;;  %v449_v7 = vunpack.c.h.bf16 %v474_v2  ;;  %v476_v8 = vld [vmem:[%s617_s26 + $0x18] sm:$0xff]   ;;  %v477_v30 = vld [vmem:[%s617_s26 + $0x20] sm:$0xff]   ;;  %v478_v31 = vld [vmem:[%s617_s26 + $0x28] sm:$0xff]  }
  0x15   : > { %v452_v10 = vunpack.c.l.bf16 %v475_v3  ;;  %v453_v11 = vunpack.c.h.bf16 %v475_v3  ;;  %v456_v12 = vunpack.c.l.bf16 %v476_v8  ;;  %v457_v13 = vunpack.c.h.bf16 %v476_v8  ;;  %v479_v36 = vld [vmem:[%s617_s26 + $0x30] sm:$0xff]   ;;  %v480_v37 = vld [vmem:[%s617_s26 + $0x38] sm:$0xff]  }
  0x16   : > { %v254_v14 = vmul.f32 %v444_v4, %v622_v0  ;;  %v255_v15 = vmul.f32 %v445_v5, %v622_v0  ;;  %v256_v16 = vmul.f32 %v448_v6, %v622_v0  ;;  %v257_v17 = vmul.f32 %v449_v7, %v622_v0 }
  0x17   : > { %v258_v18 = vmul.f32 %v452_v10, %v622_v0  ;;  %v259_v19 = vmul.f32 %v453_v11, %v622_v0  ;;  %v260_v20 = vmul.f32 %v456_v12, %v622_v0  ;;  %v261_v21 = vmul.f32 %v457_v13, %v622_v0 }
  0x18   : > { %v277_v22 = vadd.f32 %v631_v9, %v254_v14  ;;  %v278_v23 = vadd.f32 %v631_v9, %v255_v15  ;;  %v279_v24 = vadd.f32 %v631_v9, %v256_v16  ;;  %v280_v25 = vadd.f32 %v631_v9, %v257_v17 }
  0x19   : > { %v281_v26 = vadd.f32 %v631_v9, %v258_v18  ;;  %v282_v27 = vadd.f32 %v631_v9, %v259_v19  ;;  %v283_v28 = vadd.f32 %v631_v9, %v260_v20  ;;  %v284_v29 = vadd.f32 %v631_v9, %v261_v21 }
  0x1a   : > { %v293_v32 = vmax.f32 %v277_v22, 0.0  ;;  %v294_v33 = vmax.f32 %v278_v23, 0.0  ;;  %v295_v34 = vmax.f32 %v279_v24, 0.0  ;;  %v296_v35 = vmax.f32 %v280_v25, 0.0 }
  0x1b   : > { %v297_v38 = vmax.f32 %v281_v26, 0.0  ;;  %v298_v39 = vmax.f32 %v282_v27, 0.0  ;;  %v299_v40 = vmax.f32 %v283_v28, 0.0  ;;  %v300_v41 = vmax.f32 %v284_v29, 0.0 }
  0x1c   : > { %310 = vst.msk [vmem:[%s649_s7] sm:$0xff] %vm309_vm0, %v293_v32  ;;  %311 = vst.msk [vmem:[%s649_s7 + $0x8] sm:$0xff] %vm309_vm0, %v294_v33  ;;  %v460_v42 = vunpack.c.l.bf16 %v477_v30  ;;  %v461_v43 = vunpack.c.h.bf16 %v477_v30  ;;  %v464_v44 = vunpack.c.l.bf16 %v478_v31  ;;  %v465_v45 = vunpack.c.h.bf16 %v478_v31 }
  0x1d   : > { %312 = vst.msk [vmem:[%s649_s7 + $0x10] sm:$0xff] %vm309_vm0, %v295_v34  ;;  %313 = vst.msk [vmem:[%s649_s7 + $0x18] sm:$0xff] %vm309_vm0, %v296_v35  ;;  %v468_v46 = vunpack.c.l.bf16 %v479_v36  ;;  %v469_v47 = vunpack.c.h.bf16 %v479_v36  ;;  %v472_v48 = vunpack.c.l.bf16 %v480_v37  ;;  %v473_v49 = vunpack.c.h.bf16 %v480_v37 }
  0x1e   : > { %314 = vst.msk [vmem:[%s649_s7 + $0x20] sm:$0xff] %vm309_vm0, %v297_v38  ;;  %315 = vst.msk [vmem:[%s649_s7 + $0x28] sm:$0xff] %vm309_vm0, %v298_v39  ;;  %v262_v50 = vmul.f32 %v460_v42, %v622_v0  ;;  %v263_v51 = vmul.f32 %v461_v43, %v622_v0  ;;  %v264_v52 = vmul.f32 %v464_v44, %v622_v0 }
  0x1f   : > { %316 = vst.msk [vmem:[%s649_s7 + $0x30] sm:$0xff] %vm309_vm0, %v299_v40  ;;  %317 = vst.msk [vmem:[%s649_s7 + $0x38] sm:$0xff] %vm309_vm0, %v300_v41  ;;  %v265_v53 = vmul.f32 %v465_v45, %v622_v0  ;;  %v266_v54 = vmul.f32 %v468_v46, %v622_v0  ;;  %v267_v55 = vmul.f32 %v469_v47, %v622_v0 }
  0x20   : > { %v268_v56 = vmul.f32 %v472_v48, %v622_v0  ;;  %v269_v57 = vmul.f32 %v473_v49, %v622_v0  ;;  %v285_v58 = vadd.f32 %v631_v9, %v262_v50  ;;  %v286_v59 = vadd.f32 %v631_v9, %v263_v51 }
  0x21   : > { %v287_v60 = vadd.f32 %v631_v9, %v264_v52  ;;  %v288_v61 = vadd.f32 %v631_v9, %v265_v53  ;;  %v289_v62 = vadd.f32 %v631_v9, %v266_v54  ;;  %v290_v63 = vadd.f32 %v631_v9, %v267_v55 }
  0x22   : > { %v291_v0 = vadd.f32 %v631_v9, %v268_v56  ;;  %v292_v1 = vadd.f32 %v631_v9, %v269_v57  ;;  %v301_v2 = vmax.f32 %v285_v58, 0.0  ;;  %v302_v3 = vmax.f32 %v286_v59, 0.0 }
  0x23   : > { %v303_v4 = vmax.f32 %v287_v60, 0.0  ;;  %v304_v5 = vmax.f32 %v288_v61, 0.0  ;;  %v305_v6 = vmax.f32 %v289_v62, 0.0  ;;  %v306_v7 = vmax.f32 %v290_v63, 0.0 }
  0x24   : > { %v307_v8 = vmax.f32 %v291_v0, 0.0  ;;  %v308_v10 = vmax.f32 %v292_v1, 0.0  ;;  %318 = vst.msk [vmem:[%s649_s7 + $0x40] sm:$0xff] %vm309_vm0, %v301_v2  ;;  %319 = vst.msk [vmem:[%s649_s7 + $0x48] sm:$0xff] %vm309_vm0, %v302_v3 }
  0x25   : > { %320 = vst.msk [vmem:[%s649_s7 + $0x50] sm:$0xff] %vm309_vm0, %v303_v4  ;;  %321 = vst.msk [vmem:[%s649_s7 + $0x58] sm:$0xff] %vm309_vm0, %v304_v5 }
  0x26   : > { %322 = vst.msk [vmem:[%s649_s7 + $0x60] sm:$0xff] %vm309_vm0, %v305_v6  ;;  %323 = vst.msk [vmem:[%s649_s7 + $0x68] sm:$0xff] %vm309_vm0, %v306_v7 }
  0x27   : > { %324 = vst.msk [vmem:[%s649_s7 + $0x70] sm:$0xff] %vm309_vm0, %v307_v8  ;;  %325 = vst.msk [vmem:[%s649_s7 + $0x78] sm:$0xff] %vm309_vm0, %v308_v10 }
  0x28 PF: > { %s13_s16 = sadd.s32 1, %s559_s16   ;;  %s726_s12 = smov %s551_s14 }
  0x29   : > { %p10_p7 = scmp.ge.s32.totalorder %s13_s16, 6   ;;  %s727_s13 = smov %s555_s15 }
  0x2a   : > { %s728_s14 = smov %s731_s17  ;;  %s729_s15 = smov %s735_s18 }
  0x2b   :  { %12 = sbr.rel (!%p10_p7) target bundleno = 3 (0x3), region = 62 }

// kernel: conv_block_forward.4
= control target key start
LH: loop header
LB: loop body
LE: loop exit
PB: predicated region body
PF: predicated region fallthrough
CT: control target
= control target key end

     0   :  { %s1882_s18 = smov 0   ;;  %s1884_s19 = smov 0   ;;  %s2459_s0 = inlined_call_operand.vmem [shape: bf16[4,10,18,8], index: 0, kind: input, shape index: {}]   ;;  %s2460_s1 = inlined_call_operand.vmem [shape: f32[1,8], index: 1, kind: input, shape index: {}]   ;;  %s2461_s2 = inlined_call_operand.vmem [shape: f32[1,8], index: 2, kind: input, shape index: {}]   ;;  %s2462_s3 = inlined_call_operand.vmem [shape: bf16[3,24,16], index: 3, kind: input, shape index: {}]   ;;  %s2463_s4 = inlined_call_operand.vmem [shape: bf16[2,16,16,16], index: 4, kind: output, shape index: {0}]   ;;  %s2464_s5 = inlined_call_operand.vmem [shape: f32[4,2,16], index: 5, kind: output, shape index: {1}]  }
   0x1   :  { %s1886_s20 = smov 0   ;;  %s1888_s21 = smov 0  }
   0x2   :  { %s1890_s22 = smov 0  }
   0x3 LB: > { %s25_s23 = sadd.s32 1, %s1840_s20  ;;  %s28_s24 = sadd.s32 1, %s1844_s21  ;;  %s1848_s22 = sphi %s1890_s22, %s16_s22   ;;  %s1844_s21 = sphi %s1888_s21, %s2486_s21   ;;  %s1840_s20 = sphi %s1886_s20, %s2485_s20   ;;  %s1836_s19 = sphi %s1884_s19, %s2484_s19   ;;  %s1832_s18 = sphi %s1882_s18, %s2483_s18  }
   0x4   : > { %p26_p0 = scmp.ge.s32.totalorder %s25_s23, 2  ;;  %p1556_p1 = scmp.ge.s32.totalorder %s1848_s22, 1 }
   0x5   : > { %p216_p2 = scmp.lt.s32.totalorder %s1848_s22, 5 }
   0x6   : > { %s2488_s23 = smov (%p26_p0, %s25_s23), 0  ;;  %s2490_s24 = smov (!%p26_p0, %s28_s24), %s1844_s21 }
   0x7   : > { %p217_p3 = pnand %p1556_p1, %p216_p2  ;;  %p30_p4 = scmp.ge.s32.totalorder %s2490_s24, 2 }
   0x8   : > { %s1557_s25 = sshll.u32 (!%p217_p3), %s1836_s19, 1  ;;  %s1917_s27 = sshll.u32 (!%p217_p3), %s1832_s18, 3 }
   0x9   : > { %s2492_s24 = smov (%p30_p4, %s2490_s24), 0  ;;  %220 = sbr.rel (%p217_p3) target bundleno = 463 (0x1cf), region = 36 }
   0xa   : > { %s258_s26 = sadd.s32 (!%p217_p3), %s1832_s18, %s1557_s25  ;;  %s1568_s29 = sadd.s32 (!%p217_p3), 4294967295, %s1917_s27 }
   0xb   : > { %p259_p5 = scmp.lt.s32.totalorder (!%p217_p3), %s258_s26, 3  ;;  %s1850_s12 = smov (!%p217_p3), 16  }
   0xc   : > { %s1851_s13 = smov (!%p217_p3), 8   ;;  %p267_p6 = scmp.lt.s32.totalorder (!%p217_p3), %s1836_s19, 1 }
   0xd   : > { %p269_p7 = scmp.lt.s32.totalorder (!%p217_p3), %s1917_s27, 15 }
   0xe   : > { %v450_v0 = vlaneseq  ;;  %s2494_s26 = smov (!%p259_p5, %s258_s26), 3  ;;  %v1934_v3 = vld [vmem:[%s2460_s1] ss:$0 sm:$0xff]  ;;  %v1936_v4 = vstv %s1568_s29  ;;  %vm773_vm5 = vcmask 1046528   ;;  %s2496_s19 = smov (!%p267_p6, %s1836_s19), 1 }
   0xf   : > { %s1761_s28 = smul.u32 120, %s2494_s26  ;;  %v462_v7 = vadd.s32 6, %v1936_v4  ;;  %v461_v13 = vadd.s32 5, %v1936_v4  ;;  %v1949_v14 = vld [vmem:[%s2461_s2] ss:$0 sm:$0xff]  ;;  %v457_v20 = vadd.s32 1, %v1936_v4 }
  0x10   : > { %v1915_v1 = vshrl.u32 %v450_v0, 7  ;;  %s2498_s27 = smov (!%p269_p7, %s1917_s27), 15  ;;  %s1561_s10 = sshll.u32 %s2496_s19, 5 }
  0x11   : > { %s1929_s7 = scalar_lea.vmem %s2459_s0, %s1761_s28  ;;  %vm472_vm2 = vcmp.ge.s32.totalorder %v462_v7, 0  ;;  %vm482_vm3 = vcmp.lt.s32.totalorder %v462_v7, 16  ;;  %vm471_vm7 = vcmp.ge.s32.totalorder %v461_v13, 0  ;;  %vm481_vm8 = vcmp.lt.s32.totalorder %v461_v13, 16  ;;  %s1560_s9 = sshll.u32 %s2498_s27, 1 }
  0x12   : > { %v1922_v2 = vadd.s32 16, %v1915_v1  ;;  %v1661_v5 = vld [vmem:[%s1929_s7 + $0x48] sm:$0xff]   ;;  %v306_v6 = vld [vmem:[%s1929_s7 + $0x50] sm:$0x1]  ;;  %vm496_vm0 = vcmp.ge.s32.totalorder %v1915_v1, 1  ;;  %v301_v11 = vld [vmem:[%s1929_s7 + $0x3c] sm:$0xff]   ;;  %s273_s11 = sadd.s32 %s1561_s10, %s1560_s9 }
  0x13   : > { %v1653_v8 = vunpack.c.l.bf16 %v1661_v5  ;;  %v1654_v9 = vunpack.c.h.bf16 %v1661_v5  ;;  %v336_v10 = vunpack.c.l.bf16 %v306_v6  ;;  %v303_v12 = vld [vmem:[%s1929_s7 + $0x44] sm:$0x1]  ;;  %v331_v15 = vunpack.c.l.bf16 %v301_v11  ;;  %vm1954_vm4 = vmand %vm472_vm2, %vm482_vm3  ;;  %v1659_v22 = vld [vmem:[%s1929_s7 + $0x18] sm:$0xff]   ;;  %s1564_s19 = sshll.u32 %s2494_s26, 1 }
  0x14   : > { %vm531_vm1 = vcmp.le.s32.totalorder %v1922_v2, 16  ;;  %v332_v16 = vunpack.c.h.bf16 %v301_v11  ;;  %v333_v21 = vunpack.c.l.bf16 %v303_v12  ;;  %vm1963_vm6 = vmand %vm1954_vm4, %vm496_vm0  ;;  %v294_v31 = vld [vmem:[%s1929_s7 + $0x20] sm:$0x1]  ;;  %v1645_v35 = vunpack.c.l.bf16 %v1659_v22  ;;  %v289_v57 = vld [vmem:[%s1929_s7 + $0xc] sm:$0xff]   ;;  %s282_s17 = scalar_lea.vmem %s2464_s5, %s1564_s19 }
  0x15   : > { %v371_v17 = vmul.f32 %v1653_v8, %v1934_v3  ;;  %v372_v18 = vmul.f32 %v1654_v9, %v1934_v3  ;;  %v373_v19 = vmul.f32 %v1934_v3, %v336_v10  ;;  %v368_v24 = vmul.f32 %v1934_v3, %v331_v15  ;;  %vm1976_vm9 = vmand %vm1954_vm4, %vm531_vm1  ;;  %v291_v6 = vld [vmem:[%s1929_s7 + $0x14] sm:$0x1] }
  0x16   : > { %v369_v25 = vmul.f32 %v1934_v3, %v332_v16  ;;  %v370_v30 = vmul.f32 %v1934_v3, %v333_v21  ;;  %vm1984_vm10 = vmand %vm471_vm7, %vm481_vm8  ;;  %v1646_v36 = vunpack.c.h.bf16 %v1659_v22  ;;  %v324_v43 = vunpack.c.l.bf16 %v294_v31  ;;  %v307_v11 = vld [vmem:[%s1929_s7 + $0x54] sm:$0xff]  }
  0x17   : > { %v408_v26 = vadd.f32 %v1949_v14, %v371_v17  ;;  %v409_v27 = vadd.f32 %v1949_v14, %v372_v18  ;;  %v410_v28 = vadd.f32 %v1949_v14, %v373_v19  ;;  %v405_v32 = vadd.f32 %v1949_v14, %v368_v24  ;;  %vm514_vm11 = vmand %vm1984_vm10, %vm496_vm0 }
  0x18   : > { %v406_v33 = vadd.f32 %v1949_v14, %v369_v25  ;;  %v407_v40 = vadd.f32 %v1949_v14, %v370_v30  ;;  %vm549_vm12 = vmand %vm1984_vm10, %vm531_vm1  ;;  %v359_v44 = vmul.f32 %v1645_v35, %v1934_v3  ;;  %v360_v55 = vmul.f32 %v1646_v36, %v1934_v3 }
  0x19   : > { %v438_v37 = vmax.f32 %v408_v26, 0.0  ;;  %v439_v38 = vmax.f32 %v409_v27, 0.0  ;;  %v440_v39 = vmax.f32 %v410_v28, 0.0  ;;  %v435_v41 = vmax.f32 %v405_v32, 0.0  ;;  %v309_v27 = vld [vmem:[%s1929_s7 + $0x5c] sm:$0x1] }
  0x1a   : > { %v436_v42 = vmax.f32 %v406_v33, 0.0  ;;  %v437_v48 = vmax.f32 %v407_v40, 0.0  ;;  %v361_v56 = vmul.f32 %v1934_v3, %v324_v43  ;;  %v396_v61 = vadd.f32 %v1949_v14, %v359_v44 }
  0x1b   : > { %v580_v45 = vsel %vm1963_vm6, %v438_v37, 0.0  ;;  %v581_v46 = vsel %vm1954_vm4, %v439_v38, 0.0  ;;  %v582_v47 = vsel %vm1976_vm9, %v440_v39, 0.0  ;;  %v577_v51 = vsel %vm514_vm11, %v435_v41, 0.0 }
  0x1c   : > { %v2004_v49 = vpack.c.bf16 %v581_v46, %v580_v45  ;;  %v2006_v50 = vpack.c.bf16 %v582_v47, %v582_v47  ;;  %v578_v52 = vsel %vm1984_vm10, %v436_v42, 0.0  ;;  %v579_v53 = vsel %vm549_vm12, %v437_v48, 0.0 }
  0x1d   : > { %v2010_v54 = vpack.c.bf16 %v578_v52, %v577_v51  ;;  %v2017_v60 = vpack.c.bf16 %v579_v53, %v579_v53  ;;  %v397_v63 = vadd.f32 %v1949_v14, %v360_v55  ;;  %v398_v0 = vadd.f32 %v1949_v14, %v361_v56 }
  0x1e   : > { %v792_v58 = vrot.slane %v2004_v49, 1  ;;  %v793_v59 = vrot.slane %v2006_v50, 1  ;;  %v458_v5 = vadd.s32 2, %v1936_v4  ;;  %v426_v9 = vmax.f32 %v396_v61, 0.0 }
  0x1f   : > { %v789_v62 = vrot.slane %v2010_v54, 1  ;;  %v790_v8 = vrot.slane %v2017_v60, 1  ;;  %v319_v10 = vunpack.c.l.bf16 %v289_v57  ;;  %v427_v12 = vmax.f32 %v397_v63, 0.0 }
  0x20   : > { %v794_v7 = vsel %vm773_vm5, %v792_v58, %v793_v59  ;;  %v428_v13 = vmax.f32 %v398_v0, 0.0  ;;  %vm468_vm13 = vcmp.ge.s32.totalorder %v458_v5, 0  ;;  %vm478_vm14 = vcmp.lt.s32.totalorder %v458_v5, 16 }
  0x21   : > { %816 = vrot.lane.b32.xlu0 %v794_v7, %s1850_s12  ;;  %v791_v15 = vsel %vm773_vm5, %v789_v62, %v790_v8  ;;  %vm488_vm15 = vmand %vm468_vm13, %vm478_vm14  ;;  %v320_v16 = vunpack.c.h.bf16 %v289_v57  ;;  %v321_v17 = vunpack.c.l.bf16 %v291_v6  ;;  %v356_v18 = vmul.f32 %v1934_v3, %v319_v10 }
  0x22   : > { %814 = vrot.lane.b32.xlu1 %v791_v15, %s1850_s12  ;;  %vm505_vm2 = vmand %vm488_vm15, %vm496_vm0  ;;  %v569_v19 = vsel %vm488_vm15, %v427_v12, 0.0  ;;  %v337_v21 = vunpack.c.l.bf16 %v307_v11  ;;  %v338_v22 = vunpack.c.h.bf16 %v307_v11  ;;  %vm467_vm4 = vcmp.ge.s32.totalorder %v457_v20, 0 }
  0x23   : > { %vm540_vm3 = vmand %vm488_vm15, %vm531_vm1  ;;  %v568_v23 = vsel %vm505_vm2, %v426_v9, 0.0  ;;  %v357_v24 = vmul.f32 %v1934_v3, %v320_v16  ;;  %v358_v25 = vmul.f32 %v1934_v3, %v321_v17  ;;  %v393_v26 = vadd.f32 %v1949_v14, %v356_v18 }
  0x24   : > { %v570_v28 = vsel %vm540_vm3, %v428_v13, 0.0  ;;  %v2041_v29 = vpack.c.bf16 %v569_v19, %v568_v23  ;;  %vm477_vm6 = vcmp.lt.s32.totalorder %v457_v20, 16  ;;  %v339_v36 = vunpack.c.l.bf16 %v309_v27 }
  0x25   : > { %v2043_v30 = vpack.c.bf16 %v570_v28, %v570_v28  ;;  %v394_v31 = vadd.f32 %v1949_v14, %v357_v24  ;;  %v395_v32 = vadd.f32 %v1949_v14, %v358_v25  ;;  %v423_v33 = vmax.f32 %v393_v26, 0.0  ;;  %vm2047_vm7 = vmand %vm467_vm4, %vm477_vm6 }
  0x26   : > { %v780_v35 = vrot.slane %v2041_v29, 1  ;;  %vm502_vm8 = vmand %vm2047_vm7, %vm496_vm0  ;;  %v374_v37 = vmul.f32 %v1934_v3, %v337_v21  ;;  %v375_v38 = vmul.f32 %v1934_v3, %v338_v22  ;;  %v376_v43 = vmul.f32 %v1934_v3, %v339_v36  ;;  %v1662_v22 = vld [vmem:[%s1929_s7 + $0x60] sm:$0xff]  }
  0x27   : > { %v781_v39 = vrot.slane %v2043_v30, 1  ;;  %v424_v40 = vmax.f32 %v394_v31, 0.0  ;;  %v425_v41 = vmax.f32 %v395_v32, 0.0  ;;  %vm537_vm9 = vmand %vm2047_vm7, %vm531_vm1  ;;  %v565_v42 = vsel %vm502_vm8, %v423_v33, 0.0  ;;  %v312_v32 = vld [vmem:[%s1929_s7 + $0x68] sm:$0x1] }
  0x28   : > { %v411_v44 = vadd.f32 %v1949_v14, %v374_v37  ;;  %v412_v45 = vadd.f32 %v1949_v14, %v375_v38  ;;  %v463_v46 = vadd.s32 7, %v1936_v4  ;;  %vm612_vm10 = vsmask.f32 7424  ;;  %v295_v37 = vld [vmem:[%s1929_s7 + $0x24] sm:$0xff]  }
  0x29   : > { %v782_v47 = vsel %vm773_vm5, %v780_v35, %v781_v39  ;;  %v566_v48 = vsel %vm2047_vm7, %v424_v40, 0.0  ;;  %v567_v51 = vsel %vm537_vm9, %v425_v41, 0.0  ;;  %v674_v52 = vshrl.u32 %v2010_v54, 16 }
  0x2a   : > { %808 = vrot.lane.b32.xlu1 %v782_v47, %s1850_s12  ;;  %v2072_v53 = vpack.c.bf16 %v566_v48, %v565_v42  ;;  %v595_v55 = vpack.c.bf16 %v567_v51, %v567_v51  ;;  %v413_v56 = vadd.f32 %v1949_v14, %v376_v43  ;;  %v441_v57 = vmax.f32 %v411_v44, 0.0 }
  0x2b   : > { %v442_v58 = vmax.f32 %v412_v45, 0.0  ;;  %vm473_vm11 = vcmp.ge.s32.totalorder %v463_v46, 0  ;;  %vm483_vm12 = vcmp.lt.s32.totalorder %v463_v46, 16  ;;  %v676_v59 = vshll.u32 %v2010_v54, 16  ;;  %v297_v45 = vld [vmem:[%s1929_s7 + $0x2c] sm:$0x1] }
  0x2c   : > { %v777_v61 = vrot.slane %v2072_v53, 1  ;;  %v778_v62 = vrot.slane %v595_v55, 1  ;;  %v443_v63 = vmax.f32 %v413_v56, 0.0  ;;  %vm493_vm13 = vmand %vm473_vm11, %vm483_vm12  ;;  %v626_v0 = vshrl.u32 %v2072_v53, 16 }
  0x2d   : > { %vm520_vm14 = vmand %vm493_vm13, %vm496_vm0  ;;  %v584_v5 = vsel %vm493_vm13, %v442_v58, 0.0  ;;  %v628_v6 = vshll.u32 %v2072_v53, 16  ;;  %v633_v7 = vshll.u32 %v595_v55, 16  ;;  %v678_v8 = vrot.slane %v676_v59, 1 }
  0x2e   : > { %v779_v9 = vsel %vm773_vm5, %v777_v61, %v778_v62  ;;  %vm555_vm15 = vmand %vm493_vm13, %vm531_vm1  ;;  %v583_v10 = vsel %vm520_vm14, %v441_v57, 0.0  ;;  %v681_v11 = vshll.u32 %v2017_v60, 16  ;;  %v638_v12 = vshrl.u32 %v2041_v29, 16 }
  0x2f   : > { %806 = vrot.lane.b32.xlu0 %v779_v9, %s1850_s12  ;;  %v585_v13 = vsel %vm555_vm15, %v443_v63, 0.0  ;;  %v2087_v15 = vpack.c.bf16 %v584_v5, %v583_v10  ;;  %v630_v16 = vrot.slane %v628_v6, 1  ;;  %v635_v17 = vrot.slane %v633_v7, 1 }
  0x30   : > { %v2089_v18 = vpack.c.bf16 %v585_v13, %v585_v13  ;;  %v679_v19 = vor.u32 %v678_v8, %v674_v52  ;;  %v683_v20 = vrot.slane %v681_v11, 1  ;;  %v640_v21 = vshll.u32 %v2041_v29, 16 }
  0x31   : > { %v795_v60 = vrot.slane %v2087_v15, 1  ;;  %v631_v23 = vor.u32 %v630_v16, %v626_v0  ;;  %v645_v24 = vshll.u32 %v2043_v30, 16  ;;  %v686_v25 = vshrl.u32 %v2004_v49, 16 }
  0x32   : > { %v796_v26 = vrot.slane %v2089_v18, 1  ;;  %v684_v27 = vsel %vm612_vm10, %v679_v19, %v683_v20  ;;  %v642_v28 = vrot.slane %v640_v21, 1  ;;  %v688_v31 = vshll.u32 %v2004_v49, 16 }
  0x33   : > { %v636_v33 = vsel %vm612_vm10, %v631_v23, %v635_v17  ;;  %v647_v34 = vrot.slane %v645_v24, 1  ;;  %v693_v35 = vshll.u32 %v2006_v50, 16  ;;  %v1657_v36 = vunpack.c.l.bf16 %v1662_v22 }
  0x34   : > { %v797_v30 = vsel %vm773_vm5, %v795_v60, %v796_v26  ;;  %735 = vrot.lane.b32.xlu1 %v636_v33, %s1851_s13  ;;  %v643_v38 = vor.u32 %v642_v28, %v638_v12  ;;  %v690_v39 = vrot.slane %v688_v31, 1  ;;  %v1658_v40 = vunpack.c.h.bf16 %v1662_v22  ;;  %v1660_v31 = vld [vmem:[%s1929_s7 + $0x30] sm:$0xff]  }
  0x35   : > { %818 = vrot.lane.b32.xlu0 %v797_v30, %s1850_s12  ;;  %v695_v41 = vrot.slane %v693_v35, 1  ;;  %v342_v42 = vunpack.c.l.bf16 %v312_v32  ;;  %v377_v43 = vmul.f32 %v1657_v36, %v1934_v3  ;;  %v464_v44 = vadd.s32 8, %v1936_v4 }
  0x36   : > { %v648_v50 = vsel %vm612_vm10, %v643_v38, %v647_v34  ;;  %v691_v46 = vor.u32 %v690_v39, %v686_v25  ;;  %v378_v47 = vmul.f32 %v1658_v40, %v1934_v3  ;;  %v325_v48 = vunpack.c.l.bf16 %v295_v37  ;;  %v300_v38 = vld [vmem:[%s1929_s7 + $0x38] sm:$0x1] }
  0x37   : > { %v379_v51 = vmul.f32 %v1934_v3, %v342_v42  ;;  %v414_v52 = vadd.f32 %v1949_v14, %v377_v43  ;;  %vm474_vm2 = vcmp.ge.s32.totalorder %v464_v44, 0  ;;  %vm484_vm3 = vcmp.lt.s32.totalorder %v464_v44, 16 }
  0x38   : > { %737 = vrot.lane.b32.xlu1 %v648_v50, %s1851_s13  ;;  %v696_v55 = vsel %vm612_vm10, %v691_v46, %v695_v41  ;;  %v415_v56 = vadd.f32 %v1949_v14, %v378_v47  ;;  %vm2116_vm4 = vmand %vm474_vm2, %vm484_vm3  ;;  %v326_v58 = vunpack.c.h.bf16 %v295_v37  ;;  %v327_v59 = vunpack.c.l.bf16 %v297_v45 }
  0x39   : > { %743 = vrot.lane.b32.xlu0 %v684_v27, %s1851_s13  ;;  %v416_v61 = vadd.f32 %v1949_v14, %v379_v51  ;;  %v444_v62 = vmax.f32 %v414_v52, 0.0  ;;  %vm523_vm6 = vmand %vm2116_vm4, %vm496_vm0  ;;  %v362_v63 = vmul.f32 %v1934_v3, %v325_v48  ;;  %v459_v0 = vadd.s32 3, %v1936_v4 }
  0x3a   : > { %v445_v5 = vmax.f32 %v415_v56, 0.0  ;;  %vm558_vm7 = vmand %vm2116_vm4, %vm531_vm1  ;;  %v363_v6 = vmul.f32 %v1934_v3, %v326_v58  ;;  %v364_v7 = vmul.f32 %v1934_v3, %v327_v59  ;;  %v698_v8 = vshrl.u32 %v2087_v15, 16 }
  0x3b   : > { %v446_v9 = vmax.f32 %v416_v61, 0.0  ;;  %v586_v10 = vsel %vm523_vm6, %v444_v62, 0.0  ;;  %v399_v11 = vadd.f32 %v1949_v14, %v362_v63  ;;  %vm469_vm8 = vcmp.ge.s32.totalorder %v459_v0, 0  ;;  %v1640_v63 = vld [vmem:[%s1929_s7] sm:$0xff]  }
  0x3c   : > { %v587_v12 = vsel %vm2116_vm4, %v445_v5, 0.0  ;;  %v400_v13 = vadd.f32 %v1949_v14, %v363_v6  ;;  %v401_v16 = vadd.f32 %v1949_v14, %v364_v7  ;;  %vm479_vm9 = vcmp.lt.s32.totalorder %v459_v0, 16  ;;  %v288_v0 = vld [vmem:[%s1929_s7 + $0x8] sm:$0x1] }
  0x3d   : > { %745 = vrot.lane.b32.xlu0 %v696_v55, %s1851_s13  ;;  %v588_v17 = vsel %vm558_vm7, %v446_v9, 0.0  ;;  %v2141_v19 = vpack.c.bf16 %v587_v12, %v586_v10  ;;  %v429_v20 = vmax.f32 %v399_v11, 0.0  ;;  %vm489_vm11 = vmand %vm469_vm8, %vm479_vm9  ;;  %v700_v21 = vshll.u32 %v2087_v15, 16 }
  0x3e   : > { %v609_v22 = vpack.c.bf16 %v588_v17, %v588_v17  ;;  %v430_v60 = vmax.f32 %v400_v13, 0.0  ;;  %v431_v23 = vmax.f32 %v401_v16, 0.0  ;;  %vm508_vm12 = vmand %vm489_vm11, %vm496_vm0  ;;  %v705_v24 = vshll.u32 %v2089_v18, 16 }
  0x3f   : > { %v710_v25 = vshrl.u32 %v2141_v19, 16  ;;  %v712_v26 = vshll.u32 %v2141_v19, 16  ;;  %v798_v27 = vrot.slane %v2141_v19, 1  ;;  %vm543_vm13 = vmand %vm489_vm11, %vm531_vm1  ;;  %v571_v28 = vsel %vm508_vm12, %v429_v20, 0.0  ;;  %v313_v20 = vld [vmem:[%s1929_s7 + $0x6c] sm:$0xff]  }
  0x40   : > { %v717_v32 = vshll.u32 %v609_v22, 16  ;;  %v799_v33 = vrot.slane %v609_v22, 1  ;;  %v572_v34 = vsel %vm489_vm11, %v430_v60, 0.0  ;;  %v573_v35 = vsel %vm543_vm13, %v431_v23, 0.0 }
  0x41   : > { %v714_v36 = vrot.slane %v712_v26, 1  ;;  %v2153_v37 = vpack.c.bf16 %v572_v34, %v571_v28  ;;  %v599_v30 = vpack.c.bf16 %v573_v35, %v573_v35  ;;  %v702_v18 = vrot.slane %v700_v21, 1 }
  0x42   : > { %v719_v39 = vrot.slane %v717_v32, 1  ;;  %v800_v40 = vsel %vm773_vm5, %v798_v27, %v799_v33  ;;  %v707_v41 = vrot.slane %v705_v24, 1  ;;  %v1649_v42 = vunpack.c.l.bf16 %v1660_v31  ;;  %v315_v27 = vld [vmem:[%s1929_s7 + $0x74] sm:$0x1] }
  0x43   : > { %v715_v43 = vor.u32 %v714_v36, %v710_v25  ;;  %820 = vrot.lane.b32.xlu0 %v800_v40, %s1850_s12  ;;  %v650_v44 = vshrl.u32 %v2153_v37, 16  ;;  %v652_v45 = vshll.u32 %v2153_v37, 16  ;;  %v657_v50 = vshll.u32 %v599_v30, 16 }
  0x44   : > { %v703_v46 = vor.u32 %v702_v18, %v698_v8  ;;  %v1650_v47 = vunpack.c.h.bf16 %v1660_v31  ;;  %v330_v48 = vunpack.c.l.bf16 %v300_v38  ;;  %v365_v51 = vmul.f32 %v1649_v42, %v1934_v3 }
  0x45   : > { %v720_v52 = vsel %vm612_vm10, %v715_v43, %v719_v39  ;;  %v654_v55 = vrot.slane %v652_v45, 1  ;;  %v659_v56 = vrot.slane %v657_v50, 1  ;;  %v460_v57 = vadd.s32 4, %v1936_v4 }
  0x46   : > { %749 = vrot.lane.b32.xlu1 %v720_v52, %s1851_s13  ;;  %v708_v58 = vsel %vm612_vm10, %v703_v46, %v707_v41  ;;  %v366_v59 = vmul.f32 %v1650_v47, %v1934_v3  ;;  %v367_v61 = vmul.f32 %v1934_v3, %v330_v48  ;;  %v402_v62 = vadd.f32 %v1949_v14, %v365_v51 }
  0x47   : > { %v655_v5 = vor.u32 %v654_v55, %v650_v44  ;;  %747 = vrot.lane.b32.xlu0 %v708_v58, %s1851_s13  ;;  %vm470_vm14 = vcmp.ge.s32.totalorder %v460_v57, 0  ;;  %vm480_vm15 = vcmp.lt.s32.totalorder %v460_v57, 16  ;;  %v783_v6 = vrot.slane %v2153_v37, 1 }
  0x48   : > { %v403_v7 = vadd.f32 %v1949_v14, %v366_v59  ;;  %v404_v8 = vadd.f32 %v1949_v14, %v367_v61  ;;  %v432_v9 = vmax.f32 %v402_v62, 0.0  ;;  %vm2174_vm2 = vmand %vm470_vm14, %vm480_vm15  ;;  %v784_v11 = vrot.slane %v599_v30, 1 }
  0x49   : > { %v660_v12 = vsel %vm612_vm10, %v655_v5, %v659_v56  ;;  %vm511_vm3 = vmand %vm2174_vm2, %vm496_vm0  ;;  %v1641_v13 = vunpack.c.l.bf16 %v1640_v63  ;;  %v1642_v16 = vunpack.c.h.bf16 %v1640_v63  ;;  %v318_v17 = vunpack.c.l.bf16 %v288_v0  ;;  %v1804_v56 = vld [vmem:[%s2462_s3 + $0x14] ss:$0 sps:$4 sm:$0xff]  }
  0x4a   : > { %739 = vrot.lane.b32.xlu1 %v660_v12, %s1851_s13  ;;  %v433_v21 = vmax.f32 %v403_v7, 0.0  ;;  %v434_v22 = vmax.f32 %v404_v8, 0.0  ;;  %vm546_vm4 = vmand %vm2174_vm2, %vm531_vm1  ;;  %v574_v60 = vsel %vm511_vm3, %v432_v9, 0.0  ;;  %v785_v23 = vsel %vm773_vm5, %v783_v6, %v784_v11  ;;  %v1806_v12 = vld [vmem:[%s2462_s3 + $0x8] ss:$0 sps:$4 sm:$0xff]  }
  0x4b   : > { %810 = vrot.lane.b32.xlu0 %v785_v23, %s1850_s12  ;;  %v353_v24 = vmul.f32 %v1641_v13, %v1934_v3  ;;  %v354_v25 = vmul.f32 %v1642_v16, %v1934_v3  ;;  %v355_v26 = vmul.f32 %v1934_v3, %v318_v17  ;;  %vm466_vm6 = vcmp.ge.s32.totalorder %v1936_v4, 0  ;;  %v1805_v17 = vld [vmem:[%s2462_s3 + $0xc] sm:$0xff]  }
  0x4c   : > { %v575_v28 = vsel %vm2174_vm2, %v433_v21, 0.0  ;;  %v576_v31 = vsel %vm546_vm4, %v434_v22, 0.0  ;;  %vm476_vm7 = vcmp.lt.s32.totalorder %v1936_v4, 16  ;;  %v343_v32 = vunpack.c.l.bf16 %v313_v20 }
  0x4d   : > { %v2199_v33 = vpack.c.bf16 %v575_v28, %v574_v60  ;;  %v601_v34 = vpack.c.bf16 %v576_v31, %v576_v31  ;;  %v390_v35 = vadd.f32 %v1949_v14, %v353_v24  ;;  %v391_v36 = vadd.f32 %v1949_v14, %v354_v25  ;;  %vm2203_vm8 = vmand %vm466_vm6, %vm476_vm7 }
  0x4e   : > { %v392_v18 = vadd.f32 %v1949_v14, %v355_v26  ;;  %vm2212_vm9 = vmand %vm2203_vm8, %vm496_vm0  ;;  %v344_v39 = vunpack.c.h.bf16 %v313_v20  ;;  %v345_v40 = vunpack.c.l.bf16 %v315_v27  ;;  %v380_v41 = vmul.f32 %v1934_v3, %v343_v32  ;;  %v1807_v20 = vld [vmem:[%s2462_s3 + $0x20] ss:$0 sps:$4 sm:$0xff]  }
  0x4f   : > { %v662_v42 = vshrl.u32 %v2199_v33, 16  ;;  %v664_v43 = vshll.u32 %v2199_v33, 16  ;;  %v669_v44 = vshll.u32 %v601_v34, 16  ;;  %vm534_vm11 = vmand %vm2203_vm8, %vm531_vm1  ;;  %v786_v45 = vrot.slane %v2199_v33, 1 }
  0x50   : > { %v420_v50 = vmax.f32 %v390_v35, 0.0  ;;  %v421_v46 = vmax.f32 %v391_v36, 0.0  ;;  %v422_v47 = vmax.f32 %v392_v18, 0.0  ;;  %v381_v52 = vmul.f32 %v1934_v3, %v344_v39 }
  0x51   : > { %v666_v48 = vrot.slane %v664_v43, 1  ;;  %v671_v51 = vrot.slane %v669_v44, 1  ;;  %v382_v55 = vmul.f32 %v1934_v3, %v345_v40  ;;  %v787_v57 = vrot.slane %v601_v34, 1 }
  0x52   : > { %v562_v58 = vsel %vm2212_vm9, %v420_v50, 0.0  ;;  %v563_v59 = vsel %vm2203_vm8, %v421_v46, 0.0  ;;  %v564_v61 = vsel %vm534_vm11, %v422_v47, 0.0  ;;  %v417_v5 = vadd.f32 %v1949_v14, %v380_v41 }
  0x53   : > { %v667_v62 = vor.u32 %v666_v48, %v662_v42  ;;  %v2233_v63 = vpack.c.bf16 %v563_v59, %v562_v58  ;;  %v593_v0 = vpack.c.bf16 %v564_v61, %v564_v61  ;;  %v418_v3 = vadd.f32 %v1949_v14, %v381_v52  ;;  %v1809_v59 = vld [vmem:[%s2462_s3 + $0x18] sm:$0xff]  }
  0x54   : > { %v419_v6 = vadd.f32 %v1949_v14, %v382_v55  ;;  %v465_v7 = vadd.s32 9, %v1936_v4  ;;  %vm899_vm12 = vcmask 1043456   ;;  %v788_v4 = vsel %vm773_vm5, %v786_v45, %v787_v57 }
  0x55   : > { %v672_v8 = vsel %vm612_vm10, %v667_v62, %v671_v51  ;;  %v614_v9 = vshrl.u32 %v2233_v63, 16  ;;  %v616_v10 = vshll.u32 %v2233_v63, 16  ;;  %v621_v11 = vshll.u32 %v593_v0, 16  ;;  %1757 = vmatprep.subr.msk.bf16.mxu0 %vm899_vm12, %v1804_v56  ;;  %1758 = vmatprep.subr.msk.bf16.mxu1 %vm899_vm12, %v1804_v56 }
  0x56   : > { %741 = vrot.lane.b32.xlu1 %v672_v8, %s1851_s13  ;;  %v774_v14 = vrot.slane %v2233_v63, 1  ;;  %v775_v13 = vrot.slane %v593_v0, 1  ;;  %v448_v16 = vmax.f32 %v418_v3, 0.0  ;;  %v447_v60 = vmax.f32 %v417_v5, 0.0  ;;  %v1808_v5 = vld [vmem:[%s2462_s3] sm:$0xff]  }
  0x57   : > { %v618_v21 = vrot.slane %v616_v10, 1  ;;  %v623_v22 = vrot.slane %v621_v11, 1  ;;  %vm475_vm13 = vcmp.ge.s32.totalorder %v465_v7, 0  ;;  %v449_v23 = vmax.f32 %v419_v6, 0.0 }
  0x58   : > { %vm485_vm14 = vcmp.lt.s32.totalorder %v465_v7, 16  ;;  %v901_v24 = vsel %vm899_vm12, %v1804_v56, 0  ;;  %v1012_v26 = vsel %vm899_vm12, %v1806_v12, 0  ;;  %v1127_v28 = vsel %vm899_vm12, %v1807_v20, 0 }
  0x59   : > { %v619_v25 = vor.u32 %v618_v21, %v614_v9  ;;  %vm495_vm15 = vmand %vm475_vm13, %vm485_vm14  ;;  %1694 = vmatpush3.bf16.msra.mxu0 %v901_v24  ;;  %1755 = vmatpush3.bf16.msra.mxu1 %v901_v24  ;;  %v776_v32 = vsel %vm773_vm5, %v774_v14, %v775_v13  ;;  %vm882_vm4 = vcmask 195584   ;;  %vm1338_vm6 = vcmask 123904  }
  0x5a   : > { %812 = vrot.lane.b32.xlu1 %v788_v4, %s1850_s12  ;;  %vm526_vm2 = vmand %vm495_vm15, %vm496_vm0  ;;  %v590_v27 = vsel %vm495_vm15, %v448_v16, 0.0  ;;  %1695 = vmatprep.subr.bf16.mxu0 %v1805_v17  ;;  %vm824_vm0 = vcmask 64512  }
  0x5b   : > { %v624_v31 = vsel %vm612_vm10, %v619_v25, %v623_v22  ;;  %vm561_vm3 = vmand %vm495_vm15, %vm531_vm1  ;;  %v589_v34 = vsel %vm526_vm2, %v447_v60, 0.0  ;;  %1754 = vmatprep.subr.bf16.mxu1 %v1805_v17  ;;  %vm845_vm1 = vcmask 130048  }
  0x5c   : > { %733 = vrot.lane.b32.xlu0 %v624_v31, %s1851_s13  ;;  %v591_v35 = vsel %vm561_vm3, %v449_v23, 0.0  ;;  %v2267_v36 = vpack.c.bf16 %v590_v27, %v589_v34 }
  0x5d   : > { %v611_v1 = vpack.c.bf16 %v591_v35, %v591_v35  ;;  %1696 = vmatpush3.bf16.msra.mxu0 %v1805_v17  ;;  %1756 = vmatpush3.bf16.msra.mxu1 %v1805_v17 }
  0x5e   : > { %804 = vrot.lane.b32.xlu1 %v776_v32, %s1850_s12  ;;  %v722_v30 = vshrl.u32 %v2267_v36, 16  ;;  %v724_v18 = vshll.u32 %v2267_v36, 16  ;;  %v801_v38 = vrot.slane %v2267_v36, 1  ;;  %1759 = vmatprep.subr.msk.bf16.mxu1 %vm899_vm12, %v1806_v12 }
  0x5f   : > { %v729_v2 = vshll.u32 %v611_v1, 16  ;;  %v802_v39 = vrot.slane %v611_v1, 1  ;;  %1760 = vmatprep.subr.msk.bf16.mxu0 %vm899_vm12, %v1807_v20 }
  0x60   : > { %v726_v40 = vrot.slane %v724_v18, 1 }
  0x61   : > { %v731_v41 = vrot.slane %v729_v2, 1  ;;  %v803_v42 = vsel %vm773_vm5, %v801_v38, %v802_v39  ;;  %vm1404_vm5 = vcmask 125952  }
  0x62   : > { %v727_v43 = vor.u32 %v726_v40, %v722_v30  ;;  %822 = vrot.lane.b32.xlu1 %v803_v42, %s1850_s12  ;;  %s1562_s12 = sshll.u32 %s273_s11, 2 }
  0x63   : > { %s2362_s15 = scalar_lea.vmem %s2463_s4, %s1562_s12 }
  0x64   : > { %v732_v44 = vsel %vm612_vm10, %v727_v43, %v731_v41  ;;  %vm1336_vm10 = vcmask 1040384  }
  0x65   : > { %751 = vrot.lane.b32.xlu0 %v732_v44, %s1851_s13 }
  0x93   : > { %v817_v50 = vpop.permute.xlu0 %816 }
  0x94   : > { %v815_v45 = vpop.permute.xlu1 %814 }
  0x9c   : > { %v809_v46 = vpop.permute.xlu1 %808 }
  0xa1   : > { %v807_v47 = vpop.permute.xlu0 %806 }
  0xa6   : > { %v736_v48 = vpop.permute.xlu1 %735 }
  0xa7   : > { %v819_v51 = vpop.permute.xlu0 %818  ;;  %v828_v52 = vsel %vm824_vm0, %v2072_v53, %v736_v48 }
  0xa8   : > { %v849_v55 = vsel %vm845_vm1, %v828_v52, %v807_v47 }
  0xa9   : > { %1697 = vmatprep.mubr.msk.bf16.mxu0 %vm882_vm4, %v849_v55 }
  0xaa   : > { %v738_v56 = vpop.permute.xlu1 %737 }
  0xab   : > { %v744_v57 = vpop.permute.xlu0 %743  ;;  %v830_v58 = vsel %vm824_vm0, %v2041_v29, %v738_v56 }
  0xac   : > { %v836_v61 = vsel %vm824_vm0, %v2010_v54, %v744_v57  ;;  %v851_v62 = vsel %vm845_vm1, %v830_v58, %v809_v46 }
  0xad   : > { %1698 = vmatmul.mubr.msk.bf16.vlgmr.msra.gmra.mxu0 %vm882_vm4, %v851_v62  ;;  %v857_v53 = vsel %vm845_vm1, %v836_v61, %v815_v45 }
  0xae   : > { %1705 = vmatprep.mubr.msk.bf16.mxu1 %vm882_vm4, %v857_v53  ;;  %1734 = vmatpush3.bf16.msra.mxu0 %v1127_v28 }
  0xaf   : > { %v746_v0 = vpop.permute.xlu0 %745  ;;  %1735 = vmatprep.subr.bf16.mxu0 %v1809_v59 }
  0xb0   : > { %v838_v29 = vsel %vm824_vm0, %v2004_v49, %v746_v0 }
  0xb1   : > { %v859_v54 = vsel %vm845_vm1, %v838_v29, %v817_v50 }
  0xb2   : > { %1706 = vmatmul.mubr.msk.bf16.vlgmr.msra.gmra.mxu1 %vm882_vm4, %v859_v54  ;;  %1736 = vmatpush3.bf16.msra.mxu0 %v1809_v59 }
  0xb3   : > { %1714 = vmatpush3.bf16.msra.mxu1 %v1012_v26 }
  0xb4   : > { %1715 = vmatprep.subr.bf16.mxu1 %v1808_v5 }
  0xb5   : > { %v821_v3 = vpop.permute.xlu0 %820 }
  0xb7   : > { %1716 = vmatpush3.bf16.msra.mxu1 %v1808_v5 }
  0xb8   : > { %v750_v6 = vpop.permute.xlu1 %749 }
  0xb9   : > { %v748_v7 = vpop.permute.xlu0 %747  ;;  %v842_v49 = vsel %vm824_vm0, %v2141_v19, %v750_v6 }
  0xba   : > { %v840_v8 = vsel %vm824_vm0, %v2087_v15, %v748_v7  ;;  %v863_v10 = vsel %vm845_vm1, %v842_v49, %v821_v3 }
  0xbb   : > { %v861_v9 = vsel %vm845_vm1, %v840_v8, %v819_v51 }
  0xbc   : > { %v740_v11 = vpop.permute.xlu1 %739  ;;  %1709 = vmatprep.mubr.msk.bf16.mxu1 %vm882_vm4, %v861_v9 }
  0xbd   : > { %v832_v12 = vsel %vm824_vm0, %v2153_v37, %v740_v11  ;;  %v811_v4 = vpop.permute.xlu0 %810  ;;  %1710 = vmatmul.mubr.msk.bf16.gmra.mxu1 %vm882_vm4, %v863_v10 }
  0xbe   : > { %v853_v14 = vsel %vm845_vm1, %v832_v12, %v811_v4 }
  0xbf   : > { %1701 = vmatprep.mubr.msk.bf16.mxu0 %vm882_vm4, %v853_v14 }
  0xc8   : > { %v742_v15 = vpop.permute.xlu1 %741 }
  0xc9   : > { %v834_v19 = vsel %vm824_vm0, %v2199_v33, %v742_v15 }
  0xcc   : > { %v813_v13 = vpop.permute.xlu1 %812 }
  0xcd   : > { %v855_v16 = vsel %vm845_vm1, %v834_v19, %v813_v13 }
  0xce   : > { %1702 = vmatmul.mubr.msk.bf16.gmra.mxu0 %vm882_vm4, %v855_v16  ;;  %v734_v17 = vpop.permute.xlu0 %733 }
  0xcf   : > { %1737 = vmatprep.mubr.msk.bf16.mxu0 %vm882_vm4, %v851_v62  ;;  %v826_v37 = vsel %vm824_vm0, %v2233_v63, %v734_v17 }
  0xd0   : > { %v805_v20 = vpop.permute.xlu1 %804 }
  0xd1   : > { %v847_v21 = vsel %vm845_vm1, %v826_v37, %v805_v20 }
  0xd2   : > { %1717 = vmatprep.mubr.msk.bf16.mxu1 %vm882_vm4, %v847_v21 }
  0xd3   : > { %1718 = vmatmul.mubr.msk.bf16.vlgmr.msra.gmra.mxu1 %vm882_vm4, %v849_v55 }
  0xd4   : > { %1721 = vmatprep.mubr.msk.bf16.mxu1 %vm882_vm4, %v851_v62  ;;  %v823_v22 = vpop.permute.xlu1 %822 }
  0xd6   : > { %1738 = vmatmul.mubr.msk.bf16.vlgmr.msra.gmra.mxu0 %vm882_vm4, %v853_v14 }
  0xd7   : > { %1741 = vmatprep.mubr.msk.bf16.mxu0 %vm882_vm4, %v855_v16  ;;  %v752_v33 = vpop.permute.xlu0 %751 }
  0xd8   : > { %v844_v63 = vsel %vm824_vm0, %v2267_v36, %v752_v33 }
  0xd9   : > { %v865_v60 = vsel %vm845_vm1, %v844_v63, %v823_v22 }
  0xdb   : > { %1722 = vmatmul.mubr.msk.bf16.gmra.mxu1 %vm882_vm4, %v853_v14 }
  0xdc   : > { %1725 = vmatprep.mubr.msk.bf16.mxu1 %vm882_vm4, %v855_v16 }
  0xde   : > { %1742 = vmatmul.mubr.msk.bf16.gmra.mxu0 %vm882_vm4, %v857_v53 }
  0xdf   : > { %1745 = vmatprep.mubr.msk.bf16.mxu0 %vm882_vm4, %v859_v54 }
  0xe3   : > { %1726 = vmatmul.mubr.msk.bf16.gmra.mxu1 %vm882_vm4, %v857_v53 }
  0xe4   : > { %1729 = vmatprep.mubr.msk.bf16.mxu1 %vm882_vm4, %v859_v54 }
  0xe6   : > { %1746 = vmatmul.mubr.msk.bf16.gmra.mxu0 %vm882_vm4, %v861_v9 }
  0xe7   : > { %1749 = vmatprep.mubr.msk.bf16.mxu0 %vm882_vm4, %v863_v10 }
  0xeb   : > { %1730 = vmatmul.mubr.msk.bf16.gmra.mxu1 %vm882_vm4, %v861_v9 }
  0xee   : > { %1750 = vmatmul.mubr.msk.bf16.gmra.mxu0 %vm882_vm4, %v865_v60 }
 0x16d   : > { %v1699_v27 = vpop.f32.mrf.mxu0 }
 0x16f   : > { %v937_v31 = vpop.f32.mrf.mxu0 }
 0x171   : > { %v1700_v34 = vpop.f32.mrf.mxu0 }
 0x172   : > { %v2339_v23 = vpop.f32.mrf.mxu1 }
 0x173   : > { %v940_v36 = vpop.f32.mrf.mxu0 }
 0x174   : > { %v2341_v24 = vpop.f32.mrf.mxu1 }
 0x176   : > { %v2343_v25 = vpop.f32.mrf.mxu1 }
 0x178   : > { %v2345_v26 = vpop.f32.mrf.mxu1 }
 0x17d   : > { %v2347_v28 = vpop.f32.mrf.mxu1 }
 0x17f   : > { %v2351_v32 = vpop.f32.mrf.mxu1 }
 0x181   : > { %v2355_v35 = vpop.f32.mrf.mxu1 }
 0x183   : > { %v2357_v30 = vpop.f32.mrf.mxu1 }
 0x18e   : > { %v1703_v1 = vpop.f32.mrf.mxu0 }
 0x190   : > { %v953_v18 = vpop.f32.mrf.mxu0 }
 0x192   : > { %v1704_v38 = vpop.f32.mrf.mxu0 }
 0x193   : > { %v1719_v2 = vpop.f32.mrf.mxu1 }
 0x194   : > { %v1057_v39 = vadd.f32 %v1719_v2, %v1699_v27  ;;  %v956_v40 = vpop.f32.mrf.mxu0 }
 0x195   : > { %v1048_v41 = vpop.f32.mrf.mxu1 }
 0x196   : > { %v1049_v42 = vadd.f32 %v1048_v41, %v937_v31  ;;  %v1739_v43 = vpop.f32.mrf.mxu0 }
 0x197   : > { %v1228_v44 = vadd.f32 %v1739_v43, %v1057_v39  ;;  %v1720_v45 = vpop.f32.mrf.mxu1 }
 0x198   : > { %v1060_v50 = vadd.f32 %v1720_v45, %v1700_v34  ;;  %v1163_v46 = vpop.f32.mrf.mxu0 }
 0x199   : > { %v1625_v47 = vpack.c.bf16 %v1228_v44, %v1228_v44  ;;  %v1226_v48 = vadd.f32 %v1163_v46, %v1049_v42  ;;  %v1051_v51 = vpop.f32.mrf.mxu1  ;;  %v1283_v53 = vmul.f32 %v1228_v44, %v1228_v44  ;;  %v1243_v4 = vsel %vm845_vm1, %v1228_v44, 0.0 }
 0x19a   : > { %v1052_v52 = vadd.f32 %v1051_v51, %v940_v36  ;;  %v1740_v55 = vpop.f32.mrf.mxu0 }
 0x19b   : > { %1407 = vst.msk [vmem:[%s2362_s15 + $0x8] sm:$0xf] %vm1404_vm5, %v1625_v47  ;;  %v1281_v56 = vmul.f32 %v1226_v48, %v1226_v48  ;;  %v1623_v57 = vpack.c.bf16 %v1226_v48, %v1226_v48  ;;  %v1723_v58 = vpop.f32.mrf.mxu1  ;;  %v1229_v59 = vadd.f32 %v1740_v55, %v1060_v50  ;;  %v1242_v5 = vsel %vm845_vm1, %v1226_v48, 0.0 }
 0x19c   : > { %v1073_v61 = vadd.f32 %v1723_v58, %v1703_v1  ;;  %v1166_v62 = vpop.f32.mrf.mxu0  ;;  %v1298_v14 = vsel %vm845_vm1, %v1283_v53, 0.0  ;;  %v1244_v16 = vadd.f32 %v1243_v4, %v1242_v5 }
 0x19d   : > { %1405 = vst.msk [vmem:[%s2362_s15] sm:$0xf] %vm1404_vm5, %v1623_v57  ;;  %v1227_v0 = vadd.f32 %v1166_v62, %v1052_v52  ;;  %v1064_v29 = vpop.f32.mrf.mxu1  ;;  %v1626_v54 = vpack.c.bf16 %v1229_v59, %v1229_v59  ;;  %v1297_v6 = vsel %vm845_vm1, %v1281_v56, 0.0  ;;  %v1284_v15 = vmul.f32 %v1229_v59, %v1229_v59 }
 0x19e   : > { %v1743_v3 = vpop.f32.mrf.mxu0  ;;  %v1065_v49 = vadd.f32 %v1064_v29, %v953_v18  ;;  %v1299_v17 = vadd.f32 %v1298_v14, %v1297_v6  ;;  %v1258_v31 = vsel %vm845_vm1, %v1229_v59, 0.0 }
 0x19f   : > { %v1282_v7 = vmul.f32 %v1227_v0, %v1227_v0  ;;  %v1624_v8 = vpack.c.bf16 %v1227_v0, %v1227_v0  ;;  %v1724_v9 = vpop.f32.mrf.mxu1  ;;  %1408 = vst.msk [vmem:[%s2362_s15 + $0xc] sm:$0xf] %vm1404_vm5, %v1626_v54  ;;  %v1232_v10 = vadd.f32 %v1743_v3, %v1073_v61  ;;  %v1257_v37 = vsel %vm845_vm1, %v1227_v0, 0.0 }
 0x1a0   : > { %v1076_v11 = vadd.f32 %v1724_v9, %v1704_v38  ;;  %v1179_v12 = vpop.f32.mrf.mxu0  ;;  %v1313_v38 = vsel %vm845_vm1, %v1284_v15, 0.0  ;;  %v1259_v2 = vadd.f32 %v1258_v31, %v1257_v37 }
 0x1a1   : > { %1406 = vst.msk [vmem:[%s2362_s15 + $0x4] sm:$0xf] %vm1404_vm5, %v1624_v8  ;;  %v1230_v19 = vadd.f32 %v1179_v12, %v1065_v49  ;;  %v1067_v13 = vpop.f32.mrf.mxu1  ;;  %v1629_v20 = vpack.c.bf16 %v1232_v10, %v1232_v10  ;;  %v1312_v33 = vsel %vm845_vm1, %v1282_v7, 0.0  ;;  %v1287_v34 = vmul.f32 %v1232_v10, %v1232_v10 }
 0x1a2   : > { %v1744_v21 = vpop.f32.mrf.mxu0  ;;  %v1068_v60 = vadd.f32 %v1067_v13, %v956_v40  ;;  %v1314_v42 = vadd.f32 %v1313_v38, %v1312_v33 }
 0x1a3   : > { %v1285_v63 = vmul.f32 %v1230_v19, %v1230_v19  ;;  %v1627_v22 = vpack.c.bf16 %v1230_v19, %v1230_v19  ;;  %v1727_v27 = vpop.f32.mrf.mxu1  ;;  %1411 = vst.msk [vmem:[%s2362_s15 + $0x18] sm:$0xf] %vm1404_vm5, %v1629_v20  ;;  %v1233_v36 = vadd.f32 %v1744_v21, %v1076_v11  ;;  %v1245_v39 = vsel %vm845_vm1, %v1230_v19, 0.0 }
 0x1a4   : > { %v1089_v1 = vadd.f32 %v1727_v27, %v2339_v23  ;;  %v1182_v18 = vpop.f32.mrf.mxu0  ;;  %v1247_v23 = vsel %vm845_vm1, %v1232_v10, 0.0  ;;  %v1302_v52 = vsel %vm845_vm1, %v1287_v34, 0.0  ;;  %v1246_v55 = vadd.f32 %v1245_v39, %v1244_v16 }
 0x1a5   : > { %1409 = vst.msk [vmem:[%s2362_s15 + $0x10] sm:$0xf] %vm1404_vm5, %v1627_v22  ;;  %v1231_v41 = vadd.f32 %v1182_v18, %v1068_v60  ;;  %v1080_v40 = vpop.f32.mrf.mxu1  ;;  %v1300_v43 = vsel %vm845_vm1, %v1285_v63, 0.0  ;;  %v1288_v44 = vmul.f32 %v1233_v36, %v1233_v36  ;;  %v1630_v45 = vpack.c.bf16 %v1233_v36, %v1233_v36 }
 0x1a6   : > { %v1747_v50 = vpop.f32.mrf.mxu0  ;;  %v1081_v48 = vadd.f32 %v1080_v40, %v2341_v24  ;;  %v1301_v59 = vadd.f32 %v1300_v43, %v1299_v17  ;;  %v1262_v61 = vsel %vm845_vm1, %v1233_v36, 0.0  ;;  %v1248_v10 = vadd.f32 %v1247_v23, %v1246_v55 }
 0x1a7   : > { %v1286_v46 = vmul.f32 %v1231_v41, %v1231_v41  ;;  %v1628_v47 = vpack.c.bf16 %v1231_v41, %v1231_v41  ;;  %v1728_v51 = vpop.f32.mrf.mxu1  ;;  %1412 = vst.msk [vmem:[%s2362_s15 + $0x1c] sm:$0xf] %vm1404_vm5, %v1630_v45  ;;  %v1236_v56 = vadd.f32 %v1747_v50, %v1089_v1  ;;  %v1260_v62 = vsel %vm845_vm1, %v1231_v41, 0.0 }
 0x1a8   : > { %v1092_v57 = vadd.f32 %v1728_v51, %v2343_v25  ;;  %v1195_v58 = vpop.f32.mrf.mxu0  ;;  %v1317_v0 = vsel %vm845_vm1, %v1288_v44, 0.0  ;;  %v1261_v9 = vadd.f32 %v1260_v62, %v1259_v2  ;;  %v1303_v15 = vadd.f32 %v1302_v52, %v1301_v59 }
 0x1a9   : > { %1410 = vst.msk [vmem:[%s2362_s15 + $0x14] sm:$0xf] %vm1404_vm5, %v1628_v47  ;;  %v1234_v53 = vadd.f32 %v1195_v58, %v1081_v48  ;;  %v1083_v24 = vpop.f32.mrf.mxu1  ;;  %v1315_v29 = vsel %vm845_vm1, %v1286_v46, 0.0  ;;  %v1291_v5 = vmul.f32 %v1236_v56, %v1236_v56  ;;  %v1633_v54 = vpack.c.bf16 %v1236_v56, %v1236_v56 }
 0x1aa   : > { %v1748_v3 = vpop.f32.mrf.mxu0  ;;  %v1084_v8 = vadd.f32 %v1083_v24, %v2345_v26  ;;  %v1316_v14 = vadd.f32 %v1315_v29, %v1314_v42  ;;  %v1251_v26 = vsel %vm845_vm1, %v1236_v56, 0.0  ;;  %v1263_v31 = vadd.f32 %v1262_v61, %v1261_v9 }
 0x1ab   : > { %v1249_v25 = vsel %vm845_vm1, %v1234_v53, 0.0  ;;  %v1289_v6 = vmul.f32 %v1234_v53, %v1234_v53  ;;  %v1631_v7 = vpack.c.bf16 %v1234_v53, %v1234_v53  ;;  %v1731_v49 = vpop.f32.mrf.mxu1  ;;  %1415 = vst.msk [vmem:[%s2362_s15 + $0x28] sm:$0xf] %vm1404_vm5, %v1633_v54  ;;  %v1237_v11 = vadd.f32 %v1748_v3, %v1092_v57 }
 0x1ac   : > { %v1105_v12 = vadd.f32 %v1731_v49, %v2347_v28  ;;  %v1198_v4 = vpop.f32.mrf.mxu0  ;;  %v1306_v17 = vsel %vm845_vm1, %v1291_v5, 0.0  ;;  %v1250_v37 = vadd.f32 %v1249_v25, %v1248_v10  ;;  %v1318_v38 = vadd.f32 %v1317_v0, %v1316_v14 }
 0x1ad   : > { %v1304_v19 = vsel %vm845_vm1, %v1289_v6, 0.0  ;;  %1413 = vst.msk [vmem:[%s2362_s15 + $0x20] sm:$0xf] %vm1404_vm5, %v1631_v7  ;;  %v1235_v13 = vadd.f32 %v1198_v4, %v1084_v8  ;;  %v1096_v16 = vpop.f32.mrf.mxu1  ;;  %v1634_v20 = vpack.c.bf16 %v1237_v11, %v1237_v11  ;;  %v1292_v18 = vmul.f32 %v1237_v11, %v1237_v11 }
 0x1ae   : > { %v1751_v21 = vpop.f32.mrf.mxu0  ;;  %v1097_v22 = vadd.f32 %v1096_v16, %v2351_v32  ;;  %v1305_v27 = vadd.f32 %v1304_v19, %v1303_v15  ;;  %v1266_v32 = vsel %vm845_vm1, %v1237_v11, 0.0  ;;  %v1252_v43 = vadd.f32 %v1251_v26, %v1250_v37 }
 0x1af   : > { %v1264_v28 = vsel %vm845_vm1, %v1235_v13, 0.0  ;;  %v1290_v33 = vmul.f32 %v1235_v13, %v1235_v13  ;;  %v1632_v63 = vpack.c.bf16 %v1235_v13, %v1235_v13  ;;  %v1732_v60 = vpop.f32.mrf.mxu1  ;;  %1416 = vst.msk [vmem:[%s2362_s15 + $0x2c] sm:$0xf] %vm1404_vm5, %v1634_v20  ;;  %v1240_v34 = vadd.f32 %v1751_v21, %v1105_v12 }
 0x1b0   : > { %v1108_v36 = vadd.f32 %v1732_v60, %v2355_v35  ;;  %v1211_v1 = vpop.f32.mrf.mxu0  ;;  %v1265_v40 = vadd.f32 %v1264_v28, %v1263_v31  ;;  %v1307_v48 = vadd.f32 %v1306_v17, %v1305_v27  ;;  %v1321_v55 = vsel %vm845_vm1, %v1292_v18, 0.0 }
 0x1b1   : > { %v1319_v2 = vsel %vm845_vm1, %v1290_v33, 0.0  ;;  %1414 = vst.msk [vmem:[%s2362_s15 + $0x24] sm:$0xf] %vm1404_vm5, %v1632_v63  ;;  %v1238_v39 = vadd.f32 %v1211_v1, %v1097_v22  ;;  %v1099_v41 = vpop.f32.mrf.mxu1  ;;  %v1637_v42 = vpack.c.bf16 %v1240_v34, %v1240_v34  ;;  %v1295_v56 = vmul.f32 %v1240_v34, %v1240_v34 }
 0x1b2   : > { %v1752_v44 = vpop.f32.mrf.mxu0  ;;  %v1100_v23 = vadd.f32 %v1099_v41, %v2357_v30  ;;  %v1320_v46 = vadd.f32 %v1319_v2, %v1318_v38  ;;  %v1255_v59 = vsel %vm845_vm1, %v1240_v34, 0.0  ;;  %v1267_v62 = vadd.f32 %v1266_v32, %v1265_v40 }
 0x1b3   : > { %v1253_v45 = vsel %vm845_vm1, %v1238_v39, 0.0  ;;  %v1293_v35 = vmul.f32 %v1238_v39, %v1238_v39  ;;  %v1635_v50 = vpack.c.bf16 %v1238_v39, %v1238_v39  ;;  %1419 = vst.msk [vmem:[%s2362_s15 + $0x38] sm:$0xf] %vm1404_vm5, %v1637_v42  ;;  %v1241_v51 = vadd.f32 %v1752_v44, %v1108_v36 }
 0x1b4   : > { %v1254_v47 = vadd.f32 %v1253_v45, %v1252_v43  ;;  %v1214_v52 = vpop.f32.mrf.mxu0  ;;  %v1322_v3 = vadd.f32 %v1321_v55, %v1320_v46  ;;  %v1310_v25 = vsel %vm845_vm1, %v1295_v56, 0.0 }
 0x1b5   : > { %v1308_v57 = vsel %vm845_vm1, %v1293_v35, 0.0  ;;  %1417 = vst.msk [vmem:[%s2362_s15 + $0x30] sm:$0xf] %vm1404_vm5, %v1635_v50  ;;  %v1239_v58 = vadd.f32 %v1214_v52, %v1100_v23  ;;  %v1296_v61 = vmul.f32 %v1241_v51, %v1241_v51  ;;  %v1638_v53 = vpack.c.bf16 %v1241_v51, %v1241_v51 }
 0x1b6   : > { %v1309_v30 = vadd.f32 %v1308_v57, %v1307_v48  ;;  %v1256_v5 = vadd.f32 %v1255_v59, %v1254_v47  ;;  %v1270_v6 = vsel %vm845_vm1, %v1241_v51, 0.0 }
 0x1b7   : > { %v1268_v24 = vsel %vm845_vm1, %v1239_v58, 0.0  ;;  %v1294_v0 = vmul.f32 %v1239_v58, %v1239_v58  ;;  %v1636_v29 = vpack.c.bf16 %v1239_v58, %v1239_v58  ;;  %1420 = vst.msk [vmem:[%s2362_s15 + $0x3c] sm:$0xf] %vm1404_vm5, %v1638_v53  ;;  %v1325_v10 = vsel %vm845_vm1, %v1296_v61, 0.0 }
 0x1b8   : > { %v1269_v54 = vadd.f32 %v1268_v24, %v1267_v62  ;;  %v1311_v8 = vadd.f32 %v1310_v25, %v1309_v30  ;;  %v1272_v11 = vsel %vm845_vm1, %v1256_v5, 0.0 }
 0x1b9   : > { %v1323_v7 = vsel %vm845_vm1, %v1294_v0, 0.0  ;;  %1418 = vst.msk [vmem:[%s2362_s15 + $0x34] sm:$0xf] %vm1404_vm5, %v1636_v29 }
 0x1ba   : > { %v1271_v49 = vadd.f32 %v1270_v6, %v1269_v54  ;;  %v1324_v9 = vadd.f32 %v1323_v7, %v1322_v3  ;;  %v1327_v15 = vsel %vm845_vm1, %v1311_v8, 0.0 }
 0x1bc   : > { %v1273_v12 = vsel %vm845_vm1, %v1271_v49, 0.0  ;;  %v1326_v4 = vadd.f32 %v1325_v10, %v1324_v9 }
 0x1bd   : > { %v1274_v14 = vadd.f32 %v1273_v12, %v1272_v11 }
 0x1be   : > { %v1328_v19 = vsel %vm845_vm1, %v1326_v4, 0.0 }
 0x1bf   : > { %v1275_v13 = vrot.slane %v1274_v14, 4  ;;  %v1329_v16 = vadd.f32 %v1328_v19, %v1327_v15 }
 0x1c1   : > { %v1276_v26 = vadd.f32 %v1275_v13, %v1274_v14  ;;  %v1330_v17 = vrot.slane %v1329_v16, 4 }
 0x1c3   : > { %v1277_v37 = vrot.slane %v1276_v26, 2  ;;  %v1331_v20 = vadd.f32 %v1330_v17, %v1329_v16 }
 0x1c5   : > { %v1278_v21 = vadd.f32 %v1277_v37, %v1276_v26  ;;  %v1332_v28 = vrot.slane %v1331_v20, 2 }
 0x1c7   : > { %v1279_v33 = vrot.slane %v1278_v21, 1  ;;  %v1333_v63 = vadd.f32 %v1332_v28, %v1331_v20 }
 0x1c9   : > { %v1334_v22 = vrot.slane %v1333_v63, 1  ;;  %v1280_v60 = vadd.f32 %v1279_v33, %v1278_v21 }
 0x1cb   : > { %v1335_v27 = vadd.f32 %v1334_v22, %v1333_v63 }
 0x1cd   : > { %v1337_v31 = vsel %vm1336_vm10, %v1280_v60, %v1335_v27 }
 0x1ce   : > { %1339 = vst.msk [vmem:[%s282_s17] sm:$0x3] %vm1338_vm6, %v1337_v31 }
 0x1cf PF: > { %s16_s22 = sadd.s32 1, %s1848_s22   ;;  %s2483_s18 = smov %s1840_s20 }
 0x1d0   : > { %p13_p8 = scmp.ge.s32.totalorder %s16_s22, 6   ;;  %s2484_s19 = smov %s1844_s21 }
 0x1d1   : > { %s2485_s20 = smov %s2488_s23  ;;  %s2486_s21 = smov %s2492_s24 }
 0x1d2   :  { %15 = sbr.rel (!%p13_p8) target bundleno = 3 (0x3), region = 80 }

// kernel: conv_block_forward.3
= control target key start
LH: loop header
LB: loop body
LE: loop exit
PB: predicated region body
PF: predicated region fallthrough
CT: control target
= control target key end

     0   :  { %s7346_s12 = smov 0   ;;  %s7348_s13 = smov 0   ;;  %s9978_s0 = inlined_call_operand.vmem [shape: bf16[4,12,20,4], index: 0, kind: input, shape index: {}]   ;;  %s9979_s1 = inlined_call_operand.vmem [shape: bf16[3,12,8], index: 1, kind: input, shape index: {}]   ;;  %s9980_s2 = inlined_call_operand.vmem [shape: bf16[4,10,18,8], index: 2, kind: output, shape index: {0}]   ;;  %s9981_s3 = inlined_call_operand.vmem [shape: f32[4,2,8], index: 3, kind: output, shape index: {1}]  }
   0x1   :  { %s7350_s14 = smov 0   ;;  %s7352_s15 = smov 0  }
   0x2   :  { %s7354_s16 = smov 0  }
   0x3 LB: > { %s23_s17 = sadd.s32 1, %s7306_s14  ;;  %s26_s18 = sadd.s32 1, %s7310_s15  ;;  %s7314_s16 = sphi %s7354_s16, %s14_s16   ;;  %s7310_s15 = sphi %s7352_s15, %s10213_s15   ;;  %s7306_s14 = sphi %s7350_s14, %s10212_s14   ;;  %s7302_s13 = sphi %s7348_s13, %s10211_s13   ;;  %s7298_s12 = sphi %s7346_s12, %s10210_s12  }
   0x4   : > { %p24_p0 = scmp.ge.s32.totalorder %s23_s17, 2  ;;  %p6909_p1 = scmp.ge.s32.totalorder %s7314_s16, 1 }
   0x5   : > { %p168_p2 = scmp.lt.s32.totalorder %s7314_s16, 5 }
   0x6   : > { %s10215_s17 = smov (%p24_p0, %s23_s17), 0  ;;  %s10217_s18 = smov (!%p24_p0, %s26_s18), %s7310_s15 }
   0x7   : > { %p169_p3 = pnand %p6909_p1, %p168_p2  ;;  %p28_p4 = scmp.ge.s32.totalorder %s10217_s18, 2 }
   0x9   : > { %s10219_s18 = smov (%p28_p4, %s10217_s18), 0  ;;  %172 = sbr.rel (%p169_p3) target bundleno = 739 (0x2e3), region = 28 }
   0xe   : > { %s6910_s19 = sshll.u32 %s7302_s13, 1  ;;  %vm590_vm0 = vcmask 1046528   ;;  %vm361_vm1 = vsmask.f32 7424  ;;  %s7316_s25 = smov 8   ;;  %vm2024_vm2 = vcmask 1045504  }
   0xf   : > { %s203_s20 = sadd.s32 %s7298_s12, %s6910_s19  ;;  %s7317_s26 = smov 4   ;;  %vm724_vm3 = vcmask 64512   ;;  %vm675_vm4 = vcmask 31744   ;;  %vm1987_vm5 = vcmask 97280   ;;  %vm6760_vm7 = vcmask 57344  }
  0x10   : > { %p204_p5 = scmp.lt.s32.totalorder %s203_s20, 3  ;;  %vm5375_vm9 = vcmask 58368   ;;  %vm6757_vm10 = vcmask 60416   ;;  %vm6094_vm11 = vcmask 1040384  }
  0x12   : > { %s10221_s20 = smov (!%p204_p5, %s203_s20), 3 }
  0x13   : > { %s7192_s21 = smul.u32 144, %s10221_s20  ;;  %s6915_s10 = sshll.u32 %s10221_s20, 1 }
  0x14   : > { %s7193_s6 = smul.u32 120, %s10221_s20  ;;  %s225_s13 = scalar_lea.vmem %s9981_s3, %s6915_s10 }
  0x15   : > { %s7382_s24 = scalar_lea.vmem %s9978_s0, %s7192_s21 }
  0x16   : > { %v7385_v0 = vld [vmem:[%s7382_s24 + $0x48] sm:$0xff]   ;;  %v7388_v1 = vld [vmem:[%s7382_s24 + $0x50] ss:$0 sps:$4 sm:$0x33]   ;;  %v7391_v2 = vld [vmem:[%s7382_s24 + $0x54] sm:$0xff]   ;;  %s8745_s9 = scalar_lea.vmem %s9980_s2, %s7193_s6 }
  0x17   : > { %v609_v3 = vrot.slane %v7385_v0, 1  ;;  %v610_v4 = vrot.slane %v7388_v1, 1  ;;  %v460_v5 = vshll.u32 %v7388_v1, 16  ;;  %v464_v6 = vshrl.u32 %v7388_v1, 16  ;;  %v7405_v11 = vld [vmem:[%s7382_s24 + $0xc] sm:$0xff]   ;;  %v7422_v24 = vld [vmem:[%s7382_s24 + $0x18] sm:$0xff]  }
  0x18   : > { %v7398_v7 = vld [vmem:[%s7382_s24 + $0x5c] ss:$0 sps:$4 sm:$0x33]   ;;  %v612_v8 = vrot.slane %v7391_v2, 1  ;;  %v468_v12 = vshrl.u32 %v7391_v2, 16  ;;  %v470_v13 = vshll.u32 %v7391_v2, 16 }
  0x19   : > { %v611_v9 = vsel %vm590_vm0, %v609_v3, %v610_v4  ;;  %v462_v10 = vrot.slane %v460_v5, 1  ;;  %v613_v14 = vrot.slane %v7398_v7, 1  ;;  %v475_v15 = vshll.u32 %v7398_v7, 16  ;;  %v7414_v17 = vld [vmem:[%s7382_s24 + $0x14] ss:$0 sps:$4 sm:$0x33]  }
  0x1a   : > { %651 = vrot.lane.b32.xlu0 %v611_v9, %s7316_s25  ;;  %v479_v16 = vshrl.u32 %v7398_v7, 16  ;;  %v594_v19 = vrot.slane %v7405_v11, 1  ;;  %v472_v20 = vrot.slane %v470_v13, 1  ;;  %v595_v23 = vrot.slane %v7414_v17, 1  ;;  %v7440_v37 = vld [vmem:[%s7382_s24 + $0x60] sm:$0xff]   ;;  %v7464_v59 = vld [vmem:[%s7382_s24 + $0x6c] sm:$0xff]  }
  0x1b   : > { %v466_v18 = vor.u32 %v464_v6, %v462_v10  ;;  %v614_v21 = vsel %vm590_vm0, %v612_v8, %v613_v14  ;;  %v477_v22 = vrot.slane %v475_v15, 1  ;;  %v7426_v26 = vld [vmem:[%s7382_s24 + $0x20] ss:$0 sps:$4 sm:$0x33]   ;;  %v378_v27 = vshrl.u32 %v7405_v11, 16  ;;  %v7468_v60 = vld [vmem:[%s7382_s24 + $0x24] sm:$0xff]  }
  0x1c   : > { %v473_v25 = vor.u32 %v472_v20, %v468_v12  ;;  %v380_v28 = vshll.u32 %v7405_v11, 16  ;;  %v385_v29 = vshll.u32 %v7414_v17, 16  ;;  %v597_v31 = vrot.slane %v7422_v24, 1  ;;  %v7447_v43 = vld [vmem:[%s7382_s24 + $0x68] ss:$0 sps:$4 sm:$0x33]  }
  0x1d   : > { %568 = vrot.lane.b32.xlu1 %v466_v18, %s7317_s26  ;;  %v481_v30 = vor.u32 %v479_v16, %v477_v22  ;;  %v455_v32 = vshll.u32 %v7385_v0, 16  ;;  %v596_v33 = vsel %vm590_vm0, %v594_v19, %v595_v23  ;;  %v598_v34 = vrot.slane %v7426_v26, 1  ;;  %v7474_v62 = vld [vmem:[%s7382_s24 + $0x74] ss:$0 sps:$4 sm:$0x33]  }
  0x1e   : > { %655 = vrot.lane.b32.xlu0 %v614_v21, %s7316_s25  ;;  %v382_v35 = vrot.slane %v380_v28, 1  ;;  %v453_v36 = vshrl.u32 %v7385_v0, 16  ;;  %v395_v39 = vshll.u32 %v7422_v24, 16  ;;  %v478_v40 = vsel %vm361_vm1, %v473_v25, %v477_v22  ;;  %v7482_v8 = vld [vmem:[%s7382_s24 + $0x2c] ss:$0 sps:$4 sm:$0x33]  }
  0x1f   : > { %v457_v38 = vrot.slane %v455_v32, 1  ;;  %v387_v41 = vrot.slane %v385_v29, 1  ;;  %v393_v42 = vshrl.u32 %v7422_v24, 16  ;;  %v485_v44 = vshll.u32 %v7440_v37, 16  ;;  %v7488_v12 = vld [vmem:[%s7382_s24 + $0x30] sm:$0xff]  }
  0x20   : > { %v599_v45 = vsel %vm590_vm0, %v597_v31, %v598_v34  ;;  %v383_v46 = vor.u32 %v382_v35, %v378_v27  ;;  %v397_v47 = vrot.slane %v395_v39, 1  ;;  %v400_v48 = vshll.u32 %v7426_v26, 16  ;;  %v7504_v25 = vld [vmem:[%s7382_s24 + $0x38] ss:$0 sps:$4 sm:$0x33]  }
  0x21   : > { %572 = vrot.lane.b32.xlu1 %v481_v30, %s7317_s26  ;;  %v458_v49 = vor.u32 %v457_v38, %v453_v36  ;;  %v483_v50 = vshrl.u32 %v7440_v37, 16  ;;  %v487_v51 = vrot.slane %v485_v44, 1  ;;  %v490_v52 = vshll.u32 %v7447_v43, 16 }
  0x22   : > { %631 = vrot.lane.b32.xlu0 %v596_v33, %s7316_s25  ;;  %v388_v53 = vsel %vm361_vm1, %v383_v46, %v387_v41  ;;  %v398_v54 = vor.u32 %v397_v47, %v393_v42  ;;  %v7460_v55 = vrot.slane %v400_v48, 1  ;;  %v500_v3 = vshll.u32 %v7464_v59, 16  ;;  %v7535_v46 = vld [vmem:[%s7382_s24 + $0x78] sm:$0xff]  }
  0x23   : > { %v463_v56 = vsel %vm361_vm1, %v458_v49, %v462_v10  ;;  %v488_v57 = vor.u32 %v487_v51, %v483_v50  ;;  %v492_v58 = vrot.slane %v490_v52, 1  ;;  %v615_v5 = vrot.slane %v7440_v37, 1  ;;  %v7544_v52 = vld [vmem:[%s7382_s24 + $0x80] ss:$0 sps:$4 sm:$0x33]  }
  0x24   : > { %v403_v61 = vsel %vm361_vm1, %v398_v54, %v7460_v55  ;;  %v616_v6 = vrot.slane %v7447_v43, 1  ;;  %v410_v9 = vshll.u32 %v7468_v60, 16  ;;  %v389_v10 = vshrl.u32 %v7414_v17, 16 }
  0x25   : > { %570 = vrot.lane.b32.xlu1 %v478_v40, %s7317_s26  ;;  %v493_v63 = vsel %vm361_vm1, %v488_v57, %v492_v58  ;;  %v498_v13 = vshrl.u32 %v7464_v59, 16  ;;  %v502_v15 = vrot.slane %v500_v3, 1  ;;  %v505_v16 = vshll.u32 %v7474_v62, 16 }
  0x26   : > { %635 = vrot.lane.b32.xlu0 %v599_v45, %s7316_s25  ;;  %v408_v18 = vshrl.u32 %v7468_v60, 16  ;;  %v412_v19 = vrot.slane %v410_v9, 1  ;;  %v415_v20 = vshll.u32 %v7482_v8, 16  ;;  %v617_v21 = vsel %vm590_vm0, %v615_v5, %v616_v6  ;;  %v7563_v9 = vld [vmem:[%s7382_s24 + $0x44] ss:$0 sps:$4 sm:$0x33]  }
  0x27   : > { %v391_v22 = vor.u32 %v389_v10, %v387_v41  ;;  %v425_v27 = vshll.u32 %v7488_v12, 16  ;;  %v503_v28 = vor.u32 %v502_v15, %v498_v13  ;;  %v430_v32 = vshll.u32 %v7504_v25, 16 }
  0x28   : > { %v417_v29 = vrot.slane %v415_v20, 1  ;;  %v413_v30 = vor.u32 %v412_v19, %v408_v18  ;;  %v618_v35 = vrot.slane %v7464_v59, 1  ;;  %v619_v36 = vrot.slane %v7474_v62, 1 }
  0x29   : > { %546 = vrot.lane.b32.xlu1 %v388_v53, %s7317_s26  ;;  %v427_v31 = vrot.slane %v425_v27, 1  ;;  %v7522_v40 = vrot.slane %v430_v32, 1  ;;  %v600_v42 = vrot.slane %v7468_v60, 1  ;;  %v601_v44 = vrot.slane %v7482_v8, 1 }
  0x2a   : > { %566 = vrot.lane.b32.xlu0 %v463_v56, %s7317_s26  ;;  %v418_v38 = vsel %vm361_vm1, %v413_v30, %v417_v29  ;;  %v620_v41 = vsel %vm590_vm0, %v618_v35, %v619_v36  ;;  %v603_v48 = vrot.slane %v7488_v12, 1  ;;  %v604_v49 = vrot.slane %v7504_v25, 1  ;;  %v7551_v56 = vld [vmem:[%s7382_s24 + $0x3c] sm:$0xff]  }
  0x2b   : > { %v602_v47 = vsel %vm590_vm0, %v600_v42, %v601_v44  ;;  %v404_v51 = vshrl.u32 %v7426_v26, 16  ;;  %v515_v53 = vshll.u32 %v7535_v46, 16  ;;  %v419_v57 = vshrl.u32 %v7482_v8, 16 }
  0x2c   : > { %v605_v54 = vsel %vm590_vm0, %v603_v48, %v604_v49  ;;  %v520_v5 = vshll.u32 %v7544_v52, 16  ;;  %v440_v10 = vshll.u32 %v7551_v56, 16  ;;  %v445_v19 = vshll.u32 %v7563_v9, 16 }
  0x2d   : > { %550 = vrot.lane.b32.xlu1 %v403_v61, %s7317_s26  ;;  %v406_v61 = vor.u32 %v404_v51, %v7460_v55  ;;  %v517_v3 = vrot.slane %v515_v53, 1  ;;  %v421_v13 = vor.u32 %v419_v57, %v417_v29  ;;  %v509_v29 = vshrl.u32 %v7474_v62, 16  ;;  %v7266_v51 = vld [vmem:[%s7382_s24 + $0x84] sm:$0xff]  }
  0x2e   : > { %574 = vrot.lane.b32.xlu0 %v493_v63, %s7317_s26  ;;  %v513_v63 = vshrl.u32 %v7535_v46, 16  ;;  %v522_v15 = vrot.slane %v520_v5, 1  ;;  %v442_v18 = vrot.slane %v440_v10, 1  ;;  %v607_v32 = vrot.slane %v7563_v9, 1 }
  0x2f   : > { %v434_v35 = vshrl.u32 %v7504_v25, 16  ;;  %v449_v42 = vshrl.u32 %v7563_v9, 16  ;;  %v530_v57 = vshll.u32 %v7266_v51, 16 }
  0x30   : > { %v518_v55 = vor.u32 %v517_v3, %v513_v63  ;;  %v528_v63 = vshrl.u32 %v7266_v51, 16 }
  0x31   : > { %653 = vrot.lane.b32.xlu1 %v610_v4, %s7316_s25  ;;  %v7507_v4 = vrot.slane %v505_v16, 1  ;;  %v438_v16 = vshrl.u32 %v7551_v56, 16  ;;  %v532_v25 = vrot.slane %v530_v57, 1 }
  0x32   : > { %657 = vrot.lane.b32.xlu0 %v613_v14, %s7316_s25  ;;  %v423_v14 = vshrl.u32 %v7488_v12, 16 }
  0x33   : > { %v508_v33 = vsel %vm361_vm1, %v503_v28, %v7507_v4  ;;  %v443_v27 = vor.u32 %v442_v18, %v438_v16  ;;  %v447_v28 = vrot.slane %v445_v19, 1  ;;  %v533_v5 = vor.u32 %v532_v25, %v528_v63 }
  0x34   : > { %v428_v39 = vor.u32 %v427_v31, %v423_v14  ;;  %v7587_v14 = vld [vmem:[%s7382_s24] sm:$0xff]   ;;  %v606_v31 = vrot.slane %v7551_v56, 1 }
  0x35   : > { %659 = vrot.lane.b32.xlu1 %v617_v21, %s7316_s25  ;;  %v621_v21 = vrot.slane %v7535_v46, 1 }
  0x36   : > { %548 = vrot.lane.b32.xlu0 %v391_v22, %s7317_s26  ;;  %v433_v45 = vsel %vm361_vm1, %v428_v39, %v7522_v40  ;;  %v622_v22 = vrot.slane %v7544_v52, 1  ;;  %v365_v39 = vshll.u32 %v7587_v14, 16 }
  0x38   : > { %v623_v30 = vsel %vm590_vm0, %v621_v21, %v622_v22 }
  0x39   : > { %633 = vrot.lane.b32.xlu1 %v595_v23, %s7316_s25  ;;  %v494_v23 = vshrl.u32 %v7447_v43, 16 }
  0x3a   : > { %578 = vrot.lane.b32.xlu0 %v508_v33, %s7317_s26  ;;  %v511_v33 = vor.u32 %v509_v29, %v7507_v4  ;;  %v363_v4 = vshrl.u32 %v7587_v14, 16 }
  0x3b   : > { %v496_v50 = vor.u32 %v494_v23, %v492_v58  ;;  %v7268_v58 = vld [vmem:[%s9979_s1 + $0x8] sm:$0x3f]   ;;  %v367_v23 = vrot.slane %v365_v39, 1 }
  0x3c   : > { %7189 = vmatprep.subr.msk.bf16.mxu1 %vm2024_vm2, %v7268_v58  ;;  %7188 = vmatprep.subr.msk.bf16.mxu0 %vm2024_vm2, %v7268_v58  ;;  %v2026_v20 = vsel %vm2024_vm2, %v7268_v58, 0 }
  0x3d   : > { %554 = vrot.lane.b32.xlu1 %v418_v38, %s7317_s26  ;;  %7187 = vmatpush3.bf16.msra.mxu1 %v2026_v20  ;;  %v7597_v38 = vld [vmem:[%s7382_s24 + $0x8] ss:$0 sps:$4 sm:$0x33]   ;;  %v368_v48 = vor.u32 %v367_v23, %v363_v4 }
  0x3e   : > { %663 = vrot.lane.b32.xlu0 %v620_v41, %s7316_s25  ;;  %7109 = vmatpush3.bf16.msra.mxu0 %v2026_v20  ;;  %v608_v41 = vsel %vm590_vm0, %v606_v31, %v607_v32  ;;  %v592_v62 = vrot.slane %v7597_v38, 1  ;;  %v7269_v20 = vld [vmem:[%s9979_s1] sm:$0x3f]  }
  0x3f   : > { %7190 = vmatprep.subr.msk.bf16.mxu1 %vm2024_vm2, %v7269_v20 }
  0x41   : > { %558 = vrot.lane.b32.xlu1 %v433_v45, %s7317_s26  ;;  %v370_v45 = vshll.u32 %v7597_v38, 16 }
  0x42   : > { %639 = vrot.lane.b32.xlu0 %v602_v47, %s7316_s25  ;;  %v451_v47 = vor.u32 %v449_v42, %v447_v28 }
  0x45   : > { %576 = vrot.lane.b32.xlu1 %v496_v50, %s7317_s26  ;;  %v372_v50 = vrot.slane %v370_v45, 1 }
  0x46   : > { %643 = vrot.lane.b32.xlu0 %v605_v54, %s7316_s25  ;;  %v591_v54 = vrot.slane %v7587_v14, 1 }
  0x47   : > { %v373_v53 = vsel %vm361_vm1, %v368_v48, %v372_v50 }
  0x49   : > { %661 = vrot.lane.b32.xlu1 %v616_v6, %s7316_s25  ;;  %v523_v6 = vsel %vm361_vm1, %v518_v55, %v522_v15 }
  0x4a   : > { %552 = vrot.lane.b32.xlu0 %v406_v61, %s7317_s26  ;;  %v374_v61 = vshrl.u32 %v7597_v38, 16 }
  0x4c   : > { %v376_v3 = vor.u32 %v374_v61, %v372_v50 }
  0x4d   : > { %556 = vrot.lane.b32.xlu1 %v421_v13, %s7317_s26  ;;  %v624_v13 = vrot.slane %v7266_v51, 1 }
  0x4e   : > { %637 = vrot.lane.b32.xlu0 %v598_v34, %s7316_s25  ;;  %v448_v34 = vsel %vm361_vm1, %v443_v27, %v447_v28  ;;  %v802_v28 = vlaneseq }
  0x50   : > { %v7644_v31 = vshrl.u32 %v802_v28, 7 }
  0x51   : > { %582 = vrot.lane.b32.xlu1 %v523_v6, %s7317_s26  ;;  %v7270_v6 = vld [vmem:[%s9979_s1 + $0x10] sm:$0x3f]  }
  0x52   : > { %641 = vrot.lane.b32.xlu0 %v601_v44, %s7316_s25  ;;  %v436_v44 = vor.u32 %v434_v35, %v7522_v40  ;;  %v524_v40 = vshrl.u32 %v7544_v52, 16  ;;  %v593_v52 = vsel %vm590_vm0, %v591_v54, %v592_v62  ;;  %7191 = vmatprep.subr.msk.bf16.mxu0 %vm2024_vm2, %v7270_v6  ;;  %10038 = vst [vmem:[#allocation2_spill] sm:$0xff] %v7644_v31  ;;  %v7693_v28 = vsel %vm2024_vm2, %v7270_v6, 0 }
  0x54   : > { %v526_v58 = vor.u32 %v524_v40, %v522_v15 }
  0x55   : > { %667 = vrot.lane.b32.xlu1 %v623_v30, %s7316_s25 }
  0x56   : > { %562 = vrot.lane.b32.xlu0 %v448_v34, %s7317_s26 }
  0x59   : > { %580 = vrot.lane.b32.xlu1 %v511_v33, %s7317_s26 }
  0x5a   : > { %647 = vrot.lane.b32.xlu0 %v608_v41, %s7316_s25 }
  0x5d   : > { %665 = vrot.lane.b32.xlu1 %v619_v36, %s7316_s25  ;;  %v7267_v36 = vld [vmem:[%s7382_s24 + $0x8c] ss:$0 sps:$4 sm:$0x33]  }
  0x5e   : > { %560 = vrot.lane.b32.xlu0 %v436_v44, %s7317_s26  ;;  %v625_v55 = vrot.slane %v7267_v36, 1  ;;  %v539_v15 = vshrl.u32 %v7267_v36, 16 }
  0x60   : > { %v626_v18 = vsel %vm590_vm0, %v624_v13, %v625_v55 }
  0x61   : > { %564 = vrot.lane.b32.xlu1 %v451_v47, %s7317_s26 }
  0x62   : > { %645 = vrot.lane.b32.xlu0 %v604_v49, %s7316_s25  ;;  %v535_v49 = vshll.u32 %v7267_v36, 16 }
  0x64   : > { %v537_v10 = vrot.slane %v535_v49, 1 }
  0x65   : > { %542 = vrot.lane.b32.xlu1 %v373_v53, %s7317_s26 }
  0x66   : > { %649 = vrot.lane.b32.xlu0 %v607_v32, %s7316_s25  ;;  %v538_v16 = vsel %vm361_vm1, %v533_v5, %v537_v10  ;;  %v541_v19 = vor.u32 %v539_v15, %v537_v10 }
  0x69   : > { %584 = vrot.lane.b32.xlu1 %v526_v58, %s7317_s26 }
  0x6a   : > { %627 = vrot.lane.b32.xlu0 %v593_v52, %s7316_s25 }
  0x6d   : > { %669 = vrot.lane.b32.xlu1 %v622_v22, %s7316_s25  ;;  %v7318_v22 = vmov 1966171168  }
  0x6e   : > { %544 = vrot.lane.b32.xlu0 %v376_v3, %s7317_s26  ;;  %v800_v27 = vunpack.c.l.s4 %v7318_v22 }
  0x70   : > { %v801_v34 = vunpack.c.0.s8 %v800_v27  ;;  %v7690_v27 = vsel %vm2024_vm2, %v7269_v20, 0 }
  0x71   : > { %629 = vrot.lane.b32.xlu1 %v592_v62, %s7316_s25 }
  0x72   : > { %586 = vrot.lane.b32.xlu0 %v538_v16, %s7317_s26  ;;  %v7647_v35 = vsub.s32 %v801_v34, %v7644_v31 }
  0x75   : > { %671 = vrot.lane.b32.xlu1 %v626_v18, %s7316_s25 }
  0x76   : > { %588 = vrot.lane.b32.xlu0 %v541_v19, %s7317_s26 }
  0x79   : > { %673 = vrot.lane.b32.xlu1 %v625_v55, %s7316_s25 }
  0x8c   : > { %v652_v21 = vpop.permute.xlu0 %651 }
  0x8f   : > { %v569_v29 = vpop.permute.xlu1 %568 }
  0x90   : > { %v656_v30 = vpop.permute.xlu0 %655 }
  0x93   : > { %v573_v32 = vpop.permute.xlu1 %572 }
  0x94   : > { %v632_v33 = vpop.permute.xlu0 %631 }
  0x97   : > { %v571_v39 = vpop.permute.xlu1 %570 }
  0x98   : > { %v705_v41 = vsel %vm675_vm4, %v7391_v2, %v571_v39  ;;  %v636_v42 = vpop.permute.xlu0 %635 }
  0x99   : > { %v754_v44 = vsel %vm724_vm3, %v705_v41, %v656_v30  ;;  %v707_v30 = vsel %vm675_vm4, %v7398_v7, %v573_v32 }
  0x9a   : > { %v1183_v4 = vrot.slane %v754_v44, %v7647_v35  ;;  %v1176_v45 = vcombine.high %v754_v44, %v754_v44 }
  0x9b   : > { %v547_v23 = vpop.permute.xlu1 %546 }
  0x9c   : > { %v1191_v47 = vcombine.high %v1183_v4, %v1183_v4  ;;  %v7654_v48 = vrot.slane %v1183_v4, %v7647_v35  ;;  %v681_v50 = vsel %vm675_vm4, %v7405_v11, %v547_v23  ;;  %v567_v51 = vpop.permute.xlu0 %566  ;;  %v1190_v58 = vrot.slane %v1176_v45, %v7647_v35 }
  0x9d   : > { %v730_v40 = vsel %vm724_vm3, %v681_v50, %v632_v33  ;;  %v701_v2 = vsel %vm675_vm4, %v7385_v0, %v567_v51 }
  0x9e   : > { %v7662_v53 = vrot.slane %v1191_v47, %v7647_v35  ;;  %v1221_v54 = vcombine.high %v7654_v48, %v7654_v48  ;;  %v798_v62 = vcombine.high %v730_v40, %v730_v40  ;;  %v750_v36 = vsel %vm724_vm3, %v701_v2, %v652_v21 }
  0x9f   : > { %v551_v57 = vpop.permute.xlu1 %550  ;;  %v805_v11 = vrot.slane %v730_v40, %v7647_v35  ;;  %v1113_v63 = vcombine.high %v750_v36, %v750_v36  ;;  %v1192_v10 = vcombine.high %v1190_v58, %v1190_v58  ;;  %v1120_v55 = vrot.slane %v750_v36, %v7647_v35 }
  0xa0   : > { %10039 = vst [vmem:[#allocation3_spill] sm:$0xff] %v7662_v53  ;;  %v575_v61 = vpop.permute.xlu0 %574  ;;  %v812_v52 = vrot.slane %v798_v62, %v7647_v35  ;;  %v685_v0 = vsel %vm675_vm4, %v7422_v24, %v551_v57  ;;  %v2613_v25 = vcombine.low %v7662_v53, %v1221_v54  ;;  %v703_v21 = vsel %vm675_vm4, %v7388_v1, %v569_v29 }
  0xa1   : > { %v813_v13 = vcombine.high %v805_v11, %v805_v11  ;;  %v1127_v24 = vrot.slane %v1113_v63, %v7647_v35  ;;  %v734_v19 = vsel %vm724_vm3, %v685_v0, %v636_v42  ;;  %v7687_v22 = vrot.slane %v805_v11, %v7647_v35 }
  0xa2   : > { %v814_v49 = vcombine.high %v812_v52, %v812_v52  ;;  %v7674_v3 = vrot.slane %v812_v52, %v7647_v35  ;;  %v7698_v34 = vrot.slane %v1190_v58, %v7647_v35  ;;  %v868_v1 = vrot.slane %v734_v19, %v7647_v35 }
  0xa3   : > { %v654_v5 = vpop.permute.xlu1 %653  ;;  %v7705_v39 = vrot.slane %v1192_v10, %v7647_v35  ;;  %v7710_v6 = vrot.slane %v813_v13, %v7647_v35  ;;  %v1128_v41 = vcombine.high %v1120_v55, %v1120_v55  ;;  %v1129_v32 = vcombine.high %v1127_v24, %v1127_v24 }
  0xa4   : > { %v658_v15 = vpop.permute.xlu0 %657  ;;  %v7678_v16 = vrot.slane %v814_v49, %v7647_v35  ;;  %v844_v18 = vcombine.high %v7674_v3, %v7674_v3  ;;  %10040 = vst [vmem:[#allocation4_spill] sm:$0xff] %v7698_v34  ;;  %v7713_v42 = vrot.slane %v1120_v55, %v7647_v35  ;;  %v876_v44 = vcombine.high %v868_v1, %v868_v1 }
  0xa5   : > { %v752_v4 = vsel %vm724_vm3, %v703_v21, %v654_v5  ;;  %v709_v47 = vsel %vm675_vm4, %v7440_v37, %v575_v61  ;;  %v7724_v51 = vrot.slane %v1127_v24, %v7647_v35  ;;  %v7727_v40 = vrot.slane %v868_v1, %v7647_v35 }
  0xa6   : > { %v7701_v33 = vcombine.low %v7678_v16, %v844_v18  ;;  %v1168_v50 = vrot.slane %v752_v4, %v7647_v35  ;;  %v7730_v2 = vrot.slane %v876_v44, %v7647_v35  ;;  %v1222_v54 = vcombine.high %v7698_v34, %v7698_v34 }
  0xa7   : > { %v660_v29 = vpop.permute.xlu1 %659  ;;  %10041 = vst [vmem:[#allocation5_spill] sm:$0xff] %v7724_v51  ;;  %v845_v62 = vcombine.high %v7710_v6, %v7710_v6  ;;  %v7737_v36 = vrot.slane %v1128_v41, %v7647_v35  ;;  %v756_v57 = vsel %vm724_vm3, %v707_v30, %v658_v15  ;;  %v7744_v58 = vrot.slane %v1129_v32, %v7647_v35 }
  0xa8   : > { %v549_v7 = vpop.permute.xlu0 %548  ;;  %v7740_v37 = vrot.slane %v1168_v50, %v7647_v35  ;;  %v1231_v52 = vrot.slane %v756_v57, %v7647_v35  ;;  %v861_v0 = vcombine.high %v734_v19, %v734_v19  ;;  %v1224_v5 = vcombine.high %v7705_v39, %v7705_v39 }
  0xa9   : > { %10042 = vst [vmem:[#allocation6_spill] sm:$0xff] %v7744_v58  ;;  %v758_v10 = vsel %vm724_vm3, %v709_v47, %v660_v29  ;;  %v2615_v55 = vcombine.low %v7705_v39, %v1222_v54  ;;  %v7762_v21 = vcombine.low %v845_v62, %v7674_v3  ;;  %v7765_v19 = vrot.slane %v2613_v25, %v7647_v35 }
  0xaa   : > { %v2567_v49 = vcombine.low %v7740_v37, %v7654_v48  ;;  %v7758_v15 = vrot.slane %v1231_v52, %v7647_v35  ;;  %v1239_v18 = vcombine.high %v758_v10, %v758_v10  ;;  %v1246_v24 = vrot.slane %v758_v10, %v7647_v35 }
  0xab   : > { %v634_v63 = vpop.permute.xlu1 %633  ;;  %10043 = vst [vmem:[#allocation7_spill] sm:$0xff] %v7765_v19  ;;  %v2320_v1 = vcombine.low %v7727_v40, %v7730_v2  ;;  %v683_v44 = vsel %vm675_vm4, %v7414_v17, %v549_v7  ;;  %v875_v25 = vrot.slane %v861_v0, %v7647_v35  ;;  %v1161_v47 = vcombine.high %v7744_v58, %v7744_v58 }
  0xac   : > { %v579_v13 = vpop.permute.xlu0 %578  ;;  %v7768_v30 = vrot.slane %v2567_v49, %v7647_v35  ;;  %v2616_v29 = vcombine.low %v1224_v5, %v7758_v15  ;;  %v1253_v41 = vrot.slane %v1239_v18, %v7647_v35  ;;  %v1254_v32 = vcombine.high %v1246_v24, %v1246_v24 }
  0xad   : > { %v7784_v54 = vrot.slane %v2615_v55, %v7647_v35  ;;  %v6972_v52 = vcombine.high %v7724_v51, %v7744_v58  ;;  %v7795_v0 = vrot.slane %v1246_v24, %v7647_v35  ;;  %v732_v49 = vsel %vm724_vm3, %v683_v44, %v634_v63 }
  0xae   : > { %10044 = vst [vmem:[#allocation8_spill] sm:$0xff] %v7768_v30  ;;  %v7787_v62 = vrot.slane %v2616_v29, %v7647_v35  ;;  %v1255_v57 = vcombine.high %v1253_v41, %v1253_v41  ;;  %v7790_v17 = vrot.slane %v1254_v32, %v7647_v35  ;;  %v713_v5 = vsel %vm675_vm4, %v7464_v59, %v579_v13 }
  0xaf   : > { %10045 = vst [vmem:[#allocation9_spill] sm:$0xff] %v7784_v54  ;;  %v555_v7 = vpop.permute.xlu1 %554  ;;  %10048 = vst [vmem:[#allocation12_spill] sm:$0xff] %v7795_v0  ;;  %v7805_v29 = vrot.slane %v1253_v41, %v7647_v35  ;;  %v877_v24 = vcombine.high %v875_v25, %v875_v25  ;;  %v853_v13 = vrot.slane %v732_v49, %v7647_v35 }
  0xb0   : > { %10046 = vst [vmem:[#allocation10_spill] sm:$0xff] %v7787_v62  ;;  %10047 = vst [vmem:[#allocation11_spill] sm:$0xff] %v7790_v17  ;;  %v664_v10 = vpop.permute.xlu0 %663  ;;  %v7808_v32 = vrot.slane %v1255_v57, %v7647_v35  ;;  %v7816_v44 = vrot.slane %v875_v25, %v7647_v35  ;;  %v846_v41 = vcombine.high %v7678_v16, %v7678_v16 }
  0xb1   : > { %10049 = vst [vmem:[#allocation13_spill] sm:$0xff] %v7805_v29  ;;  %v762_v57 = vsel %vm724_vm3, %v713_v5, %v664_v10  ;;  %v860_v50 = vrot.slane %v853_v13, %v7647_v35  ;;  %v1428_v59 = vcombine.low %v7687_v22, %v7710_v6  ;;  %v7828_v49 = vrot.slane %v6972_v52, %v7647_v35 }
  0xb2   : > { %10050 = vst [vmem:[#allocation14_spill] sm:$0xff] %v7808_v32  ;;  %v1302_v20 = vcombine.high %v762_v57, %v762_v57  ;;  %v1309_v63 = vrot.slane %v762_v57, %v7647_v35  ;;  %v6942_v25 = vcombine.high %v7687_v22, %v7710_v6  ;;  %v1430_v18 = vcombine.low %v7674_v3, %v7678_v16 }
  0xb3   : > { %10051 = vst [vmem:[#allocation15_spill] sm:$0xff] %v7828_v49  ;;  %v6943_v5 = vcombine.high %v7674_v3, %v7678_v16  ;;  %v7836_v10 = vpop.permute.xlu1 %558  ;;  %v7839_v13 = vrot.slane %v877_v24, %v7647_v35  ;;  %v906_v57 = vcombine.high %v7727_v40, %v7727_v40  ;;  %v2319_v4 = vcombine.low %v846_v41, %v860_v50 }
  0xb4   : > { %v1317_v52 = vcombine.high %v1309_v63, %v1309_v63  ;;  %v7844_v61 = vrot.slane %v1302_v20, %v7647_v35  ;;  %v1438_v55 = vrot.slane %v1428_v59, %v7647_v35  ;;  %v1445_v45 = vrot.slane %v6942_v25, %v7647_v35  ;;  %v640_v23 = vpop.permute.xlu0 %639 }
  0xb5   : > { %v1452_v3 = vrot.slane %v1430_v18, %v7647_v35  ;;  %v7854_v11 = vrot.slane %v2320_v1, %v7647_v35  ;;  %v2329_v41 = vrot.slane %v2319_v4, %v7647_v35  ;;  %v1459_v59 = vrot.slane %v6943_v5, %v7647_v35 }
  0xb6   : > { %v7858_v20 = vrot.slane %v1317_v52, %v7647_v35  ;;  %v1460_v25 = vcombine.low %v1438_v55, %v1445_v45  ;;  %v1159_v18 = vcombine.high %v7724_v51, %v7724_v51  ;;  %v1724_v16 = vcombine.low %v1161_v47, %v7740_v37 }
  0xb7   : > { %v1478_v1 = vcombine.low %v7730_v2, %v906_v57  ;;  %v7868_v31 = vcombine.low %v2329_v41, %v7854_v11  ;;  %v1774_v4 = vcombine.low %v7758_v15, %v7795_v0  ;;  %v7874_v5 = vrot.slane %v7844_v61, %v7647_v35  ;;  %v7878_v37 = vpop.permute.xlu1 %576 }
  0xb8   : > { %v1349_v45 = vcombine.high %v7858_v20, %v7858_v20  ;;  %v1461_v55 = vcombine.low %v1452_v3, %v1459_v59  ;;  %v1477_v47 = vcombine.low %v860_v50, %v7727_v40  ;;  %v689_v57 = vsel %vm675_vm4, %v7468_v60, %v555_v7 }
  0xb9   : > { %v1468_v52 = vrot.slane %v1460_v25, %v7647_v35  ;;  %v1160_v15 = vcombine.high %v7737_v36, %v7737_v36  ;;  %v1723_v54 = vcombine.low %v7744_v58, %v1159_v18  ;;  %v1725_v3 = vcombine.low %v7654_v48, %v7662_v53  ;;  %v644_v25 = vpop.permute.xlu0 %643 }
  0xba   : > { %v7887_v41 = vcombine.low %v1349_v45, %v7874_v5  ;;  %v1475_v24 = vrot.slane %v1461_v55, %v7647_v35  ;;  %v1284_v50 = vcombine.high %v7795_v0, %v7795_v0  ;;  %v1746_v7 = vrot.slane %v1724_v16, %v7647_v35 }
  0xbb   : > { %v1722_v60 = vcombine.low %v1160_v15, %v7724_v51  ;;  %v738_v59 = vsel %vm724_vm3, %v689_v57, %v640_v23  ;;  %v1286_v45 = vcombine.high %v7790_v17, %v7790_v17  ;;  %v1739_v55 = vrot.slane %v1723_v54, %v7647_v35 }
  0xbc   : > { %10052 = vst [vmem:[#allocation16_spill] sm:$0xff] %v7887_v41  ;;  %v1476_v41 = vcombine.low %v1468_v52, %v1475_v24  ;;  %v1753_v18 = vrot.slane %v1725_v3, %v7647_v35  ;;  %v7903_v49 = vrot.slane %v1309_v63, %v7647_v35  ;;  %v1772_v15 = vcombine.low %v7698_v34, %v7705_v39  ;;  %v7913_v52 = vpop.permute.xlu1 %661 }
  0xbd   : > { %v1732_v62 = vrot.slane %v1722_v60, %v7647_v35  ;;  %v6949_v23 = vcombine.high %v7698_v34, %v7705_v39  ;;  %v1487_v16 = vrot.slane %v1477_v47, %v7647_v35  ;;  %v924_v57 = vcombine.high %v738_v59, %v738_v59 }
  0xbe   : > { %7110 = vmatprep.mubr.msk.bf16.mxu0 %vm1987_vm5, %v1476_v41  ;;  %v1755_v24 = vcombine.low %v1746_v7, %v1753_v18  ;;  %v1802_v54 = vrot.slane %v1774_v4, %v7647_v35  ;;  %v931_v3 = vrot.slane %v738_v59, %v7647_v35  ;;  %v10053_v60 = vcombine.high %v7654_v48, %v7662_v53  ;;  %v553_v18 = vpop.permute.xlu0 %552 }
  0xbf   : > { %v1754_v63 = vcombine.low %v1732_v62, %v1739_v55  ;;  %v1788_v39 = vrot.slane %v1772_v15, %v7647_v35  ;;  %v1494_v47 = vrot.slane %v1478_v1, %v7647_v35  ;;  %v1318_v41 = vcombine.high %v7844_v61, %v7844_v61 }
  0xc0   : > { %v1781_v19 = vrot.slane %v10053_v60, %v7647_v35  ;;  %v1769_v7 = vrot.slane %v1755_v24, %v7647_v35  ;;  %v1795_v4 = vrot.slane %v6949_v23, %v7647_v35  ;;  %v1285_v62 = vcombine.high %v7805_v29, %v7805_v29 }
  0xc1   : > { %v7929_v59 = vcombine.low %v7790_v17, %v1284_v50  ;;  %v1762_v48 = vrot.slane %v1754_v63, %v7647_v35  ;;  %v7933_v15 = vcombine.low %v1286_v45, %v7805_v29  ;;  %v1347_v61 = vcombine.high %v7903_v49, %v7903_v49  ;;  %v557_v17 = vpop.permute.xlu1 %556 }
  0xc2   : > { %v1803_v55 = vcombine.low %v1781_v19, %v1788_v39  ;;  %v938_v1 = vrot.slane %v924_v57, %v7647_v35  ;;  %v1804_v24 = vcombine.low %v1795_v4, %v1802_v54  ;;  %v1509_v23 = vcombine.low %v1487_v16, %v1494_v47 }
  0xc3   : > { %v1770_v60 = vcombine.low %v1762_v48, %v1769_v7  ;;  %v693_v50 = vsel %vm675_vm4, %v7488_v12, %v7836_v10  ;;  %v939_v30 = vcombine.high %v931_v3, %v931_v3  ;;  %v7942_v63 = vrot.slane %v1318_v41, %v7647_v35 }
  0xc4   : > { %v1811_v19 = vrot.slane %v1803_v55, %v7647_v35  ;;  %v1818_v45 = vrot.slane %v1804_v24, %v7647_v35  ;;  %v742_v39 = vsel %vm724_vm3, %v693_v50, %v644_v25  ;;  %v7951_v16 = vrot.slane %v931_v3, %v7647_v35 }
  0xc5   : > { %7122 = vmatprep.mubr.msk.bf16.mxu1 %vm1987_vm5, %v1770_v60  ;;  %v987_v12 = vcombine.high %v742_v39, %v742_v39  ;;  %v10054_v10 = vcombine.high %v7730_v2, %v7730_v2  ;;  %v940_v47 = vcombine.high %v938_v1, %v938_v1  ;;  %v994_v7 = vrot.slane %v742_v39, %v7647_v35  ;;  %v638_v60 = vpop.permute.xlu0 %637  ;;  %v583_v57 = vpop.permute.xlu1 %582 }
  0xc6   : > { %v1819_v41 = vcombine.low %v1811_v19, %v1818_v45  ;;  %v10055_v25 = vcombine.high %v7816_v44, %v7816_v44  ;;  %v7965_v3 = vrot.slane %v938_v1, %v7647_v35  ;;  %v7968_v55 = vrot.slane %v939_v30, %v7647_v35 }
  0xc7   : > { %v1479_v54 = vcombine.low %v10054_v10, %v7816_v44  ;;  %v6974_v45 = vcombine.high %v7805_v29, %v7808_v32  ;;  %v2712_v39 = vcombine.low %v7858_v20, %v1347_v61  ;;  %v969_v10 = vcombine.high %v7951_v16, %v7951_v16 }
  0xc8   : > { %v1480_v4 = vcombine.low %v7839_v13, %v10055_v25  ;;  %7123 = vmatmul.mubr.msk.bf16.vlgmr.msra.gmra.mxu1 %vm1987_vm5, %v1819_v41  ;;  %v7987_v41 = vrot.slane %v940_v47, %v7647_v35  ;;  %v1002_v25 = vcombine.high %v994_v7, %v994_v7  ;;  %v1517_v61 = vrot.slane %v1509_v23, %v7647_v35 }
  0xc9   : > { %v1501_v24 = vrot.slane %v1479_v54, %v7647_v35  ;;  %v1001_v54 = vrot.slane %v987_v12, %v7647_v35  ;;  %7135 = vmatpush3.bf16.msra.mxu1 %v7690_v27  ;;  %v970_v1 = vcombine.high %v7965_v3, %v7965_v3  ;;  %v971_v30 = vcombine.high %v7968_v55, %v7968_v55 }
  0xca   : > { %v1508_v19 = vrot.slane %v1480_v4, %v7647_v35  ;;  %v711_v12 = vsel %vm675_vm4, %v7447_v43, %v7878_v37  ;;  %v7998_v27 = vrot.slane %v994_v7, %v7647_v35  ;;  %v1287_v23 = vcombine.high %v7808_v32, %v7808_v32  ;;  %v642_v37 = vpop.permute.xlu0 %641 }
  0xcb   : > { %v1003_v50 = vcombine.high %v1001_v54, %v1001_v54  ;;  %v1822_v48 = vcombine.low %v7808_v32, %v1285_v62  ;;  %v687_v43 = vsel %vm675_vm4, %v7426_v26, %v553_v18  ;;  %v8012_v7 = vrot.slane %v1001_v54, %v7647_v35 }
  0xcc   : > { %v1510_v4 = vcombine.low %v1501_v24, %v1508_v19  ;;  %v760_v19 = vsel %vm724_vm3, %v711_v12, %v7913_v52  ;;  %v736_v0 = vsel %vm724_vm3, %v687_v43, %v638_v60  ;;  %v1032_v52 = vcombine.high %v7998_v27, %v7998_v27 }
  0xcd   : > { %v1294_v29 = vrot.slane %v760_v19, %v7647_v35  ;;  %v691_v12 = vsel %vm675_vm4, %v7482_v8, %v557_v17  ;;  %v916_v26 = vrot.slane %v736_v0, %v7647_v35  ;;  %v8036_v0 = vrot.slane %v1003_v50, %v7647_v35 }
  0xce   : > { %v1524_v24 = vrot.slane %v1510_v4, %v7647_v35  ;;  %v8015_v4 = vrot.slane %v1002_v25, %v7647_v35  ;;  %v2371_v25 = vcombine.low %v971_v30, %v7965_v3  ;;  %v740_v60 = vsel %vm724_vm3, %v691_v12, %v642_v37  ;;  %v563_v50 = vpop.permute.xlu0 %562 }
  0xcf   : > { %v1301_v62 = vrot.slane %v1294_v29, %v7647_v35  ;;  %v1844_v29 = vrot.slane %v1822_v48, %v7647_v35  ;;  %v923_v17 = vrot.slane %v916_v26, %v7647_v35  ;;  %v979_v19 = vrot.slane %v740_v60, %v7647_v35 }
  0xd0   : > { %v1525_v47 = vcombine.low %v1517_v61, %v1524_v24  ;;  %v668_v61 = vpop.permute.xlu1 %667  ;;  %v1034_v30 = vcombine.high %v8015_v4, %v8015_v4  ;;  %v8050_v43 = vrot.slane %v2712_v39, %v7647_v35  ;;  %v2419_v37 = vcombine.low %v7998_v27, %v8015_v4 }
  0xd1   : > { %v1823_v24 = vcombine.low %v1287_v23, %v1301_v62  ;;  %v2711_v8 = vcombine.low %v1301_v62, %v7903_v49  ;;  %v8047_v23 = vcombine.low %v8015_v4, %v1032_v52  ;;  %v2369_v62 = vcombine.low %v923_v17, %v7951_v16 }
  0xd2   : > { %7111 = vmatmul.mubr.msk.bf16.vlgmr.msra.gmra.mxu0 %vm1987_vm5, %v1525_v47  ;;  %v8041_v47 = vrot.slane %v6974_v45, %v7647_v35  ;;  %10057 = vst [vmem:[#allocation18_spill] sm:$0xff] %v8050_v43  ;;  %v986_v12 = vrot.slane %v979_v19, %v7647_v35  ;;  %v909_v60 = vcombine.high %v7839_v13, %v7839_v13 }
  0xd3   : > { %7161 = vmatpush3.bf16.msra.mxu0 %v7693_v28  ;;  %v8053_v28 = vrot.slane %v2711_v8, %v7647_v35  ;;  %v1851_v45 = vrot.slane %v1823_v24, %v7647_v35  ;;  %v8069_v8 = vcombine.low %v1034_v30, %v8012_v7  ;;  %v2370_v19 = vcombine.low %v7968_v55, %v969_v10 }
  0xd4   : > { %10056 = vst [vmem:[#allocation17_spill] sm:$0xff] %v8041_v47  ;;  %v717_v52 = vsel %vm675_vm4, %v7535_v46, %v583_v57  ;;  %v581_v48 = vpop.permute.xlu1 %580  ;;  %v1526_v54 = vcombine.low %v909_v60, %v923_v17  ;;  %v6968_v39 = vcombine.high %v7816_v44, %v7839_v13  ;;  %v2417_v26 = vcombine.low %v7987_v41, %v970_v1  ;;  %v648_v17 = vpop.permute.xlu0 %647 }
  0xd5   : > { %10058 = vst [vmem:[#allocation19_spill] sm:$0xff] %v8053_v28  ;;  %v766_v18 = vsel %vm724_vm3, %v717_v52, %v668_v61  ;;  %v1853_v43 = vcombine.low %v1844_v29, %v1851_v45  ;;  %v8081_v30 = vrot.slane %v2369_v62, %v7647_v35  ;;  %v972_v24 = vcombine.high %v7987_v41, %v7987_v41 }
  0xd6   : > { %v1576_v10 = vcombine.low %v986_v12, %v7998_v27  ;;  %v1365_v28 = vcombine.high %v766_v18, %v766_v18  ;;  %v1372_v46 = vrot.slane %v766_v18, %v7647_v35  ;;  %v697_v57 = vsel %vm675_vm4, %v7551_v56, %v563_v50 }
  0xd7   : > { %10059 = vst [vmem:[#allocation20_spill] sm:$0xff] %v8081_v30  ;;  %v1837_v1 = vrot.slane %v7933_v15, %v7647_v35  ;;  %v8092_v61 = vrot.slane %v2370_v19, %v7647_v35  ;;  %v6945_v29 = vcombine.high %v7965_v3, %v7987_v41  ;;  %v8097_v45 = vrot.slane %v2371_v25, %v7647_v35 }
  0xd8   : > { %v1830_v62 = vrot.slane %v7929_v59, %v7647_v35  ;;  %v1536_v18 = vrot.slane %v1526_v54, %v7647_v35  ;;  %v2418_v52 = vcombine.low %v972_v24, %v986_v12  ;;  %v8103_v56 = vrot.slane %v2417_v26, %v7647_v35  ;;  %v666_v32 = vpop.permute.xlu1 %665 }
  0xd9   : > { %10060 = vst [vmem:[#allocation21_spill] sm:$0xff] %v8092_v61  ;;  %v1380_v15 = vcombine.high %v1372_v46, %v1372_v46  ;;  %v1379_v50 = vrot.slane %v1365_v28, %v7647_v35  ;;  %v1867_v19 = vrot.slane %v1853_v43, %v7647_v35  ;;  %v746_v47 = vsel %vm724_vm3, %v697_v57, %v648_v17 }
  0xda   : > { %10061 = vst [vmem:[#allocation22_spill] sm:$0xff] %v8103_v56  ;;  %v1852_v60 = vcombine.low %v1830_v62, %v1837_v1  ;;  %v10062_v25 = vcombine.low %v7951_v16, %v7968_v55  ;;  %v8113_v54 = vrot.slane %v6968_v39, %v7647_v35  ;;  %v3527_v12 = vcombine.low %v8081_v30, %v8092_v61 }
  0xdb   : > { %v8118_v26 = vrot.slane %v1576_v10, %v7647_v35  ;;  %v8121_v28 = vrot.slane %v6945_v29, %v7647_v35  ;;  %v8124_v43 = vrot.slane %v1380_v15, %v7647_v35  ;;  %v1050_v57 = vcombine.high %v746_v47, %v746_v47 }
  0xdc   : > { %v1543_v59 = vrot.slane %v10062_v25, %v7647_v35  ;;  %v1860_v24 = vrot.slane %v1852_v60, %v7647_v35  ;;  %v8132_v17 = vrot.slane %v2418_v52, %v7647_v35  ;;  %v8135_v10 = vrot.slane %v2419_v37, %v7647_v35  ;;  %v561_v60 = vpop.permute.xlu0 %560 }
  0xdd   : > { %v3528_v29 = vcombine.low %v8097_v45, %v8103_v56  ;;  %v1381_v62 = vcombine.high %v1379_v50, %v1379_v50  ;;  %v1057_v25 = vrot.slane %v746_v47, %v7647_v35  ;;  %v8146_v52 = vrot.slane %v1372_v46, %v7647_v35 }
  0xde   : > { %v8127_v1 = vcombine.low %v1536_v18, %v1543_v59  ;;  %v1868_v15 = vcombine.low %v1860_v24, %v1867_v19  ;;  %v8141_v18 = vrot.slane %v3527_v12, %v7647_v35  ;;  %v10064_v37 = vcombine.low %v7903_v49, %v7858_v20  ;;  %v8163_v59 = vpop.permute.xlu1 %564 }
  0xdf   : > { %10063 = vst [vmem:[#allocation23_spill] sm:$0xff] %v8146_v52  ;;  %v8153_v19 = vrot.slane %v1379_v50, %v7647_v35  ;;  %v1412_v47 = vcombine.high %v8124_v43, %v8124_v43  ;;  %v1064_v12 = vrot.slane %v1050_v57, %v7647_v35  ;;  %v10065_v46 = vcombine.high %v7903_v49, %v7858_v20 }
  0xe0   : > { %v1879_v39 = vrot.slane %v10064_v37, %v7647_v35  ;;  %7126 = vmatprep.mubr.msk.bf16.mxu1 %vm1987_vm5, %v1868_v15  ;;  %v10066_v53 = vcombine.low %v7874_v5, %v7942_v63  ;;  %v10067_v57 = vcombine.high %v7874_v5, %v7942_v63  ;;  %v8178_v49 = vrot.slane %v3528_v29, %v7647_v35  ;;  %v646_v30 = vpop.permute.xlu0 %645 }
  0xe1   : > { %v1886_v24 = vrot.slane %v10065_v46, %v7647_v35  ;;  %v8181_v20 = vrot.slane %v1381_v62, %v7647_v35  ;;  %v7271_v46 = vld [vmem:[%s7382_s24 + $0x74] ss:$0 sps:$4 sm:$0x33]   ;;  %v1065_v50 = vcombine.high %v1057_v25, %v1057_v25  ;;  %v1410_v56 = vcombine.high %v8146_v52, %v8146_v52 }
  0xe2   : > { %v1893_v15 = vrot.slane %v10066_v53, %v7647_v35  ;;  %v1900_v34 = vrot.slane %v10067_v57, %v7647_v35  ;;  %v715_v37 = vsel %vm675_vm4, %v7271_v46, %v581_v48  ;;  %v8188_v53 = vrot.slane %v1057_v25, %v7647_v35  ;;  %v543_v29 = vpop.permute.xlu1 %542 }
  0xe3   : > { %v1901_v51 = vcombine.low %v1879_v39, %v1886_v24  ;;  %v8193_v57 = vcombine.low %v1412_v47, %v8153_v19  ;;  %v1066_v62 = vcombine.high %v1064_v12, %v1064_v12  ;;  %v10068_v48 = vcombine.high %v7874_v5, %v7874_v5 }
  0xe4   : > { %v1902_v58 = vcombine.low %v1893_v15, %v1900_v34  ;;  %v8200_v61 = vrot.slane %v1064_v12, %v7647_v35  ;;  %v764_v39 = vsel %vm724_vm3, %v715_v37, %v666_v32  ;;  %v8208_v24 = vrot.slane %v1065_v50, %v7647_v35  ;;  %v7272_v15 = vld [vmem:[%s7382_s24 + $0x38] ss:$0 sps:$4 sm:$0x33]  }
  0xe5   : > { %v2714_v46 = vcombine.low %v7942_v63, %v10068_v48  ;;  %v1909_v25 = vrot.slane %v1901_v51, %v7647_v35  ;;  %v1357_v5 = vrot.slane %v764_v39, %v7647_v35  ;;  %v695_v48 = vsel %vm675_vm4, %v7272_v15, %v561_v60 }
  0xe6   : > { %v1916_v34 = vrot.slane %v1902_v58, %v7647_v35  ;;  %v1095_v12 = vcombine.high %v8188_v53, %v8188_v53  ;;  %v10069_v58 = vcombine.high %v7951_v16, %v7968_v55  ;;  %v10070_v37 = vcombine.low %v7965_v3, %v7987_v41 }
  0xe7   : > { %v8224_v39 = vrot.slane %v1066_v62, %v7647_v35  ;;  %v1350_v60 = vcombine.high %v7942_v63, %v7942_v63  ;;  %v1364_v15 = vrot.slane %v1357_v5, %v7647_v35  ;;  %v1566_v3 = vrot.slane %v8127_v1, %v7647_v35  ;;  %v650_v5 = vpop.permute.xlu0 %649 }
  0xe8   : > { %v1917_v51 = vcombine.low %v1909_v25, %v1916_v34  ;;  %v1550_v32 = vrot.slane %v10069_v58, %v7647_v35  ;;  %v1557_v50 = vrot.slane %v10070_v37, %v7647_v35  ;;  %v744_v25 = vsel %vm724_vm3, %v695_v48, %v646_v30 }
  0xe9   : > { %v1096_v34 = vcombine.high %v8200_v61, %v8200_v61  ;;  %v1042_v55 = vrot.slane %v744_v25, %v7647_v35  ;;  %v1918_v62 = vcombine.low %v1364_v15, %v8146_v52  ;;  %v2760_v30 = vcombine.low %v1350_v60, %v1364_v15  ;;  %v585_v15 = vpop.permute.xlu1 %584 }
  0xea   : > { %7127 = vmatmul.mubr.msk.bf16.gmra.mxu1 %vm1987_vm5, %v1917_v51  ;;  %v1559_v16 = vcombine.low %v1550_v32, %v1557_v50  ;;  %v1919_v51 = vcombine.low %v8124_v43, %v1410_v56  ;;  %v8247_v32 = vrot.slane %v2714_v46, %v7647_v35  ;;  %v1599_v50 = vrot.slane %v8047_v23, %v7647_v35 }
  0xeb   : > { %v1049_v1 = vrot.slane %v1042_v55, %v7647_v35  ;;  %v8250_v37 = vrot.slane %v2760_v30, %v7647_v35  ;;  %v1606_v60 = vrot.slane %v8069_v8, %v7647_v35  ;;  %v2469_v56 = vcombine.low %v8208_v24, %v1095_v12 }
  0xec   : > { %v1573_v58 = vrot.slane %v1559_v16, %v7647_v35  ;;  %v1035_v16 = vcombine.high %v8036_v0, %v8036_v0  ;;  %v10071_v46 = vcombine.high %v8012_v7, %v8012_v7  ;;  %v1928_v30 = vrot.slane %v1918_v62, %v7647_v35 }
  0xed   : > { %v1608_v47 = vcombine.low %v1599_v50, %v1606_v60  ;;  %v10072_v8 = vcombine.low %v8121_v28, %v8118_v26  ;;  %v699_v62 = vsel %vm675_vm4, %v7563_v9, %v8163_v59  ;;  %v1935_v50 = vrot.slane %v1919_v51, %v7647_v35 }
  0xee   : > { %v1574_v25 = vcombine.low %v1566_v3, %v1573_v58  ;;  %v8263_v55 = vcombine.low %v8036_v0, %v10071_v46  ;;  %v1625_v46 = vcombine.low %v1035_v16, %v1049_v1  ;;  %v748_v28 = vsel %vm724_vm3, %v699_v62, %v650_v5  ;;  %v670_v62 = vpop.permute.xlu1 %669 }
  0xef   : > { %v1615_v12 = vrot.slane %v10072_v8, %v7647_v35  ;;  %v1622_v26 = vrot.slane %v1608_v47, %v7647_v35  ;;  %v628_v8 = vpop.permute.xlu0 %627  ;;  %v8286_v23 = vrot.slane %v2469_v56, %v7647_v35  ;;  %v2468_v9 = vcombine.low %v1049_v1, %v8188_v53 }
  0xf0   : > { %7114 = vmatprep.mubr.msk.bf16.mxu0 %vm1987_vm5, %v1574_v25  ;;  %v1634_v25 = vrot.slane %v8263_v55, %v7647_v35  ;;  %v677_v59 = vsel %vm675_vm4, %v7587_v14, %v543_v29  ;;  %v1950_v51 = vcombine.low %v1928_v30, %v1935_v50  ;;  %v1098_v47 = vcombine.high %v8224_v39, %v8224_v39  ;;  %v7273_v30 = vld [vmem:[%s7382_s24 + $0x80] ss:$0 sps:$4 sm:$0x33]  }
  0xf1   : > { %v1623_v16 = vcombine.low %v1615_v12, %v1622_v26  ;;  %v1105_v5 = vrot.slane %v748_v28, %v7647_v35  ;;  %v1641_v60 = vrot.slane %v1625_v46, %v7647_v35  ;;  %v726_v56 = vsel %vm724_vm3, %v677_v59, %v628_v8 }
  0xf2   : > { %v10073_v55 = vcombine.high %v8153_v19, %v8153_v19  ;;  %v1942_v14 = vrot.slane %v8193_v57, %v7647_v35  ;;  %v719_v12 = vsel %vm675_vm4, %v7273_v30, %v585_v15  ;;  %v2158_v50 = vcombine.high %v726_v56, %v726_v56 }
  0xf3   : > { %7115 = vmatmul.mubr.msk.bf16.gmra.mxu0 %vm1987_vm5, %v1623_v16  ;;  %v1112_v29 = vrot.slane %v1105_v5, %v7647_v35  ;;  %v2165_v46 = vrot.slane %v726_v56, %v7647_v35  ;;  %v545_v26 = vpop.permute.xlu0 %544  ;;  %v8310_v28 = vrot.slane %v2468_v9, %v7647_v35  ;;  %v10074_v8 = vcombine.high %v7713_v42, %v7713_v42 }
  0xf4   : > { %v1921_v1 = vcombine.low %v8181_v20, %v10073_v55  ;;  %v768_v16 = vsel %vm724_vm3, %v719_v12, %v670_v62  ;;  %v2172_v15 = vrot.slane %v2158_v50, %v7647_v35  ;;  %v1958_v56 = vrot.slane %v1950_v51, %v7647_v35  ;;  %v630_v51 = vpop.permute.xlu1 %629 }
  0xf5   : > { %v1676_v59 = vcombine.low %v7737_v36, %v10074_v8  ;;  %v1675_v5 = vcombine.low %v1112_v29, %v7713_v42  ;;  %v2173_v55 = vcombine.high %v2165_v46, %v2165_v46  ;;  %v1413_v9 = vcombine.high %v8181_v20, %v8181_v20 }
  0xf6   : > { %v1949_v57 = vrot.slane %v1921_v1, %v7647_v35  ;;  %v1420_v41 = vrot.slane %v768_v16, %v7647_v35  ;;  %v679_v8 = vsel %vm675_vm4, %v7597_v38, %v545_v26  ;;  %v2174_v58 = vcombine.high %v2172_v15, %v2172_v15 }
  0xf7   : > { %v1697_v1 = vrot.slane %v1675_v5, %v7647_v35  ;;  %v2181_v62 = vrot.slane %v2165_v46, %v7647_v35  ;;  %v10075_v12 = vcombine.high %v7687_v22, %v7687_v22  ;;  %v2301_v38 = vrot.slane %v7701_v33, %v7647_v35 }
  0xf8   : > { %v1951_v30 = vcombine.low %v1942_v14, %v1949_v57  ;;  %v2195_v14 = vrot.slane %v2173_v55, %v7647_v35  ;;  %v8335_v16 = vrot.slane %v1420_v41, %v7647_v35  ;;  %v1704_v26 = vrot.slane %v1676_v59, %v7647_v35 }
  0xf9   : > { %v2271_v50 = vcombine.low %v7710_v6, %v10075_v12  ;;  %v2516_v46 = vcombine.low %v8224_v39, %v1096_v34  ;;  %v2518_v6 = vcombine.low %v7713_v42, %v7737_v36  ;;  %v2202_v5 = vrot.slane %v2174_v58, %v7647_v35 }
  0xfa   : > { %v1965_v57 = vrot.slane %v1951_v30, %v7647_v35  ;;  %v2221_v55 = vcombine.low %v2181_v62, %v2195_v14  ;;  %v6965_v30 = vcombine.high %v2181_v62, %v2195_v14  ;;  %v1967_v41 = vcombine.low %v1413_v9, %v8335_v16  ;;  %v587_v9 = vpop.permute.xlu0 %586 }
  0xfb   : > { %v1656_v3 = vcombine.low %v1634_v25, %v1641_v60  ;;  %v2188_v33 = vrot.slane %v2172_v15, %v7647_v35  ;;  %v10076_v59 = vrot.slane %v7762_v21, %v7647_v35  ;;  %v728_v34 = vsel %vm724_vm3, %v679_v8, %v630_v51  ;;  %v672_v8 = vpop.permute.xlu1 %671 }
  0xfc   : > { %v1966_v12 = vcombine.low %v1958_v56, %v1965_v57  ;;  %v1706_v63 = vcombine.low %v1697_v1, %v1704_v26  ;;  %v2517_v52 = vcombine.low %v1098_v47, %v1112_v29  ;;  %v2287_v58 = vrot.slane %v2271_v50, %v7647_v35  ;;  %v7274_v57 = vld [vmem:[%s7382_s24 + $0x84] sm:$0xff]  }
  0xfd   : > { %v8352_v48 = vcombine.low %v10076_v59, %v2301_v38  ;;  %v2213_v56 = vrot.slane %v728_v34, %v7647_v35  ;;  %v2223_v60 = vcombine.low %v2188_v33, %v2202_v5  ;;  %v6966_v25 = vcombine.high %v2188_v33, %v2202_v5 }
  0xfe   : > { %7130 = vmatprep.mubr.msk.bf16.mxu1 %vm1987_vm5, %v1966_v12  ;;  %v2231_v15 = vrot.slane %v2221_v55, %v7647_v35  ;;  %v10077_v21 = vcombine.low %v8188_v53, %v8208_v24  ;;  %v2238_v1 = vrot.slane %v6965_v30, %v7647_v35  ;;  %v1974_v47 = vrot.slane %v1967_v41, %v7647_v35 }
  0xff   : > { %v2220_v29 = vrot.slane %v2213_v56, %v7647_v35  ;;  %v10078_v50 = vcombine.high %v8188_v53, %v8208_v24  ;;  %v1664_v14 = vrot.slane %v1656_v3, %v7647_v35  ;;  %v721_v38 = vsel %vm675_vm4, %v7274_v57, %v587_v9 }
 0x100   : > { %v1648_v62 = vrot.slane %v10077_v21, %v7647_v35  ;;  %v10079_v26 = vcombine.low %v8200_v61, %v8224_v39  ;;  %v10080_v55 = vcombine.high %v8200_v61, %v8224_v39  ;;  %v770_v53 = vsel %vm724_vm3, %v721_v38, %v672_v8 }
 0x101   : > { %v1655_v51 = vrot.slane %v10078_v50, %v7647_v35  ;;  %v2270_v12 = vcombine.low %v2220_v29, %v7687_v22  ;;  %v2322_v3 = vcombine.low %v7816_v44, %v7839_v13  ;;  %v3447_v33 = vcombine.high %v770_v53, %v770_v53 }
 0x102   : > { %v1683_v5 = vrot.slane %v10079_v26, %v7647_v35  ;;  %v1690_v30 = vrot.slane %v10080_v55, %v7647_v35  ;;  %v1720_v34 = vrot.slane %v1706_v63, %v7647_v35  ;;  %v10081_v56 = vcombine.high %v7727_v40, %v7730_v2 }
 0x103   : > { %v1657_v41 = vcombine.low %v1648_v62, %v1655_v51  ;;  %v2280_v39 = vrot.slane %v2270_v12, %v7647_v35  ;;  %v2350_v22 = vrot.slane %v2322_v3, %v7647_v35  ;;  %v1981_v62 = vrot.slane %v1974_v47, %v7647_v35 }
 0x104   : > { %v1705_v59 = vcombine.low %v1683_v5, %v1690_v30  ;;  %v2343_v9 = vrot.slane %v10081_v56, %v7647_v35  ;;  %v2245_v8 = vrot.slane %v2223_v60, %v7647_v35  ;;  %v2252_v44 = vrot.slane %v6966_v25, %v7647_v35 }
 0x105   : > { %v1671_v21 = vrot.slane %v1657_v41, %v7647_v35  ;;  %v3454_v13 = vrot.slane %v770_v53, %v7647_v35  ;;  %v2302_v29 = vcombine.low %v2280_v39, %v2287_v58  ;;  %v3511_v2 = vcombine.low %v2350_v22, %v8113_v54  ;;  %7131 = vmatmul.mubr.msk.bf16.gmra.mxu1 %vm1987_vm5, %v1981_v62 }
 0x106   : > { %v1713_v63 = vrot.slane %v1705_v59, %v7647_v35  ;;  %v3510_v40 = vcombine.low %v7854_v11, %v2343_v9  ;;  %v6991_v51 = vcombine.high %v8153_v19, %v8181_v20  ;;  %v10082_v60 = vcombine.high %v8208_v24, %v8208_v24 }
 0x107   : > { %v1672_v50 = vcombine.low %v1664_v14, %v1671_v21  ;;  %v10083_v47 = vcombine.high %v8012_v7, %v8036_v0  ;;  %v8414_v11 = vrot.slane %v2517_v52, %v7647_v35  ;;  %v2499_v14 = vcombine.low %v8310_v28, %v8286_v23 }
 0x108   : > { %v2515_v25 = vcombine.low %v10082_v60, %v8200_v61  ;;  %v2253_v57 = vcombine.low %v2231_v15, %v2238_v1  ;;  %v3461_v38 = vrot.slane %v3447_v33, %v7647_v35  ;;  %v1721_v26 = vcombine.low %v1713_v63, %v1720_v34 }
 0x109   : > { %v8411_v58 = vrot.slane %v10083_v47, %v7647_v35  ;;  %7118 = vmatprep.mubr.msk.bf16.mxu0 %vm1987_vm5, %v1672_v50  ;;  %v8423_v24 = vrot.slane %v2516_v46, %v7647_v35  ;;  %v8426_v5 = vrot.slane %v2518_v6, %v7647_v35  ;;  %v2310_v52 = vrot.slane %v2302_v29, %v7647_v35 }
 0x10a   : > { %v3462_v55 = vcombine.high %v3454_v13, %v3454_v13  ;;  %7119 = vmatmul.mubr.msk.bf16.gmra.mxu0 %vm1987_vm5, %v1721_v26  ;;  %v3518_v15 = vrot.slane %v3510_v40, %v7647_v35  ;;  %v3525_v1 = vrot.slane %v3511_v2, %v7647_v35  ;;  %v2254_v30 = vcombine.low %v2245_v8, %v2252_v44  ;;  %v10088_v40 = vld [vmem:[#allocation21_spill] sm:$0xff] }
 0x10b   : > { %v3561_v61 = vcombine.low %v8411_v58, %v8310_v28  ;;  %v2548_v12 = vcombine.low %v8414_v11, %v8426_v5  ;;  %v3578_v46 = vcombine.low %v8423_v24, %v8414_v11  ;;  %v2317_v6 = vrot.slane %v8352_v48, %v7647_v35  ;;  %v10092_v26 = vld [vmem:[#allocation5_spill] sm:$0xff] }
 0x10c   : > { %v8439_v41 = vrot.slane %v3454_v13, %v7647_v35  ;;  %v3463_v53 = vcombine.high %v3461_v38, %v3461_v38  ;;  %v3526_v3 = vcombine.low %v3518_v15, %v3525_v1  ;;  %v2261_v33 = vrot.slane %v2253_v57, %v7647_v35 }
 0x10d   : > { %v2268_v59 = vrot.slane %v2254_v30, %v7647_v35  ;;  %v2318_v34 = vcombine.low %v2310_v52, %v2317_v6  ;;  %v8444_v56 = vrot.slane %v3461_v38, %v7647_v35  ;;  %v10084_v39 = vcombine.high %v7998_v27, %v8015_v4  ;;  %v10091_v38 = vld [vmem:[#allocation6_spill] sm:$0xff] }
 0x10e   : > { %v10085_v48 = vcombine.low %v8012_v7, %v8036_v0  ;;  %v8457_v8 = vrot.slane %v3462_v55, %v7647_v35  ;;  %7162 = vmatprep.mubr.msk.bf16.mxu0 %vm1987_vm5, %v3526_v3  ;;  %v2352_v13 = vcombine.low %v2343_v9, %v2350_v22  ;;  %v2359_v63 = vrot.slane %v7868_v31, %v7647_v35 }
 0x10f   : > { %v2448_v21 = vrot.slane %v10084_v39, %v7647_v35  ;;  %v2269_v44 = vcombine.low %v2261_v33, %v2268_v59  ;;  %v10086_v27 = vcombine.low %v8132_v17, %v8135_v10  ;;  %v8468_v7 = vrot.slane %v2515_v25, %v7647_v35  ;;  %v10095_v33 = vld [vmem:[#allocation4_spill] sm:$0xff]  ;;  %v10096_v59 = vld [vmem:[#allocation3_spill] sm:$0xff] }
 0x110   : > { %v8454_v62 = vrot.slane %v10085_v48, %v7647_v35  ;;  %v10087_v0 = vcombine.high %v7713_v42, %v7737_v36  ;;  %v3492_v9 = vcombine.high %v8439_v41, %v8439_v41  ;;  %v3543_v31 = vcombine.low %v8141_v18, %v8178_v49  ;;  %v10099_v48 = vld [vmem:[#allocation11_spill] sm:$0xff] }
 0x111   : > { %v3552_v4 = vrot.slane %v10086_v27, %v7647_v35  ;;  %7136 = vmatprep.mubr.msk.bf16.mxu1 %vm1987_vm5, %v2269_v44  ;;  %v2366_v22 = vrot.slane %v2352_v13, %v7647_v35  ;;  %v2401_v2 = vcombine.low %v10088_v40, %v8097_v45  ;;  %v3562_v42 = vcombine.low %v8286_v23, %v8468_v7  ;;  %v10089_v45 = vld [vmem:[#allocation20_spill] sm:$0xff] }
 0x112   : > { %v3545_v29 = vcombine.low %v2448_v21, %v8454_v62  ;;  %v8474_v50 = vrot.slane %v10087_v0, %v7647_v35  ;;  %7137 = vmatmul.mubr.msk.bf16.vlgmr.msra.gmra.mxu1 %vm1987_vm5, %v2318_v34  ;;  %v2450_v25 = vcombine.low %v8135_v10, %v2448_v21  ;;  %v8492_v47 = vrot.slane %v3463_v53, %v7647_v35  ;;  %v10093_v10 = vld [vmem:[#allocation22_spill] sm:$0xff]  ;;  %v10098_v21 = vld [vmem:[#allocation12_spill] sm:$0xff] }
 0x113   : > { %7163 = vmatmul.mubr.msk.bf16.vlgmr.msra.gmra.mxu0 %vm1987_vm5, %v3543_v31  ;;  %v2367_v18 = vcombine.low %v2359_v63, %v2366_v22  ;;  %v10090_v49 = vcombine.low %v8113_v54, %v10089_v45  ;;  %v2565_v52 = vcombine.low %v10092_v26, %v10091_v38  ;;  %v3569_v15 = vrot.slane %v3561_v61, %v7647_v35  ;;  %v10101_v27 = vld [vmem:[#allocation8_spill] sm:$0xff]  ;;  %v10106_v45 = vld [vmem:[#allocation9_spill] sm:$0xff]  ;;  %v10108_v26 = vld [vmem:[#allocation14_spill] sm:$0xff] }
 0x114   : > { %v3559_v60 = vrot.slane %v3545_v29, %v7647_v35  ;;  %v3579_v36 = vcombine.low %v8426_v5, %v8474_v50  ;;  %v3586_v1 = vrot.slane %v3578_v46, %v7647_v35  ;;  %v10094_v30 = vcombine.low %v10093_v10, %v8132_v17  ;;  %v10107_v38 = vld [vmem:[#allocation13_spill] sm:$0xff] }
 0x115   : > { %v2408_v57 = vrot.slane %v10090_v49, %v7647_v35  ;;  %v3493_v53 = vcombine.high %v8444_v56, %v8444_v56  ;;  %7140 = vmatprep.mubr.msk.bf16.mxu1 %vm1987_vm5, %v2367_v18  ;;  %v2415_v54 = vrot.slane %v2401_v2, %v7647_v35  ;;  %v2581_v3 = vrot.slane %v2565_v52, %v7647_v35 }
 0x116   : > { %v3560_v55 = vcombine.low %v3552_v4, %v3559_v60  ;;  %v2457_v6 = vrot.slane %v10094_v30, %v7647_v35  ;;  %v10097_v61 = vcombine.high %v10096_v59, %v10096_v59  ;;  %v3576_v46 = vrot.slane %v3562_v42, %v7647_v35  ;;  %v10102_v4 = vld [vmem:[#allocation7_spill] sm:$0xff]  ;;  %v10104_v42 = vld [vmem:[#allocation10_spill] sm:$0xff] }
 0x117   : > { %v3593_v17 = vrot.slane %v3579_v36, %v7647_v35  ;;  %v2464_v39 = vrot.slane %v2450_v25, %v7647_v35  ;;  %v10100_v44 = vcombine.low %v10098_v21, %v10099_v48  ;;  %v3494_v63 = vcombine.high %v8457_v8, %v8457_v8  ;;  %v10105_v25 = vld [vmem:[#allocation15_spill] sm:$0xff] }
 0x118   : > { %v2614_v34 = vcombine.low %v10097_v61, %v10095_v33  ;;  %7166 = vmatprep.mubr.msk.bf16.mxu0 %vm1987_vm5, %v3560_v55  ;;  %v2416_v29 = vcombine.low %v2408_v57, %v2415_v54  ;;  %v10103_v0 = vcombine.low %v10101_v27, %v10102_v4  ;;  %v3577_v40 = vcombine.low %v3569_v15, %v3576_v46  ;;  %v10113_v33 = vld [vmem:[#allocation19_spill] sm:$0xff] }
 0x119   : > { %v8524_v13 = vrot.slane %v10100_v44, %v7647_v35  ;;  %v3594_v2 = vcombine.low %v3586_v1, %v3593_v17  ;;  %v2465_v60 = vcombine.low %v2457_v6, %v2464_v39  ;;  %v3595_v18 = vcombine.low %v2581_v3, %v10105_v25  ;;  %v589_v44 = vpop.permute.xlu0 %588 }
 0x11a   : > { %v3610_v31 = vrot.slane %v10103_v0, %v7647_v35  ;;  %v2630_v22 = vrot.slane %v2614_v34, %v7647_v35  ;;  %v2498_v57 = vcombine.low %v8454_v62, %v8411_v58  ;;  %v10109_v52 = vcombine.low %v10107_v38, %v10108_v26  ;;  %7141 = vmatmul.mubr.msk.bf16.gmra.mxu1 %vm1987_vm5, %v2416_v29  ;;  %v10111_v58 = vld [vmem:[#allocation16_spill] sm:$0xff]  ;;  %v10115_v34 = vld [vmem:[#allocation18_spill] sm:$0xff]  ;;  %v674_v38 = vpop.permute.xlu1 %673 }
 0x11b   : > { %v3613_v36 = vcombine.low %v10104_v42, %v8524_v13  ;;  %v2513_v1 = vrot.slane %v2499_v14, %v7647_v35  ;;  %v10110_v10 = vcombine.high %v10098_v21, %v10099_v48  ;;  %v2735_v62 = vrot.slane %v10111_v58, %v7647_v35  ;;  %7167 = vmatmul.mubr.msk.bf16.gmra.mxu0 %vm1987_vm5, %v3577_v40  ;;  %v10112_v14 = vld [vmem:[#allocation17_spill] sm:$0xff] }
 0x11c   : > { %v3612_v49 = vcombine.low %v2630_v22, %v10106_v45  ;;  %v2686_v55 = vrot.slane %v10109_v52, %v7647_v35  ;;  %7144 = vmatprep.mubr.msk.bf16.mxu1 %vm1987_vm5, %v2465_v60  ;;  %v2547_v54 = vcombine.low %v8468_v7, %v8423_v24  ;;  %v2562_v23 = vrot.slane %v2548_v12, %v7647_v35 }
 0x11d   : > { %v3627_v15 = vrot.slane %v3613_v36, %v7647_v35  ;;  %v2679_v30 = vrot.slane %v10110_v10, %v7647_v35  ;;  %7170 = vmatprep.mubr.msk.bf16.mxu0 %vm1987_vm5, %v3594_v2  ;;  %v10114_v59 = vcombine.low %v10112_v14, %v10113_v33  ;;  %v3646_v46 = vcombine.low %v10115_v34, %v2735_v62 }
 0x11e   : > { %v3620_v6 = vrot.slane %v3612_v49, %v7647_v35  ;;  %v10116_v17 = vcombine.low %v8247_v32, %v8250_v37  ;;  %v2506_v11 = vrot.slane %v2498_v57, %v7647_v35  ;;  %v2596_v5 = vcombine.low %v8474_v50, %v2581_v3  ;;  %v7275_v57 = vld [vmem:[%s7382_s24 + $0x8c] ss:$0 sps:$4 sm:$0x33]  }
 0x11f   : > { %v3629_v28 = vcombine.low %v2679_v30, %v2686_v55  ;;  %v3644_v61 = vrot.slane %v10114_v59, %v7647_v35  ;;  %v10117_v12 = vcombine.low %v10105_v25, %v10101_v27  ;;  %v3654_v48 = vrot.slane %v3646_v46, %v7647_v35 }
 0x120   : > { %v8574_v24 = vrot.slane %v10116_v17, %v7647_v35  ;;  %v3628_v7 = vcombine.low %v3620_v6, %v3627_v15  ;;  %v2645_v29 = vcombine.low %v10102_v4, %v2630_v22  ;;  %v10118_v0 = vcombine.low %v10106_v45, %v10104_v42 }
 0x121   : > { %v2611_v39 = vrot.slane %v10117_v12, %v7647_v35  ;;  %v3637_v21 = vrot.slane %v3629_v28, %v7647_v35  ;;  %v3714_v50 = vcombine.low %v3494_v63, %v8444_v56  ;;  %v3603_v3 = vrot.slane %v3595_v18, %v7647_v35  ;;  %v10119_v56 = vld [vmem:[#allocation23_spill] sm:$0xff] }
 0x122   : > { %v2660_v40 = vrot.slane %v10118_v0, %v7647_v35  ;;  %v2555_v27 = vrot.slane %v2547_v54, %v7647_v35  ;;  %v2604_v2 = vrot.slane %v2596_v5, %v7647_v35  ;;  %v2514_v60 = vcombine.low %v2506_v11, %v2513_v1 }
 0x123   : > { %v3645_v36 = vcombine.low %v3637_v21, %v3644_v61  ;;  %v3662_v25 = vcombine.low %v3654_v48, %v8574_v24  ;;  %v2653_v49 = vrot.slane %v2645_v29, %v7647_v35  ;;  %v3611_v4 = vcombine.low %v3603_v3, %v3610_v31 }
 0x124   : > { %v2563_v22 = vcombine.low %v2555_v27, %v2562_v23  ;;  %v723_v42 = vsel %vm675_vm4, %v7275_v57, %v589_v44  ;;  %v2612_v45 = vcombine.low %v2604_v2, %v2611_v39  ;;  %v3663_v63 = vcombine.low %v10119_v56, %v8124_v43  ;;  %7145 = vmatmul.mubr.msk.bf16.gmra.mxu1 %vm1987_vm5, %v2514_v60 }
 0x125   : > { %v3715_v18 = vcombine.low %v8492_v47, %v3493_v53  ;;  %v2661_v26 = vcombine.low %v2653_v49, %v2660_v40  ;;  %v6990_v52 = vcombine.high %v10119_v56, %v8124_v43  ;;  %v3712_v31 = vcombine.low %v8335_v16, %v8439_v41  ;;  %7171 = vmatmul.mubr.msk.bf16.gmra.mxu0 %vm1987_vm5, %v3611_v4 }
 0x126   : > { %7148 = vmatprep.mubr.msk.bf16.mxu1 %vm1987_vm5, %v2563_v22  ;;  %v2694_v15 = vcombine.low %v8524_v13, %v2679_v30  ;;  %v3713_v53 = vcombine.low %v8457_v8, %v3492_v9  ;;  %7174 = vmatprep.mubr.msk.bf16.mxu0 %vm1987_vm5, %v3628_v7  ;;  %v772_v1 = vsel %vm724_vm3, %v723_v42, %v674_v38  ;;  %v7319_v57 = vmov 269488144  }
 0x127   : > { %v2695_v43 = vcombine.low %v2686_v55, %v10112_v14  ;;  %v2744_v10 = vcombine.low %v2735_v62, %v8247_v32  ;;  %v3736_v16 = vrot.slane %v3714_v50, %v7647_v35  ;;  %v10120_v58 = vcombine.low %v8153_v19, %v8181_v20 }
 0x128   : > { %v3694_v41 = vrot.slane %v6991_v51, %v7647_v35  ;;  %v10121_v8 = vcombine.low %v10113_v33, %v10115_v34  ;;  %v3743_v55 = vrot.slane %v3715_v18, %v7647_v35  ;;  %v2702_v32 = vrot.slane %v2694_v15, %v7647_v35 }
 0x129   : > { %v3687_v13 = vrot.slane %v10120_v58, %v7647_v35  ;;  %v2709_v30 = vrot.slane %v2695_v43, %v7647_v35  ;;  %v2758_v62 = vrot.slane %v2744_v10, %v7647_v35  ;;  %v3502_v6 = vrot.slane %v772_v1, %v7647_v35  ;;  %v10132_v58 = vld [vmem:[#allocation2_spill] sm:$0xff] }
 0x12a   : > { %v2751_v9 = vrot.slane %v10121_v8, %v7647_v35  ;;  %v3673_v54 = vrot.slane %v3663_v63, %v7647_v35  ;;  %v3680_v19 = vrot.slane %v6990_v52, %v7647_v35  ;;  %v3729_v20 = vrot.slane %v3713_v53, %v7647_v35 }
 0x12b   : > { %v2710_v51 = vcombine.low %v2702_v32, %v2709_v30  ;;  %v3696_v28 = vcombine.low %v3687_v13, %v3694_v41  ;;  %v3722_v14 = vrot.slane %v3712_v31, %v7647_v35  ;;  %v3745_v33 = vcombine.low %v3736_v16, %v3743_v55 }
 0x12c   : > { %v2759_v23 = vcombine.low %v2751_v9, %v2758_v62  ;;  %7149 = vmatmul.mubr.msk.bf16.gmra.mxu1 %vm1987_vm5, %v2612_v45  ;;  %v3495_v59 = vcombine.high %v8492_v47, %v8492_v47  ;;  %v3509_v61 = vrot.slane %v3502_v6, %v7647_v35  ;;  %v3695_v34 = vcombine.low %v3673_v54, %v3680_v19 }
 0x12d   : > { %7175 = vmatmul.mubr.msk.bf16.gmra.mxu0 %vm1987_vm5, %v3645_v36  ;;  %7152 = vmatprep.mubr.msk.bf16.mxu1 %vm1987_vm5, %v2661_v26  ;;  %v3744_v46 = vcombine.low %v3722_v14, %v3729_v20  ;;  %v3710_v17 = vrot.slane %v3696_v28, %v7647_v35  ;;  %v3759_v24 = vrot.slane %v3745_v33, %v7647_v35  ;;  %v4574_v42 = vunpack.c.l.s4 %v7319_v57 }
 0x12e   : > { %7178 = vmatprep.mubr.msk.bf16.mxu0 %vm1987_vm5, %v3662_v25  ;;  %v3761_v7 = vcombine.low %v3495_v59, %v3509_v61  ;;  %v3703_v11 = vrot.slane %v3695_v34, %v7647_v35  ;;  %v2774_v48 = vrot.slane %v8250_v37, %v7647_v35  ;;  %v7320_v45 = vmov 842150450  }
 0x12f   : > { %v3752_v5 = vrot.slane %v3744_v46, %v7647_v35  ;;  %v4581_v38 = vunpack.c.l.s4 %v7320_v45  ;;  %v7321_v56 = vmov 1983009808   ;;  %v7322_v52 = vmov 1414812756  }
 0x130   : > { %v3711_v12 = vcombine.low %v3703_v11, %v3710_v17  ;;  %v3768_v47 = vrot.slane %v3761_v7, %v7647_v35  ;;  %v2972_v63 = vunpack.c.l.s4 %v7321_v56  ;;  %v4588_v31 = vunpack.c.l.s4 %v7322_v52 }
 0x131   : > { %v3760_v39 = vcombine.low %v3752_v5, %v3759_v24  ;;  %v4575_v1 = vunpack.c.0.s8 %v4574_v42  ;;  %v4582_v43 = vunpack.c.0.s8 %v4581_v38  ;;  %vm4537_vm6 = vcmp.ge.s32.totalorder %v10132_v58, 1 }
 0x132   : > { %v3775_v21 = vrot.slane %v3768_v47, %v7647_v35  ;;  %v2973_v10 = vunpack.c.0.s8 %v2972_v63  ;;  %v7323_v13 = vmov 1987475062   ;;  %v4589_v9 = vunpack.c.0.s8 %v4588_v31 }
 0x133   : > { %v4595_v41 = vunpack.c.l.s4 %v7323_v13  ;;  %v4578_v32 = vsub.s32 %v4575_v1, %v10132_v58  ;;  %v4585_v30 = vsub.s32 %v4582_v43, %v10132_v58  ;;  %v7324_v6 = vmov 0.0  }
 0x134   : > { %7153 = vmatmul.mubr.msk.bf16.gmra.mxu1 %vm1987_vm5, %v2710_v51  ;;  %v8703_v62 = vsub.s32 %v2973_v10, %v10132_v58  ;;  %v7005_v54 = vsel %vm4537_vm6, 1.0, %v7324_v6  ;;  %v4536_v51 = vadd.s32 16, %v10132_v58  ;;  %v4592_v28 = vsub.s32 %v4589_v9, %v10132_v58 }
 0x135   : > { %7179 = vmatmul.mubr.msk.bf16.gmra.mxu0 %vm1987_vm5, %v3711_v12  ;;  %7156 = vmatprep.mubr.msk.bf16.mxu1 %vm1987_vm5, %v2759_v23  ;;  %v4596_v20 = vunpack.c.0.s8 %v4595_v41  ;;  %v8709_v59 = vrot.slane %v7324_v6, %v4578_v32  ;;  %v8711_v61 = vrot.slane %v7005_v54, %v4578_v32  ;;  %v8713_v34 = vrot.slane %v7005_v54, %v4585_v30 }
 0x136   : > { %7182 = vmatprep.mubr.msk.bf16.mxu0 %vm1987_vm5, %v3760_v39  ;;  %v8716_v7 = vrot.slane %v7324_v6, %v4585_v30  ;;  %v7325_v11 = vmov 1.0   ;;  %vm4548_vm8 = vcmp.le.s32.totalorder %v4536_v51, 16  ;;  %v8723_v57 = vrot.slane %v7324_v6, %v4592_v28 }
 0x137   : > { %10136 = vst [vmem:[#allocation9_spill] sm:$0xff] %v8709_v59  ;;  %10137 = vst [vmem:[#allocation13_spill] sm:$0xff] %v8711_v61  ;;  %v8718_v5 = vrot.slane %v7325_v11, %v4578_v32  ;;  %v8725_v42 = vrot.slane %v7325_v11, %v4585_v30  ;;  %v8731_v1 = vrot.slane %v7005_v54, %v4592_v28  ;;  %v7006_v43 = vsel %vm4548_vm8, 1.0, %v7324_v6 }
 0x138   : > { %10138 = vst [vmem:[#allocation14_spill] sm:$0xff] %v8716_v7  ;;  %10139 = vst [vmem:[#allocation16_spill] sm:$0xff] %v8723_v57  ;;  %v8735_v13 = vrot.slane %v7325_v11, %v4592_v28 }
 0x13c   : > { %7157 = vmatmul.mubr.msk.bf16.gmra.mxu1 %vm1987_vm5, %v2774_v48 }
 0x13d   : > { %7183 = vmatmul.mubr.msk.bf16.gmra.mxu0 %vm1987_vm5, %v3775_v21  ;;  %v4599_v21 = vsub.s32 %v4596_v20, %v10132_v58 }
 0x13f   : > { %v8733_v58 = vrot.slane %v7005_v54, %v4599_v21  ;;  %v8740_v20 = vrot.slane %v7325_v11, %v4599_v21 }
 0x141   : > { %10141 = vst [vmem:[#allocation19_spill] sm:$0xff] %v8733_v58 }
 0x188   : > { %v8659_v44 = vpop.f32.mrf.mxu1 }
 0x189   : > { %10122 = vst [vmem:[#allocation21_spill] sm:$0xff] %v8659_v44 }
 0x18a   : > { %v8661_v29 = vpop.f32.mrf.mxu1 }
 0x18b   : > { %10123 = vst [vmem:[#allocation20_spill] sm:$0xff] %v8661_v29 }
 0x18c   : > { %v8663_v40 = vpop.f32.mrf.mxu1 }
 0x18d   : > { %10124 = vst [vmem:[#allocation6_spill] sm:$0xff] %v8663_v40 }
 0x18e   : > { %v8665_v3 = vpop.f32.mrf.mxu1 }
 0x18f   : > { %10125 = vst [vmem:[#allocation5_spill] sm:$0xff] %v8665_v3 }
 0x192   : > { %v7112_v0 = vpop.f32.mrf.mxu0 }
 0x194   : > { %v2062_v50 = vpop.f32.mrf.mxu0 }
 0x196   : > { %v8667_v27 = vpop.f32.mrf.mxu0 }
 0x198   : > { %v8671_v60 = vpop.f32.mrf.mxu0 }
 0x1aa   : > { %v8669_v2 = vpop.f32.mrf.mxu1 }
 0x1ab   : > { %10126 = vst [vmem:[#allocation22_spill] sm:$0xff] %v8669_v2 }
 0x1ac   : > { %v8673_v35 = vpop.f32.mrf.mxu1 }
 0x1ad   : > { %10127 = vst [vmem:[#allocation4_spill] sm:$0xff] %v8673_v35 }
 0x1ae   : > { %v8677_v36 = vpop.f32.mrf.mxu1 }
 0x1af   : > { %10128 = vst [vmem:[#allocation3_spill] sm:$0xff] %v8677_v36 }
 0x1b0   : > { %v8681_v49 = vpop.f32.mrf.mxu1 }
 0x1b1   : > { %10129 = vst [vmem:[#allocation12_spill] sm:$0xff] %v8681_v49 }
 0x1b3   : > { %v8675_v37 = vpop.f32.mrf.mxu0 }
 0x1b5   : > { %v8679_v25 = vpop.f32.mrf.mxu0 }
 0x1b7   : > { %v8683_v4 = vpop.f32.mrf.mxu0 }
 0x1b9   : > { %v8687_v18 = vpop.f32.mrf.mxu0 }
 0x1c5   : > { %v8685_v22 = vpop.f32.mrf.mxu1 }
 0x1c6   : > { %10130 = vst [vmem:[#allocation11_spill] sm:$0xff] %v8685_v22 }
 0x1c7   : > { %v8689_v26 = vpop.f32.mrf.mxu1 }
 0x1c8   : > { %10131 = vst [vmem:[#allocation8_spill] sm:$0xff] %v8689_v26 }
 0x1c9   : > { %v7133_v53 = vpop.f32.mrf.mxu1 }
 0x1ca   : > { %v8691_v15 = vpop.f32.mrf.mxu0  ;;  %v8729_v53 = vrot.slane %v7324_v6, %v4599_v21 }
 0x1cb   : > { %v8696_v8 = vpop.f32.mrf.mxu1 }
 0x1cc   : > { %v8693_v16 = vpop.f32.mrf.mxu0  ;;  %10133 = vst [vmem:[#allocation7_spill] sm:$0xff] %v8696_v8  ;;  %10140 = vst [vmem:[#allocation17_spill] sm:$0xff] %v8729_v53 }
 0x1ce   : > { %v8698_v55 = vpop.f32.mrf.mxu0 }
 0x1cf   : > { %10134 = vst [vmem:[#allocation10_spill] sm:$0xff] %v8698_v55 }
 0x1d0   : > { %v8705_v19 = vpop.f32.mrf.mxu0 }
 0x1d1   : > { %10135 = vst [vmem:[#allocation15_spill] sm:$0xff] %v8705_v19 }
 0x1d2   : > { %v7138_v23 = vpop.f32.mrf.mxu1 }
 0x1d3   : > { %v7164_v14 = vpop.f32.mrf.mxu0  ;;  %v2862_v33 = vadd.f32 %v7138_v23, %v7112_v0  ;;  %v8753_v23 = vrot.slane %v7006_v43, %v4578_v32 }
 0x1d4   : > { %v4005_v46 = vcombine.high %v7164_v14, %v7164_v14  ;;  %v4012_v17 = vrot.slane %v7164_v14, %v8703_v62  ;;  %v2853_v24 = vpop.f32.mrf.mxu1 }
 0x1d5   : > { %v3854_v12 = vpop.f32.mrf.mxu0  ;;  %v3004_v39 = vcombine.high %v2862_v33, %v2862_v33  ;;  %v3011_v47 = vrot.slane %v2862_v33, %v8703_v62  ;;  %v2854_v0 = vadd.f32 %v2853_v24, %v2062_v50 }
 0x1d6   : > { %v4019_v48 = vrot.slane %v4005_v46, %v8703_v62  ;;  %v4020_v45 = vcombine.high %v4012_v17, %v4012_v17  ;;  %v3971_v52 = vcombine.high %v3854_v12, %v3854_v12  ;;  %v3978_v41 = vrot.slane %v3854_v12, %v8703_v62 }
 0x1d7   : > { %v3018_v38 = vrot.slane %v3004_v39, %v8703_v62  ;;  %v3019_v56 = vcombine.high %v3011_v47, %v3011_v47  ;;  %v4451_v63 = vadd.f32 %v4012_v17, %v3011_v47  ;;  %v7165_v31 = vpop.f32.mrf.mxu0  ;;  %v2970_v51 = vcombine.high %v2854_v0, %v2854_v0 }
 0x1d8   : > { %v3985_v28 = vrot.slane %v3971_v52, %v8703_v62  ;;  %v4022_v46 = vcombine.high %v7165_v31, %v7165_v31  ;;  %v4029_v39 = vrot.slane %v7165_v31, %v8703_v62  ;;  %v4021_v32 = vcombine.high %v4019_v48, %v4019_v48 }
 0x1d9   : > { %v4452_v10 = vadd.f32 %v4020_v45, %v3019_v56  ;;  %v4453_v50 = vadd.f32 %v4019_v48, %v3018_v38  ;;  %v4725_v9 = vmul.f32 %v8709_v59, %v4451_v63  ;;  %v6227_v30 = vrot.slane %v4451_v63, %v8703_v62  ;;  %v8756_v17 = vpop.f32.mrf.mxu0 }
 0x1da   : > { %v3020_v14 = vcombine.high %v3018_v38, %v3018_v38  ;;  %v3986_v47 = vcombine.high %v3978_v41, %v3978_v41  ;;  %v2977_v45 = vrot.slane %v2854_v0, %v8703_v62  ;;  %v2984_v43 = vrot.slane %v2970_v51, %v8703_v62 }
 0x1db   : > { %v8748_v6 = vmul.f32 %v8711_v61, %v4452_v10  ;;  %v8751_v54 = vmul.f32 %v8713_v34, %v4453_v50  ;;  %v7041_v33 = vpack.c.bf16 %v6227_v30, %v6227_v30  ;;  %v4937_v21 = vrot.slane %v4725_v9, %v8703_v62  ;;  %v7139_v30 = vpop.f32.mrf.mxu1  ;;  %v8779_v8 = vpop.f32.mrf.mxu0 }
 0x1dc   : > { %v8771_v38 = vmul.f32 %v4725_v9, %v4451_v63  ;;  %v6228_v52 = vcombine.low %v4452_v10, %v4453_v50  ;;  %v8777_v31 = vrot.slane %v4022_v46, %v8703_v62  ;;  %v2985_v48 = vcombine.high %v2977_v45, %v2977_v45 }
 0x1dd   : > { %v4938_v24 = vcombine.low %v8748_v6, %v8751_v54  ;;  %v8761_v11 = vmul.f32 %v8748_v6, %v4452_v10  ;;  %v8764_v12 = vmul.f32 %v8751_v54, %v4453_v50  ;;  %6761 = vst.msk [vmem:[%s8745_s9 + $0x8] sm:$0x1] %vm6760_vm7, %v7041_v33  ;;  %v3987_v6 = vcombine.high %v3985_v28, %v3985_v28 }
 0x1de   : > { %v4443_v54 = vadd.f32 %v3978_v41, %v2977_v45  ;;  %v8781_v33 = vadd.f32 %v4021_v32, %v3020_v14  ;;  %v4037_v0 = vcombine.high %v4029_v39, %v4029_v39  ;;  %v2986_v63 = vcombine.high %v2984_v43, %v2984_v43 }
 0x1df   : > { %v4445_v9 = vadd.f32 %v3985_v28, %v2984_v43  ;;  %v8784_v26 = vsel %vm5375_vm9, %v4937_v21, 0.0  ;;  %v4444_v10 = vadd.f32 %v3986_v47, %v2985_v48  ;;  %v2865_v51 = vadd.f32 %v7139_v30, %v8667_v27  ;;  %v8795_v47 = vpop.f32.mrf.mxu0 }
 0x1e0   : > { %v4717_v50 = vmul.f32 %v8709_v59, %v4443_v54  ;;  %v8791_v41 = vrot.slane %v6228_v52, %v8703_v62  ;;  %v4446_v45 = vadd.f32 %v3987_v6, %v2986_v63 }
 0x1e1   : > { %v4719_v14 = vmul.f32 %v8723_v57, %v4445_v9  ;;  %v4718_v32 = vmul.f32 %v8716_v7, %v4444_v10  ;;  %v6187_v43 = vcombine.low %v4443_v54, %v4444_v10  ;;  %v3021_v21 = vcombine.high %v2865_v51, %v2865_v51 }
 0x1e2   : > { %v5406_v28 = vmul.f32 %v4717_v50, %v4443_v54  ;;  %v4720_v48 = vmul.f32 %v8729_v53, %v4446_v45  ;;  %v6188_v30 = vcombine.low %v4445_v9, %v4446_v45  ;;  %v3028_v46 = vrot.slane %v2865_v51, %v8703_v62  ;;  %v2856_v51 = vpop.f32.mrf.mxu1 }
 0x1e3   : > { %v5408_v27 = vmul.f32 %v4719_v14, %v4445_v9  ;;  %v4897_v56 = vcombine.low %v4717_v50, %v4718_v32  ;;  %v5407_v52 = vmul.f32 %v4718_v32, %v4444_v10  ;;  %v6195_v6 = vrot.slane %v6187_v43, %v8703_v62  ;;  %v8807_v50 = vpop.f32.mrf.mxu0 }
 0x1e4   : > { %v8801_v63 = vrot.slane %v3021_v21, %v8703_v62  ;;  %v4898_v22 = vcombine.low %v4719_v14, %v4720_v48  ;;  %v5409_v49 = vmul.f32 %v4720_v48, %v4446_v45  ;;  %v6202_v54 = vrot.slane %v6188_v30, %v8703_v62 }
 0x1e5   : > { %v3036_v36 = vcombine.high %v3028_v46, %v3028_v46  ;;  %v4905_v35 = vrot.slane %v4897_v56, %v8703_v62  ;;  %v5586_v2 = vcombine.low %v5406_v28, %v5407_v52  ;;  %v4455_v3 = vadd.f32 %v4029_v39, %v3028_v46 }
 0x1e6   : > { %v4728_v9 = vmul.f32 %v8731_v1, %v8781_v33  ;;  %v4912_v10 = vrot.slane %v4898_v22, %v8703_v62  ;;  %v5587_v32 = vcombine.low %v5408_v27, %v5409_v49  ;;  %v6203_v43 = vcombine.low %v6195_v6, %v6202_v54  ;;  %v8829_v27 = vpop.f32.mrf.mxu0 }
 0x1e7   : > { %v8810_v21 = vadd.f32 %v4037_v0, %v3036_v36  ;;  %v4946_v45 = vrot.slane %v4938_v24, %v8703_v62  ;;  %v5594_v14 = vrot.slane %v5586_v2, %v8703_v62  ;;  %v8816_v39 = vadd.f32 %v8777_v31, %v8801_v63  ;;  %v7142_v0 = vpop.f32.mrf.mxu1 }
 0x1e8   : > { %v4729_v56 = vmul.f32 %v8733_v58, %v4455_v3  ;;  %v4913_v46 = vcombine.low %v4905_v35, %v4912_v10  ;;  %v5601_v28 = vrot.slane %v5587_v32, %v8703_v62  ;;  %v7039_v48 = vpack.c.bf16 %v6203_v43, %v6203_v43 }
 0x1e9   : > { %v8822_v49 = vmul.f32 %v8718_v5, %v8810_v21  ;;  %v8826_v36 = vmul.f32 %v8725_v42, %v8816_v39  ;;  %v5417_v2 = vmul.f32 %v4728_v9, %v8781_v33  ;;  %v3988_v35 = vcombine.high %v8756_v17, %v8756_v17 }
 0x1ea   : > { %v4939_v22 = vcombine.low %v4728_v9, %v4729_v56  ;;  %v5418_v24 = vmul.f32 %v4729_v56, %v4455_v3  ;;  %v5602_v30 = vcombine.low %v5594_v14, %v5601_v28  ;;  %6758 = vst.msk [vmem:[%s8745_s9] sm:$0xf] %vm6757_vm10, %v7039_v48  ;;  %v6229_v6 = vcombine.low %v8781_v33, %v4455_v3 }
 0x1eb   : > { %v8837_v52 = vmul.f32 %v8822_v49, %v8810_v21  ;;  %v4955_v9 = vcombine.low %v8822_v49, %v8826_v36  ;;  %v8845_v10 = vmul.f32 %v8826_v36, %v8816_v39  ;;  %v10142_v43 = vcombine.low %v8761_v11, %v8764_v12  ;;  %v8862_v11 = vpop.f32.mrf.mxu0 }
 0x1ec   : > { %v4953_v54 = vrot.slane %v4939_v22, %v8703_v62  ;;  %v5628_v32 = vcombine.low %v5417_v2, %v5418_v24  ;;  %v4038_v56 = vcombine.high %v8777_v31, %v8777_v31  ;;  %v3995_v3 = vrot.slane %v8756_v17, %v8703_v62  ;;  %v8860_v22 = vpop.f32.mrf.mxu1 }
 0x1ed   : > { %v5635_v14 = vrot.slane %v10142_v43, %v8703_v62  ;;  %v6243_v33 = vrot.slane %v6229_v6, %v8703_v62  ;;  %v5337_v28 = vsel %vm724_vm3, %v4913_v46, 0.0  ;;  %v10143_v12 = vrot.slane %v8771_v38, %v8703_v62 }
 0x1ee   : > { %v4954_v48 = vcombine.low %v4946_v45, %v4953_v54  ;;  %v5642_v49 = vrot.slane %v5628_v32, %v8703_v62  ;;  %v4002_v17 = vrot.slane %v3988_v35, %v8703_v62  ;;  %v3037_v45 = vcombine.high %v8801_v63, %v8801_v63 }
 0x1ef   : > { %v8868_v31 = vsel %vm5375_vm9, %v10143_v12, 0.0  ;;  %v6244_v46 = vcombine.low %v8791_v41, %v6243_v33  ;;  %v6026_v2 = vsel %vm724_vm3, %v5602_v30, 0.0  ;;  %v2857_v54 = vadd.f32 %v2856_v51, %v8671_v60 }
 0x1f0   : > { %v5338_v24 = vsel %vm724_vm3, %v4954_v48, 0.0  ;;  %v5643_v6 = vcombine.low %v5635_v14, %v5642_v49  ;;  %v4073_v43 = vcombine.high %v8779_v8, %v8779_v8  ;;  %v4080_v35 = vrot.slane %v8779_v8, %v8703_v62  ;;  %v8885_v48 = vpop.f32.mrf.mxu1  ;;  %v8887_v14 = vpop.f32.mrf.mxu0 }
 0x1f1   : > { %v8877_v32 = vadd.f32 %v5338_v24, %v5337_v28  ;;  %v7042_v38 = vpack.c.bf16 %v6244_v46, %v6244_v46  ;;  %v4003_v63 = vcombine.high %v3995_v3, %v3995_v3  ;;  %v2987_v33 = vcombine.high %v2857_v54, %v2857_v54 }
 0x1f2   : > { %v6027_v41 = vsel %vm724_vm3, %v5643_v6, 0.0  ;;  %v2994_v30 = vrot.slane %v2857_v54, %v8703_v62  ;;  %v4004_v60 = vcombine.high %v4002_v17, %v4002_v17  ;;  %v8889_v51 = vadd.f32 %v4038_v56, %v3037_v45 }
 0x1f3   : > { %v8891_v28 = vadd.f32 %v6027_v41, %v6026_v2  ;;  %6762 = vst.msk [vmem:[%s8745_s9 + $0xc] sm:$0xf] %vm6757_vm10, %v7042_v38  ;;  %v2878_v49 = vadd.f32 %v7142_v0, %v8675_v37  ;;  %v6245_v8 = vcombine.low %v8810_v21, %v8816_v39  ;;  %v3001_v12 = vrot.slane %v2987_v33, %v8703_v62  ;;  %v8904_v37 = vpop.f32.mrf.mxu1  ;;  %v8906_v0 = vpop.f32.mrf.mxu0 }
 0x1f4   : > { %v3002_v46 = vcombine.high %v2994_v30, %v2994_v30  ;;  %v4447_v24 = vadd.f32 %v3995_v3, %v2994_v30  ;;  %v8900_v6 = vrot.slane %v4073_v43, %v8703_v62  ;;  %v4088_v54 = vcombine.high %v4080_v35, %v4080_v35 }
 0x1f5   : > { %v3072_v36 = vcombine.high %v2878_v49, %v2878_v49  ;;  %v3079_v56 = vrot.slane %v2878_v49, %v8703_v62  ;;  %v3003_v45 = vcombine.high %v3001_v12, %v3001_v12  ;;  %v4449_v41 = vadd.f32 %v4002_v17, %v3001_v12 }
 0x1f6   : > { %v4448_v2 = vadd.f32 %v4003_v63, %v3002_v46  ;;  %v4721_v38 = vmul.f32 %v8709_v59, %v4447_v24  ;;  %v4039_v21 = vcombine.high %v8795_v47, %v8795_v47  ;;  %v8912_v33 = vrot.slane %v4955_v9, %v8703_v62  ;;  %v8923_v9 = vpop.f32.mrf.mxu0 }
 0x1f7   : > { %v3086_v39 = vrot.slane %v3072_v36, %v8703_v62  ;;  %v3087_v3 = vcombine.high %v3079_v56, %v3079_v56  ;;  %v4467_v43 = vadd.f32 %v4080_v35, %v3079_v56  ;;  %v4450_v30 = vadd.f32 %v4004_v60, %v3003_v45  ;;  %v8921_v56 = vpop.f32.mrf.mxu1  ;;  %10144 = vst [vmem:[#allocation18_spill] sm:$0xff] %v8923_v9 }
 0x1f8   : > { %v4722_v63 = vmul.f32 %v8716_v7, %v4448_v2  ;;  %v4723_v17 = vmul.f32 %v8723_v57, %v4449_v41  ;;  %v8917_v49 = vrot.slane %v6245_v8, %v8703_v62  ;;  %v6204_v12 = vcombine.low %v4447_v24, %v4448_v2  ;;  %v8941_v55 = vpop.f32.mrf.mxu0 }
 0x1f9   : > { %v4468_v46 = vadd.f32 %v4088_v54, %v3087_v3  ;;  %v4469_v59 = vadd.f32 %v8900_v6, %v3086_v39  ;;  %v4724_v40 = vmul.f32 %v8729_v53, %v4450_v30  ;;  %v5410_v29 = vmul.f32 %v4721_v38, %v4447_v24  ;;  %v8939_v9 = vpop.f32.mrf.mxu1  ;;  %10145 = vst [vmem:[#allocation23_spill] sm:$0xff] %v8941_v55 }
 0x1fa   : > { %v4914_v36 = vcombine.low %v4721_v38, %v4722_v63  ;;  %v5411_v35 = vmul.f32 %v4722_v63, %v4448_v2  ;;  %v6205_v60 = vcombine.low %v4449_v41, %v4450_v30  ;;  %v8927_v45 = vrot.slane %v8795_v47, %v8703_v62 }
 0x1fb   : > { %v8930_v8 = vrot.slane %v4039_v21, %v8703_v62  ;;  %v4741_v54 = vmul.f32 %v8735_v13, %v4467_v43  ;;  %v4915_v3 = vcombine.low %v4723_v17, %v4724_v40  ;;  %v5412_v57 = vmul.f32 %v4723_v17, %v4449_v41 }
 0x1fc   : > { %v5413_v53 = vmul.f32 %v4724_v40, %v4450_v30  ;;  %v5603_v7 = vcombine.low %v5410_v29, %v5411_v35  ;;  %v6212_v24 = vrot.slane %v6204_v12, %v8703_v62  ;;  %v6219_v2 = vrot.slane %v6205_v60, %v8703_v62 }
 0x1fd   : > { %v4742_v38 = vmul.f32 %v8740_v20, %v4468_v46  ;;  %v4743_v63 = vmul.f32 %v8753_v23, %v4469_v59  ;;  %v4922_v47 = vrot.slane %v4914_v36, %v8703_v62  ;;  %v4929_v44 = vrot.slane %v4915_v3, %v8703_v62 }
 0x1fe   : > { %v5604_v21 = vcombine.low %v5412_v57, %v5413_v53  ;;  %v3088_v19 = vcombine.high %v3086_v39, %v3086_v39  ;;  %v6220_v40 = vcombine.low %v6212_v24, %v6219_v2  ;;  %v8943_v41 = vmul.f32 %v4741_v54, %v4467_v43  ;;  %v8965_v24 = vpop.f32.mrf.mxu0 }
 0x1ff   : > { %v4997_v29 = vcombine.low %v4741_v54, %v4742_v38  ;;  %v8945_v30 = vmul.f32 %v4742_v38, %v4468_v46  ;;  %v4930_v17 = vcombine.low %v4922_v47, %v4929_v44  ;;  %v5611_v12 = vrot.slane %v5603_v7, %v8703_v62  ;;  %10147 = vst [vmem:[#allocation2_spill] sm:$0xff] %v8965_v24 }
 0x200   : > { %v5618_v36 = vrot.slane %v5604_v21, %v8703_v62  ;;  %v6287_v35 = vcombine.low %v4467_v43, %v4468_v46  ;;  %v10146_v57 = vcombine.low %v8837_v52, %v8845_v10  ;;  %v7040_v39 = vpack.c.bf16 %v6220_v40, %v6220_v40  ;;  %v8963_v46 = vpop.f32.mrf.mxu1 }
 0x201   : > { %v5019_v60 = vrot.slane %v4743_v63, %v8703_v62  ;;  %v4089_v44 = vcombine.high %v8900_v6, %v8900_v6  ;;  %v8960_v7 = vmul.f32 %v4743_v63, %v4469_v59  ;;  %v6309_v43 = vrot.slane %v4469_v59, %v8703_v62 }
 0x202   : > { %v8953_v53 = vrot.slane %v10146_v57, %v8703_v62  ;;  %v5619_v3 = vcombine.low %v5611_v12, %v5618_v36  ;;  %6759 = vst.msk [vmem:[%s8745_s9 + $0x4] sm:$0xf] %vm6757_vm10, %v7040_v39  ;;  %v4054_v52 = vcombine.high %v8927_v45, %v8927_v45  ;;  %v4090_v10 = vcombine.high %v8807_v50, %v8807_v50  ;;  %v9002_v36 = vpop.f32.mrf.mxu1 }
 0x203   : > { %v8975_v6 = vrot.slane %v8807_v50, %v8703_v62  ;;  %v2870_v59 = vadd.f32 %v8860_v22, %v8679_v25  ;;  %v4055_v2 = vcombine.high %v8930_v8, %v8930_v8  ;;  %v8981_v38 = vadd.f32 %v4089_v44, %v3088_v19  ;;  %10149 = vst [vmem:[#allocation25_spill] sm:$0xff] %v9002_v36 }
 0x204   : > { %v8984_v63 = vrot.slane %v6287_v35, %v8703_v62  ;;  %v7047_v47 = vpack.c.bf16 %v6309_v43, %v6309_v43  ;;  %v8987_v21 = vrot.slane %v4997_v29, %v8703_v62  ;;  %v8990_v40 = vsel %vm5375_vm9, %v5019_v60, 0.0  ;;  %v9004_v35 = vpop.f32.mrf.mxu0  ;;  %v9031_v54 = vpop.f32.mrf.mxu1 }
 0x205   : > { %10148 = vst [vmem:[#allocation24_spill] sm:$0xff] %v8990_v40  ;;  %v3038_v50 = vcombine.high %v2870_v59, %v2870_v59  ;;  %v3045_v12 = vrot.slane %v2870_v59, %v8703_v62  ;;  %v5356_v25 = vsel %vm724_vm3, %v4930_v17, 0.0  ;;  %v4732_v19 = vmul.f32 %v8735_v13, %v8889_v51  ;;  %10150 = vst [vmem:[#allocation26_spill] sm:$0xff] %v9004_v35 }
 0x206   : > { %6767 = vst.msk [vmem:[%s8745_s9 + $0x20] sm:$0x1] %vm6760_vm7, %v7047_v47  ;;  %v2881_v29 = vadd.f32 %v8885_v48, %v8683_v4  ;;  %v9007_v57 = vrot.slane %v4090_v10, %v8703_v62  ;;  %v6045_v44 = vsel %vm724_vm3, %v5619_v3, 0.0  ;;  %v4105_v43 = vcombine.high %v8975_v6, %v8975_v6  ;;  %10151 = vst [vmem:[#allocation27_spill] sm:$0xff] %v9031_v54 }
 0x207   : > { %v3052_v17 = vrot.slane %v3038_v50, %v8703_v62  ;;  %v3053_v39 = vcombine.high %v3045_v12, %v3045_v12  ;;  %v4459_v60 = vadd.f32 %v8927_v45, %v3045_v12  ;;  %v4056_v4 = vcombine.high %v8829_v27, %v8829_v27 }
 0x208   : > { %v3096_v48 = vrot.slane %v2881_v29, %v8703_v62  ;;  %v5421_v22 = vmul.f32 %v4732_v19, %v8889_v51  ;;  %v9025_v3 = vrot.slane %v8829_v27, %v8703_v62  ;;  %v9029_v12 = vmul.f32 %v8711_v61, %v8981_v38 }
 0x209   : > { %v3054_v59 = vcombine.high %v3052_v17, %v3052_v17  ;;  %v4460_v47 = vadd.f32 %v4054_v52, %v3053_v39  ;;  %v9018_v10 = vadd.f32 %v8930_v8, %v3052_v17  ;;  %v4733_v50 = vmul.f32 %v8740_v20, %v4459_v60  ;;  %v9033_v52 = vpop.f32.mrf.mxu0 }
 0x20a   : > { %v6246_v45 = vcombine.low %v8889_v51, %v4459_v60  ;;  %10152 = vst [vmem:[#allocation28_spill] sm:$0xff] %v9033_v52  ;;  %v3089_v24 = vcombine.high %v2881_v29, %v2881_v29  ;;  %v3104_v36 = vcombine.high %v3096_v48, %v3096_v48  ;;  %v9055_v29 = vpop.f32.mrf.mxu1 }
 0x20b   : > { %v9035_v8 = vadd.f32 %v4055_v2, %v3054_v59  ;;  %v4734_v17 = vmul.f32 %v8753_v23, %v4460_v47  ;;  %v9040_v39 = vmul.f32 %v8711_v61, %v9018_v10  ;;  %v4956_v51 = vcombine.low %v4732_v19, %v4733_v50 }
 0x20c   : > { %v5422_v35 = vmul.f32 %v4733_v50, %v4459_v60  ;;  %v6260_v27 = vrot.slane %v6246_v45, %v8703_v62  ;;  %v6268_v60 = vrot.slane %v4460_v47, %v8703_v62  ;;  %v9057_v50 = vpop.f32.mrf.mxu0 }
 0x20d   : > { %v9045_v55 = vmul.f32 %v8713_v34, %v9035_v8  ;;  %v4970_v52 = vrot.slane %v4956_v51, %v8703_v62  ;;  %v4978_v2 = vrot.slane %v4734_v17, %v8703_v62  ;;  %v5423_v59 = vmul.f32 %v4734_v17, %v4460_v47  ;;  %10153 = vst [vmem:[#allocation29_spill] sm:$0xff] %v9057_v50  ;;  %v9085_v51 = vpop.f32.mrf.mxu1 }
 0x20e   : > { %v9051_v54 = vmul.f32 %v9040_v39, %v9018_v10  ;;  %v5645_v61 = vcombine.low %v5421_v22, %v5422_v35  ;;  %v6261_v19 = vcombine.low %v8917_v49, %v6260_v27  ;;  %v9073_v47 = vrot.slane %v3089_v24, %v8703_v62  ;;  %10154 = vst [vmem:[#allocation30_spill] sm:$0xff] %v9085_v51  ;;  %v9087_v24 = vpop.f32.mrf.mxu0 }
 0x20f   : > { %v4971_v45 = vcombine.low %v8912_v33, %v4970_v52  ;;  %v5377_v17 = vsel %vm5375_vm9, %v4978_v2, 0.0  ;;  %v9065_v40 = vmul.f32 %v9045_v55, %v9035_v8  ;;  %v5667_v35 = vrot.slane %v5423_v59, %v8703_v62  ;;  %10155 = vst [vmem:[#allocation31_spill] sm:$0xff] %v9087_v24 }
 0x210   : > { %v9068_v22 = vadd.f32 %v5377_v17, %v8784_v26  ;;  %v5659_v49 = vrot.slane %v5645_v61, %v8703_v62  ;;  %v7043_v27 = vpack.c.bf16 %v6261_v19, %v6261_v19  ;;  %v9079_v2 = vrot.slane %v4056_v4, %v8703_v62 }
 0x211   : > { %v5357_v33 = vsel %vm724_vm3, %v4971_v45, 0.0  ;;  %v5668_v52 = vcombine.low %v9051_v54, %v9065_v40  ;;  %v6065_v61 = vsel %vm5375_vm9, %v5667_v35, 0.0  ;;  %v7044_v59 = vpack.c.bf16 %v6268_v60, %v6268_v60 }
 0x212   : > { %v9081_v26 = vadd.f32 %v5357_v33, %v5356_v25  ;;  %v5660_v17 = vcombine.low %v8953_v53, %v5659_v49  ;;  %v10156_v54 = vcombine.low %v8943_v41, %v8945_v30  ;;  %v9096_v4 = vadd.f32 %v6065_v61, %v8868_v31  ;;  %6763 = vst.msk [vmem:[%s8745_s9 + $0x10] sm:$0xf] %vm6757_vm10, %v7043_v27  ;;  %v9120_v33 = vpop.f32.mrf.mxu1  ;;  %v9122_v27 = vpop.f32.mrf.mxu0 }
 0x213   : > { %v4471_v53 = vadd.f32 %v8975_v6, %v3096_v48  ;;  %v4472_v25 = vadd.f32 %v4105_v43, %v3104_v36  ;;  %6764 = vst.msk [vmem:[%s8745_s9 + $0x14] sm:$0x1] %vm6760_vm7, %v7044_v59  ;;  %v4473_v41 = vadd.f32 %v9007_v57, %v9073_v47  ;;  %v5433_v30 = vmul.f32 %v9029_v12, %v8981_v38 }
 0x214   : > { %v9093_v40 = vrot.slane %v10156_v54, %v8703_v62  ;;  %v6046_v60 = vsel %vm724_vm3, %v5660_v17, 0.0  ;;  %v4071_v43 = vcombine.high %v9025_v3, %v9025_v3  ;;  %v4072_v48 = vcombine.high %v9079_v2, %v9079_v2  ;;  %10157 = vst [vmem:[#allocation32_spill] sm:$0xff] %v9120_v33  ;;  %10158 = vst [vmem:[#allocation33_spill] sm:$0xff] %v9122_v27 }
 0x215   : > { %v9110_v31 = vadd.f32 %v6046_v60, %v6045_v44  ;;  %v4745_v45 = vmul.f32 %v8713_v34, %v4471_v53  ;;  %v4746_v6 = vmul.f32 %v8731_v1, %v4472_v25  ;;  %v6310_v36 = vcombine.low %v8981_v38, %v4471_v53 }
 0x216   : > { %v4747_v49 = vmul.f32 %v8733_v58, %v4473_v41  ;;  %v6311_v35 = vcombine.low %v4472_v25, %v4473_v41  ;;  %v4141_v38 = vcombine.high %v8862_v11, %v8862_v11  ;;  %v6269_v24 = vcombine.low %v9018_v10, %v9035_v8 }
 0x217   : > { %v5020_v44 = vcombine.low %v9029_v12, %v4745_v45  ;;  %v5434_v17 = vmul.f32 %v4745_v45, %v4471_v53  ;;  %v5435_v61 = vmul.f32 %v4746_v6, %v4472_v25  ;;  %v6318_v60 = vrot.slane %v6310_v36, %v8703_v62  ;;  %v9143_v36 = vpop.f32.mrf.mxu0 }
 0x218   : > { %v5021_v59 = vcombine.low %v4746_v6, %v4747_v49  ;;  %v5436_v54 = vmul.f32 %v4747_v49, %v4473_v41  ;;  %v6325_v19 = vrot.slane %v6311_v35, %v8703_v62  ;;  %v2873_v12 = vadd.f32 %v8904_v37, %v8687_v18  ;;  %v9141_v6 = vpop.f32.mrf.mxu1  ;;  %10160 = vst [vmem:[#allocation35_spill] sm:$0xff] %v9143_v36 }
 0x219   : > { %v5709_v27 = vcombine.low %v5433_v30, %v5434_v17  ;;  %v9136_v53 = vrot.slane %v5020_v44, %v8703_v62  ;;  %10159 = vst [vmem:[#allocation34_spill] sm:$0xff] %v9141_v6  ;;  %v4148_v10 = vrot.slane %v8862_v11, %v8703_v62  ;;  %v4155_v8 = vrot.slane %v4141_v38, %v8703_v62 }
 0x21a   : > { %v9139_v25 = vrot.slane %v5021_v59, %v8703_v62  ;;  %v5710_v41 = vcombine.low %v5435_v61, %v5436_v54  ;;  %v6326_v45 = vcombine.low %v6318_v60, %v6325_v19  ;;  %v3055_v30 = vcombine.high %v2873_v12, %v2873_v12  ;;  %v9173_v60 = vpop.f32.mrf.mxu1 }
 0x21b   : > { %v3062_v18 = vrot.slane %v2873_v12, %v8703_v62  ;;  %v9152_v49 = vrot.slane %v5709_v27, %v8703_v62  ;;  %v6277_v44 = vrot.slane %v6269_v24, %v8703_v62  ;;  %v10161_v38 = vcombine.low %v9040_v39, %v9045_v55  ;;  %10162 = vst [vmem:[#allocation36_spill] sm:$0xff] %v9173_v60  ;;  %v9175_v12 = vpop.f32.mrf.mxu0 }
 0x21c   : > { %v9155_v19 = vrot.slane %v5710_v41, %v8703_v62  ;;  %v7048_v35 = vpack.c.bf16 %v6326_v45, %v6326_v45  ;;  %v3069_v17 = vrot.slane %v3055_v30, %v8703_v62  ;;  %v9165_v54 = vrot.slane %v5668_v52, %v8703_v62  ;;  %10163 = vst [vmem:[#allocation37_spill] sm:$0xff] %v9175_v12 }
 0x21d   : > { %v3070_v11 = vcombine.high %v3062_v18, %v3062_v18  ;;  %v4463_v61 = vadd.f32 %v9025_v3, %v3062_v18  ;;  %v4987_v59 = vrot.slane %v10161_v38, %v8703_v62  ;;  %v2894_v24 = vadd.f32 %v8921_v56, %v8691_v15 }
 0x21e   : > { %6768 = vst.msk [vmem:[%s8745_s9 + $0x24] sm:$0xf] %vm6757_vm10, %v7048_v35  ;;  %v3071_v3 = vcombine.high %v3069_v17, %v3069_v17  ;;  %v4465_v55 = vadd.f32 %v9079_v2, %v3069_v17  ;;  %v4156_v52 = vcombine.high %v4148_v10, %v4148_v10  ;;  %v4157_v45 = vcombine.high %v4155_v8, %v4155_v8  ;;  %v9185_v2 = vpop.f32.mrf.mxu1  ;;  %v9187_v17 = vpop.f32.mrf.mxu0 }
 0x21f   : > { %v4464_v41 = vadd.f32 %v4071_v43, %v3070_v11  ;;  %v4737_v39 = vmul.f32 %v8731_v1, %v4463_v61  ;;  %v3140_v30 = vcombine.high %v2894_v24, %v2894_v24  ;;  %v3147_v18 = vrot.slane %v2894_v24, %v8703_v62  ;;  %10164 = vst [vmem:[#allocation38_spill] sm:$0xff] %v9185_v2 }
 0x220   : > { %v4466_v38 = vadd.f32 %v4072_v48, %v3071_v3  ;;  %v4739_v15 = vmul.f32 %v8718_v5, %v4465_v55  ;;  %10165 = vst [vmem:[#allocation39_spill] sm:$0xff] %v9187_v17 }
 0x221   : > { %v4738_v35 = vmul.f32 %v8733_v58, %v4464_v41  ;;  %v5426_v56 = vmul.f32 %v4737_v39, %v4463_v61  ;;  %v6270_v27 = vcombine.low %v4463_v61, %v4464_v41  ;;  %v3154_v37 = vrot.slane %v3140_v30, %v8703_v62  ;;  %v7185_v61 = vpop.f32.mrf.mxu0 }
 0x222   : > { %v3155_v50 = vcombine.high %v3147_v18, %v3147_v18  ;;  %v9183_v43 = vadd.f32 %v4148_v10, %v3147_v18  ;;  %v4740_v11 = vmul.f32 %v8725_v42, %v4466_v38  ;;  %v5428_v48 = vmul.f32 %v4739_v15, %v4465_v55 }
 0x223   : > { %v4980_v12 = vcombine.low %v4737_v39, %v4738_v35  ;;  %v5427_v24 = vmul.f32 %v4738_v35, %v4464_v41  ;;  %v6284_v3 = vrot.slane %v6270_v27, %v8703_v62  ;;  %v6286_v36 = vcombine.low %v4465_v55, %v4466_v38  ;;  %v9193_v39 = vpop.f32.mrf.mxu1 }
 0x224   : > { %v3156_v60 = vcombine.high %v3154_v37, %v3154_v37  ;;  %v4484_v6 = vadd.f32 %v4156_v52, %v3155_v50  ;;  %v4996_v33 = vcombine.low %v4739_v15, %v4740_v11  ;;  %v5429_v10 = vmul.f32 %v4740_v11, %v4466_v38 }
 0x225   : > { %v4994_v30 = vrot.slane %v4980_v12, %v8703_v62  ;;  %v5669_v18 = vcombine.low %v5426_v56, %v5427_v24  ;;  %v6285_v51 = vcombine.low %v6277_v44, %v6284_v3  ;;  %v6294_v2 = vrot.slane %v6286_v36, %v8703_v62 }
 0x226   : > { %v4485_v17 = vadd.f32 %v4155_v8, %v3154_v37  ;;  %v4486_v58 = vadd.f32 %v4157_v45, %v3156_v60  ;;  %v5004_v27 = vrot.slane %v4996_v33, %v8703_v62  ;;  %v5685_v50 = vcombine.low %v5428_v48, %v5429_v10  ;;  %v9212_v45 = vpop.f32.mrf.mxu1 }
 0x227   : > { %v4995_v41 = vcombine.low %v4987_v59, %v4994_v30  ;;  %v5683_v55 = vrot.slane %v5669_v18, %v8703_v62  ;;  %v6302_v52 = vcombine.low %v6294_v2, %v8984_v63  ;;  %v7045_v12 = vpack.c.bf16 %v6285_v51, %v6285_v51 }
 0x228   : > { %v4757_v38 = vmul.f32 %v8718_v5, %v9183_v43  ;;  %v4758_v44 = vmul.f32 %v8725_v42, %v4484_v6  ;;  %v5012_v36 = vcombine.low %v5004_v27, %v8987_v21  ;;  %v5693_v33 = vrot.slane %v5685_v50, %v8703_v62 }
 0x229   : > { %v5340_v8 = vsel %vm724_vm3, %v4995_v41, 0.0  ;;  %v5684_v37 = vcombine.low %v9165_v54, %v5683_v55  ;;  %v7046_v60 = vpack.c.bf16 %v6302_v52, %v6302_v52  ;;  %6765 = vst.msk [vmem:[%s8745_s9 + $0x18] sm:$0xf] %vm6757_vm10, %v7045_v12  ;;  %v4759_v63 = vmul.f32 %v8735_v13, %v4485_v17 }
 0x22a   : > { %v9206_v59 = vadd.f32 %v5340_v8, %v8877_v32  ;;  %v4760_v51 = vmul.f32 %v8740_v20, %v4486_v58  ;;  %v10166_v21 = vcombine.high %v9073_v47, %v9073_v47  ;;  %v10167_v54 = vcombine.high %v9007_v57, %v9007_v57  ;;  %v9230_v47 = vpop.f32.mrf.mxu1 }
 0x22b   : > { %v5701_v32 = vcombine.low %v5693_v33, %v9093_v40  ;;  %v6029_v15 = vsel %vm724_vm3, %v5684_v37, 0.0  ;;  %v5078_v56 = vcombine.low %v4757_v38, %v4758_v44  ;;  %6766 = vst.msk [vmem:[%s8745_s9 + $0x1c] sm:$0xf] %vm6757_vm10, %v7046_v60  ;;  %v5446_v24 = vmul.f32 %v4757_v38, %v9183_v43 }
 0x22c   : > { %v9220_v35 = vadd.f32 %v10167_v54, %v10166_v21  ;;  %v9225_v2 = vadd.f32 %v6029_v15, %v8891_v28  ;;  %v5079_v11 = vcombine.low %v4759_v63, %v4760_v51  ;;  %v5447_v48 = vmul.f32 %v4758_v44, %v4484_v6  ;;  %v7159_v41 = vpop.f32.mrf.mxu1 }
 0x22d   : > { %v4107_v57 = vcombine.high %v8887_v14, %v8887_v14  ;;  %v9235_v3 = vrot.slane %v5078_v56, %v8703_v62  ;;  %v5448_v40 = vmul.f32 %v4759_v63, %v4485_v17  ;;  %v5449_v61 = vmul.f32 %v4760_v51, %v4486_v58 }
 0x22e   : > { %v9238_v30 = vrot.slane %v5079_v11, %v8703_v62  ;;  %v5767_v28 = vcombine.low %v5446_v24, %v5447_v48  ;;  %v6368_v10 = vcombine.low %v9183_v43, %v4484_v6  ;;  %v6369_v18 = vcombine.low %v4485_v17, %v4486_v58 }
 0x22f   : > { %v5359_v27 = vsel %vm724_vm3, %v5012_v36, 0.0  ;;  %v4114_v55 = vrot.slane %v8887_v14, %v8703_v62  ;;  %v5768_v50 = vcombine.low %v5448_v40, %v5449_v61  ;;  %v2886_v52 = vadd.f32 %v8939_v9, %v8693_v16 }
 0x230   : > { %v6048_v12 = vsel %vm724_vm3, %v5701_v32, 0.0  ;;  %v5094_v38 = vcombine.low %v9235_v3, %v9238_v30  ;;  %v6376_v44 = vrot.slane %v6368_v10, %v8703_v62  ;;  %v6383_v6 = vrot.slane %v6369_v18, %v8703_v62 }
 0x231   : > { %v4121_v58 = vrot.slane %v4107_v57, %v8703_v62  ;;  %v9253_v43 = vrot.slane %v5767_v28, %v8703_v62  ;;  %v9256_v14 = vrot.slane %v5768_v50, %v8703_v62  ;;  %v3106_v17 = vcombine.high %v2886_v52, %v2886_v52 }
 0x232   : > { %v6384_v36 = vcombine.low %v6376_v44, %v6383_v6  ;;  %v4158_v16 = vcombine.high %v8906_v0, %v8906_v0  ;;  %v3113_v9 = vrot.slane %v2886_v52, %v8703_v62  ;;  %v4748_v8 = vmul.f32 %v8718_v5, %v9220_v35 }
 0x233   : > { %v5783_v37 = vcombine.low %v9253_v43, %v9256_v14  ;;  %v3120_v33 = vrot.slane %v3106_v17, %v8703_v62  ;;  %v5360_v60 = vadd.f32 %v5359_v27, %v9081_v26  ;;  %v9268_v63 = vadd.f32 %v6048_v12, %v9110_v31  ;;  %v10169_v12 = vld [vmem:[#allocation10_spill] sm:$0xff] }
 0x234   : > { %v4122_v51 = vcombine.high %v4114_v55, %v4114_v55  ;;  %v7052_v21 = vpack.c.bf16 %v6384_v36, %v6384_v36  ;;  %v3121_v54 = vcombine.high %v3113_v9, %v3113_v9  ;;  %v4475_v32 = vadd.f32 %v4114_v55, %v3113_v9 }
 0x235   : > { %v10168_v15 = vrot.slane %v8960_v7, %v8703_v62  ;;  %v4123_v11 = vcombine.high %v4121_v58, %v4121_v58  ;;  %v3122_v24 = vcombine.high %v3120_v33, %v3120_v33  ;;  %v4477_v48 = vadd.f32 %v4121_v58, %v3120_v33 }
 0x236   : > { %6772 = vst.msk [vmem:[%s8745_s9 + $0x34] sm:$0xf] %vm6757_vm10, %v7052_v21  ;;  %v4165_v26 = vrot.slane %v8906_v0, %v8703_v62  ;;  %v4476_v57 = vadd.f32 %v4122_v51, %v3121_v54  ;;  %v4749_v31 = vmul.f32 %v8725_v42, %v4475_v32  ;;  %v6327_v40 = vcombine.low %v9220_v35, %v4475_v32 }
 0x237   : > { %v6067_v56 = vsel %vm5375_vm9, %v10168_v15, 0.0  ;;  %v9281_v61 = vrot.slane %v4158_v16, %v8703_v62  ;;  %v4478_v28 = vadd.f32 %v4123_v11, %v3122_v24  ;;  %v4751_v7 = vmul.f32 %v8740_v20, %v4477_v48 }
 0x238   : > { %v5437_v10 = vmul.f32 %v4748_v8, %v9220_v35  ;;  %v4750_v18 = vmul.f32 %v8735_v13, %v4476_v57  ;;  %v5037_v41 = vcombine.low %v4748_v8, %v4749_v31  ;;  %v5438_v27 = vmul.f32 %v4749_v31, %v4475_v32  ;;  %v10170_v31 = vld [vmem:[#allocation24_spill] sm:$0xff] }
 0x239   : > { %v6328_v55 = vcombine.low %v4476_v57, %v4477_v48  ;;  %v4752_v0 = vmul.f32 %v8753_v23, %v4478_v28  ;;  %v5440_v50 = vmul.f32 %v4751_v7, %v4477_v48  ;;  %v6350_v52 = vrot.slane %v4478_v28, %v8703_v62 }
 0x23a   : > { %v2897_v44 = vadd.f32 %v8963_v46, %v10169_v12  ;;  %v5038_v6 = vcombine.low %v4750_v18, %v4751_v7  ;;  %v5439_v58 = vmul.f32 %v4750_v18, %v4476_v57  ;;  %v5726_v17 = vcombine.low %v5437_v10, %v5438_v27 }
 0x23b   : > { %v6335_v36 = vrot.slane %v6327_v40, %v8703_v62  ;;  %v5060_v35 = vrot.slane %v4752_v0, %v8703_v62  ;;  %v5441_v16 = vmul.f32 %v4752_v0, %v4478_v28  ;;  %v6342_v9 = vrot.slane %v6328_v55, %v8703_v62 }
 0x23c   : > { %v7050_v8 = vpack.c.bf16 %v6350_v52, %v6350_v52  ;;  %v4173_v33 = vcombine.high %v4165_v26, %v4165_v26  ;;  %v5045_v51 = vrot.slane %v5037_v41, %v8703_v62  ;;  %v5052_v21 = vrot.slane %v5038_v6, %v8703_v62 }
 0x23d   : > { %v5727_v54 = vcombine.low %v5439_v58, %v5440_v50  ;;  %v5734_v46 = vrot.slane %v5726_v17, %v8703_v62  ;;  %v5749_v32 = vrot.slane %v5441_v16, %v8703_v62  ;;  %v6343_v15 = vcombine.low %v6335_v36, %v6342_v9  ;;  %v10172_v36 = vld [vmem:[#allocation13_spill] sm:$0xff] }
 0x23e   : > { %6770 = vst.msk [vmem:[%s8745_s9 + $0x2c] sm:$0x1] %vm6760_vm7, %v7050_v8  ;;  %v3157_v11 = vcombine.high %v2897_v44, %v2897_v44  ;;  %v5053_v24 = vcombine.low %v5045_v51, %v5052_v21  ;;  %v3164_v57 = vrot.slane %v2897_v44, %v8703_v62  ;;  %v5380_v40 = vadd.f32 %v10170_v31, %v9068_v22 }
 0x23f   : > { %v5741_v48 = vrot.slane %v5727_v54, %v8703_v62  ;;  %v7049_v28 = vpack.c.bf16 %v6343_v15, %v6343_v15  ;;  %v5381_v10 = vsel %vm5375_vm9, %v5060_v35, 0.0  ;;  %v6068_v18 = vadd.f32 %v6067_v56, %v9096_v4 }
 0x240   : > { %v9304_v7 = vrot.slane %v3157_v11, %v8703_v62  ;;  %v5361_v41 = vsel %vm724_vm3, %v5053_v24, 0.0  ;;  %v3172_v55 = vcombine.high %v3164_v57, %v3164_v57  ;;  %v4487_v0 = vadd.f32 %v4165_v26, %v3164_v57 }
 0x241   : > { %v5742_v27 = vcombine.low %v5734_v46, %v5741_v48  ;;  %v9309_v50 = vadd.f32 %v5361_v41, %v5360_v60  ;;  %6769 = vst.msk [vmem:[%s8745_s9 + $0x28] sm:$0xf] %vm6757_vm10, %v7049_v28  ;;  %v5382_v52 = vadd.f32 %v5381_v10, %v5380_v40  ;;  %v6069_v56 = vsel %vm5375_vm9, %v5749_v32, 0.0  ;;  %v10171_v60 = vld [vmem:[#allocation18_spill] sm:$0xff]  ;;  %v10177_v41 = vld [vmem:[#allocation25_spill] sm:$0xff] }
 0x242   : > { %v9315_v22 = vadd.f32 %v9281_v61, %v9304_v7  ;;  %v9318_v44 = vadd.f32 %v4173_v33, %v3172_v55  ;;  %v4761_v4 = vmul.f32 %v8753_v23, %v4487_v0  ;;  %v4124_v26 = vcombine.high %v10171_v60, %v10171_v60  ;;  %v10173_v33 = vld [vmem:[#allocation23_spill] sm:$0xff] }
 0x243   : > { %v6050_v12 = vsel %vm724_vm3, %v5742_v27, 0.0  ;;  %v6070_v17 = vadd.f32 %v6069_v56, %v6068_v18  ;;  %v6391_v8 = vrot.slane %v4487_v0, %v8703_v62  ;;  %v4209_v51 = vcombine.high %v10173_v33, %v10173_v33  ;;  %v10176_v18 = vld [vmem:[#allocation15_spill] sm:$0xff] }
 0x244   : > { %v9323_v6 = vadd.f32 %v6050_v12, %v9268_v63  ;;  %v9329_v58 = vmul.f32 %v8713_v34, %v9315_v22  ;;  %v9333_v35 = vmul.f32 %v10172_v36, %v9318_v44  ;;  %v5101_v16 = vrot.slane %v4761_v4, %v8703_v62  ;;  %v10179_v56 = vld [vmem:[#allocation27_spill] sm:$0xff] }
 0x245   : > { %v5450_v9 = vmul.f32 %v4761_v4, %v4487_v0  ;;  %v10174_v15 = vcombine.low %v9136_v53, %v9139_v25  ;;  %v7053_v48 = vpack.c.bf16 %v6391_v8, %v6391_v8  ;;  %v4131_v57 = vrot.slane %v10171_v60, %v8703_v62  ;;  %v10178_v4 = vld [vmem:[#allocation21_spill] sm:$0xff] }
 0x246   : > { %v9339_v63 = vmul.f32 %v9329_v58, %v9315_v22  ;;  %v5102_v21 = vcombine.low %v9333_v35, %v9329_v58  ;;  %v5383_v54 = vsel %vm5375_vm9, %v5101_v16, 0.0  ;;  %v9348_v46 = vmul.f32 %v9333_v35, %v9318_v44 }
 0x247   : > { %v5790_v32 = vrot.slane %v5450_v9, %v8703_v62  ;;  %v5342_v11 = vsel %vm724_vm3, %v10174_v15, 0.0  ;;  %v9355_v24 = vadd.f32 %v5383_v54, %v5382_v52  ;;  %v4138_v31 = vrot.slane %v4124_v26, %v8703_v62  ;;  %6773 = vst.msk [vmem:[%s8745_s9 + $0x38] sm:$0x1] %vm6760_vm7, %v7053_v48 }
 0x248   : > { %v5791_v40 = vcombine.low %v9348_v46, %v9339_v63  ;;  %v10175_v10 = vcombine.low %v9152_v49, %v9155_v19  ;;  %v2889_v27 = vadd.f32 %v10177_v41, %v10176_v18  ;;  %v9374_v55 = vadd.f32 %v5342_v11, %v9206_v59  ;;  %v10180_v18 = vld [vmem:[#allocation20_spill] sm:$0xff] }
 0x249   : > { %v6071_v28 = vsel %vm5375_vm9, %v5790_v32, 0.0  ;;  %v4216_v0 = vrot.slane %v10173_v33, %v8703_v62  ;;  %v4223_v52 = vrot.slane %v4209_v51, %v8703_v62  ;;  %v2910_v60 = vadd.f32 %v10179_v56, %v10178_v4  ;;  %v10181_v56 = vld [vmem:[#allocation19_spill] sm:$0xff] }
 0x24a   : > { %v6031_v53 = vsel %vm724_vm3, %v10175_v10, 0.0  ;;  %v9367_v25 = vadd.f32 %v6071_v28, %v6070_v17  ;;  %v3123_v49 = vcombine.high %v2889_v27, %v2889_v27  ;;  %v3130_v19 = vrot.slane %v2889_v27, %v8703_v62 }
 0x24b   : > { %v9380_v12 = vadd.f32 %v6031_v53, %v9225_v2  ;;  %v4174_v26 = vcombine.high %v9281_v61, %v9281_v61  ;;  %v4139_v17 = vcombine.high %v4131_v57, %v4131_v57  ;;  %v4140_v59 = vcombine.high %v4138_v31, %v4138_v31 }
 0x24c   : > { %v3173_v16 = vcombine.high %v9304_v7, %v9304_v7  ;;  %v3137_v9 = vrot.slane %v3123_v49, %v8703_v62  ;;  %v3138_v8 = vcombine.high %v3130_v19, %v3130_v19  ;;  %v4479_v33 = vadd.f32 %v4131_v57, %v3130_v19 }
 0x24d   : > { %v3208_v2 = vcombine.high %v2910_v60, %v2910_v60  ;;  %v6392_v51 = vcombine.low %v9318_v44, %v9315_v22  ;;  %v4224_v54 = vcombine.high %v4216_v0, %v4216_v0  ;;  %v4225_v32 = vcombine.high %v4223_v52, %v4223_v52 }
 0x24e   : > { %v3215_v15 = vrot.slane %v2910_v60, %v8703_v62  ;;  %v3139_v11 = vcombine.high %v3137_v9, %v3137_v9  ;;  %v4480_v48 = vadd.f32 %v4139_v17, %v3138_v8  ;;  %v4481_v61 = vadd.f32 %v4138_v31, %v3137_v9 }
 0x24f   : > { %v4753_v28 = vmul.f32 %v10172_v36, %v4479_v33  ;;  %v3222_v10 = vrot.slane %v3208_v2, %v8703_v62  ;;  %v2902_v57 = vadd.f32 %v9055_v29, %v10180_v18  ;;  %v5110_v43 = vrot.slane %v5102_v21, %v8703_v62 }
 0x250   : > { %v3223_v7 = vcombine.high %v3215_v15, %v3215_v15  ;;  %v9395_v53 = vadd.f32 %v4216_v0, %v3215_v15  ;;  %v4482_v41 = vadd.f32 %v4140_v59, %v3139_v11  ;;  %v4754_v22 = vmul.f32 %v8713_v34, %v4480_v48 }
 0x251   : > { %v4755_v44 = vmul.f32 %v8731_v1, %v4481_v61  ;;  %v5442_v27 = vmul.f32 %v4753_v28, %v4479_v33  ;;  %v6351_v49 = vcombine.low %v4479_v33, %v4480_v48  ;;  %v3224_v19 = vcombine.high %v3222_v10, %v3222_v10 }
 0x252   : > { %v9401_v4 = vadd.f32 %v4224_v54, %v3223_v7  ;;  %v9403_v31 = vadd.f32 %v4223_v52, %v3222_v10  ;;  %v4756_v60 = vmul.f32 %v10181_v56, %v4482_v41  ;;  %v5061_v17 = vcombine.low %v4753_v28, %v4754_v22 }
 0x253   : > { %v5443_v0 = vmul.f32 %v4754_v22, %v4480_v48  ;;  %v5444_v9 = vmul.f32 %v4755_v44, %v4481_v61  ;;  %v6352_v8 = vcombine.low %v4481_v61, %v4482_v41  ;;  %v6359_v29 = vrot.slane %v6351_v49, %v8703_v62 }
 0x254   : > { %v9407_v59 = vadd.f32 %v4225_v32, %v3224_v19  ;;  %v9411_v2 = vmul.f32 %v8731_v1, %v9395_v53  ;;  %v5062_v33 = vcombine.low %v4755_v44, %v4756_v60  ;;  %v5069_v54 = vrot.slane %v5061_v17, %v8703_v62 }
 0x255   : > { %v5445_v15 = vmul.f32 %v4756_v60, %v4482_v41  ;;  %v5750_v52 = vcombine.low %v5442_v27, %v5443_v0  ;;  %v6366_v11 = vrot.slane %v6352_v8, %v8703_v62  ;;  %v9417_v48 = vmul.f32 %v10181_v56, %v9401_v4  ;;  %v10182_v8 = vld [vmem:[#allocation2_spill] sm:$0xff] }
 0x256   : > { %v9421_v61 = vmul.f32 %v8718_v5, %v9403_v31  ;;  %v4776_v32 = vmul.f32 %v8725_v42, %v9407_v59  ;;  %v5076_v28 = vrot.slane %v5062_v33, %v8703_v62  ;;  %v9429_v18 = vmul.f32 %v9411_v2, %v9395_v53 }
 0x257   : > { %v5751_v10 = vcombine.low %v5444_v9, %v5445_v15  ;;  %v5758_v7 = vrot.slane %v5750_v52, %v8703_v62  ;;  %v6367_v41 = vcombine.low %v6359_v29, %v6366_v11  ;;  %v5144_v22 = vcombine.low %v9411_v2, %v9417_v48 }
 0x258   : > { %v5160_v44 = vcombine.low %v9421_v61, %v4776_v32  ;;  %v9436_v27 = vmul.f32 %v9417_v48, %v9401_v4  ;;  %v5077_v49 = vcombine.low %v5069_v54, %v5076_v28  ;;  %v9441_v60 = vmul.f32 %v9421_v61, %v9403_v31 }
 0x259   : > { %v5765_v19 = vrot.slane %v5751_v10, %v8703_v62  ;;  %v9444_v17 = vmul.f32 %v4776_v32, %v9407_v59  ;;  %v4490_v0 = vadd.f32 %v4174_v26, %v3173_v16  ;;  %v7051_v9 = vpack.c.bf16 %v6367_v41, %v6367_v41  ;;  %v10183_v41 = vld [vmem:[#allocation26_spill] sm:$0xff] }
 0x25a   : > { %v4175_v29 = vcombine.high %v10182_v8, %v10182_v8  ;;  %v5833_v33 = vcombine.low %v9429_v18, %v9436_v27  ;;  %v5344_v15 = vsel %vm724_vm3, %v5077_v49, 0.0  ;;  %v4182_v52 = vrot.slane %v10182_v8, %v8703_v62 }
 0x25b   : > { %v5766_v54 = vcombine.low %v5758_v7, %v5765_v19  ;;  %v9459_v26 = vsel %vm724_vm3, %v5094_v38, 0.0  ;;  %v5345_v16 = vadd.f32 %v5344_v15, %v9374_v55  ;;  %6771 = vst.msk [vmem:[%s8745_s9 + $0x30] sm:$0xf] %vm6757_vm10, %v7051_v9  ;;  %v3174_v61 = vcombine.high %v2902_v57, %v2902_v57  ;;  %v10184_v19 = vld [vmem:[#allocation6_spill] sm:$0xff] }
 0x25c   : > { %v9468_v32 = vsel %vm724_vm3, %v5783_v37, 0.0  ;;  %v6400_v28 = vrot.slane %v6392_v51, %v8703_v62  ;;  %v3181_v3 = vrot.slane %v2902_v57, %v8703_v62  ;;  %v9475_v38 = vrot.slane %v4175_v29, %v8703_v62  ;;  %v10185_v9 = vld [vmem:[#allocation30_spill] sm:$0xff] }
 0x25d   : > { %v6033_v10 = vsel %vm724_vm3, %v5766_v54, 0.0  ;;  %v9478_v55 = vrot.slane %v3174_v61, %v8703_v62  ;;  %v4764_v7 = vmul.f32 %v8731_v1, %v4490_v0  ;;  %v4190_v14 = vcombine.high %v4182_v52, %v4182_v52 }
 0x25e   : > { %v6034_v30 = vadd.f32 %v6033_v10, %v9380_v12  ;;  %v3189_v37 = vcombine.high %v3181_v3, %v3181_v3  ;;  %v4491_v51 = vadd.f32 %v4182_v52, %v3181_v3  ;;  %v4226_v57 = vcombine.high %v10183_v41, %v10183_v41 }
 0x25f   : > { %v4233_v12 = vrot.slane %v10183_v41, %v8703_v62  ;;  %v9491_v49 = vadd.f32 %v9475_v38, %v9478_v55  ;;  %v2913_v8 = vadd.f32 %v10185_v9, %v10184_v19  ;;  %v5799_v58 = vrot.slane %v5791_v40, %v8703_v62 }
 0x260   : > { %v9499_v35 = vadd.f32 %v4190_v14, %v3189_v37  ;;  %v4765_v21 = vmul.f32 %v10181_v56, %v4491_v51  ;;  %v6393_v29 = vcombine.low %v4490_v0, %v4491_v51  ;;  %v4191_v15 = vcombine.high %v9475_v38, %v9475_v38 }
 0x261   : > { %v9506_v54 = vmul.f32 %v8725_v42, %v9491_v49  ;;  %v5453_v52 = vmul.f32 %v4764_v7, %v4490_v0  ;;  %v3225_v61 = vcombine.high %v2913_v8, %v2913_v8  ;;  %v9514_v3 = vrot.slane %v4226_v57, %v8703_v62 }
 0x262   : > { %v9510_v10 = vmul.f32 %v8718_v5, %v9499_v35  ;;  %v5103_v63 = vcombine.low %v4764_v7, %v4765_v21  ;;  %v5454_v46 = vmul.f32 %v4765_v21, %v4491_v51  ;;  %v6407_v40 = vrot.slane %v6393_v29, %v8703_v62 }
 0x263   : > { %v4241_v14 = vcombine.high %v4233_v12, %v4233_v12  ;;  %v9518_v38 = vmul.f32 %v9506_v54, %v9491_v49  ;;  %v3232_v37 = vrot.slane %v2913_v8, %v8703_v62  ;;  %v9529_v57 = vrot.slane %v5160_v44, %v8703_v62 }
 0x264   : > { %v5117_v0 = vrot.slane %v5103_v63, %v8703_v62  ;;  %v5119_v41 = vcombine.low %v9510_v10, %v9506_v54  ;;  %v9526_v7 = vmul.f32 %v9510_v10, %v9499_v35  ;;  %v5792_v51 = vcombine.low %v5453_v52, %v5454_v46 }
 0x265   : > { %v6408_v19 = vcombine.low %v6400_v28, %v6407_v40  ;;  %v9532_v9 = vrot.slane %v3225_v61, %v8703_v62  ;;  %v3240_v21 = vcombine.high %v3232_v37, %v3232_v37  ;;  %v6450_v8 = vcombine.low %v9403_v31, %v9407_v59  ;;  %v10186_v40 = vld [vmem:[#allocation28_spill] sm:$0xff] }
 0x266   : > { %v5118_v29 = vcombine.low %v5110_v43, %v5117_v0  ;;  %v5806_v54 = vrot.slane %v5792_v51, %v8703_v62  ;;  %v5808_v10 = vcombine.low %v9526_v7, %v9518_v38  ;;  %v6434_v52 = vcombine.low %v9395_v53, %v9401_v4 }
 0x267   : > { %v7054_v44 = vpack.c.bf16 %v6408_v19, %v6408_v19  ;;  %v4503_v63 = vadd.f32 %v4233_v12, %v3232_v37  ;;  %v4504_v28 = vadd.f32 %v4241_v14, %v3240_v21  ;;  %v4192_v11 = vcombine.high %v10186_v40, %v10186_v40 }
 0x268   : > { %v5346_v61 = vsel %vm724_vm3, %v5118_v29, 0.0  ;;  %v5807_v46 = vcombine.low %v5799_v58, %v5806_v54  ;;  %v9546_v31 = vadd.f32 %v9514_v3, %v9532_v9  ;;  %v3190_v59 = vcombine.high %v9478_v55, %v9478_v55 }
 0x269   : > { %v9550_v43 = vadd.f32 %v5346_v61, %v5345_v16  ;;  %6774 = vst.msk [vmem:[%s8745_s9 + $0x3c] sm:$0xf] %vm6757_vm10, %v7054_v44  ;;  %v4777_v53 = vmul.f32 %v8735_v13, %v4503_v63  ;;  %v4778_v4 = vmul.f32 %v8740_v20, %v4504_v28  ;;  %v6458_v12 = vrot.slane %v6450_v8, %v8703_v62 }
 0x26a   : > { %v6035_v58 = vsel %vm724_vm3, %v5807_v46, 0.0  ;;  %v6451_v14 = vcombine.low %v4503_v63, %v4504_v28  ;;  %v6473_v38 = vrot.slane %v9546_v31, %v8703_v62  ;;  %v4199_v7 = vrot.slane %v10186_v40, %v8703_v62 }
 0x26b   : > { %v9560_v37 = vadd.f32 %v6035_v58, %v6034_v30  ;;  %v5161_v55 = vcombine.low %v4777_v53, %v4778_v4  ;;  %v5466_v16 = vmul.f32 %v4777_v53, %v4503_v63  ;;  %v5467_v0 = vmul.f32 %v4778_v4, %v4504_v28 }
 0x26c   : > { %v4206_v51 = vrot.slane %v4192_v11, %v8703_v62  ;;  %v6465_v19 = vrot.slane %v6451_v14, %v8703_v62  ;;  %v7059_v21 = vpack.c.bf16 %v6473_v38, %v6473_v38  ;;  %v4494_v8 = vadd.f32 %v4191_v15, %v3190_v59 }
 0x26d   : > { %v6409_v29 = vcombine.low %v9499_v35, %v9491_v49  ;;  %v9569_v54 = vrot.slane %v5161_v55, %v8703_v62  ;;  %v5850_v30 = vcombine.low %v5466_v16, %v5467_v0  ;;  %v9575_v44 = vrot.slane %v5144_v22, %v8703_v62  ;;  %v10187_v49 = vld [vmem:[#allocation5_spill] sm:$0xff]  ;;  %v10188_v35 = vld [vmem:[#allocation32_spill] sm:$0xff] }
 0x26e   : > { %v9581_v11 = vrot.slane %v5833_v33, %v8703_v62  ;;  %v6466_v15 = vcombine.low %v6458_v12, %v6465_v19  ;;  %6779 = vst.msk [vmem:[%s8745_s9 + $0x50] sm:$0x1] %vm6760_vm7, %v7059_v21  ;;  %v2905_v63 = vadd.f32 %v10188_v35, %v10187_v49  ;;  %v10189_v28 = vcombine.low %v9441_v60, %v9444_v17  ;;  %v10191_v35 = vld [vmem:[#allocation22_spill] sm:$0xff] }
 0x26f   : > { %v6448_v48 = vrot.slane %v6434_v52, %v8703_v62  ;;  %v5176_v18 = vcombine.low %v9529_v57, %v9569_v54  ;;  %v9597_v22 = vrot.slane %v5850_v30, %v8703_v62  ;;  %v4207_v27 = vcombine.high %v4199_v7, %v4199_v7 }
 0x270   : > { %v9591_v2 = vrot.slane %v10189_v28, %v8703_v62  ;;  %v7058_v33 = vpack.c.bf16 %v6466_v15, %v6466_v15  ;;  %v3191_v61 = vcombine.high %v2905_v63, %v2905_v63  ;;  %v3198_v46 = vrot.slane %v2905_v63, %v8703_v62  ;;  %v10192_v63 = vld [vmem:[#allocation34_spill] sm:$0xff] }
 0x271   : > { %v6417_v40 = vrot.slane %v6409_v29, %v8703_v62  ;;  %v4208_v59 = vcombine.high %v4206_v51, %v4206_v51  ;;  %v4768_v17 = vmul.f32 %v8735_v13, %v4494_v8  ;;  %v5364_v12 = vadd.f32 %v9459_v26, %v9309_v50 }
 0x272   : > { %v5865_v60 = vcombine.low %v9591_v2, %v9597_v22  ;;  %6778 = vst.msk [vmem:[%s8745_s9 + $0x4c] sm:$0xf] %vm6757_vm10, %v7058_v33  ;;  %v3205_v52 = vrot.slane %v3191_v61, %v8703_v62  ;;  %v3206_v53 = vcombine.high %v3198_v46, %v3198_v46  ;;  %v4495_v4 = vadd.f32 %v4199_v7, %v3198_v46  ;;  %v10190_v7 = vld [vmem:[#allocation29_spill] sm:$0xff] }
 0x273   : > { %v5127_v58 = vrot.slane %v5119_v41, %v8703_v62  ;;  %v5816_v14 = vrot.slane %v5808_v10, %v8703_v62  ;;  %v9613_v38 = vmul.f32 %v8753_v23, %v9546_v31  ;;  %v6053_v55 = vadd.f32 %v9468_v32, %v9323_v6 }
 0x274   : > { %v3207_v16 = vcombine.high %v3205_v52, %v3205_v52  ;;  %v4496_v0 = vadd.f32 %v4207_v27, %v3206_v53  ;;  %v4497_v19 = vadd.f32 %v4206_v51, %v3205_v52  ;;  %v4769_v21 = vmul.f32 %v8740_v20, %v4495_v4 }
 0x275   : > { %v4277_v29 = vcombine.high %v10190_v7, %v10190_v7  ;;  %v9622_v50 = vrot.slane %v10190_v7, %v8703_v62  ;;  %v5457_v26 = vmul.f32 %v4768_v17, %v4494_v8  ;;  %v6410_v41 = vcombine.low %v4494_v8, %v4495_v4 }
 0x276   : > { %v4498_v10 = vadd.f32 %v4208_v59, %v3207_v16  ;;  %v4770_v30 = vmul.f32 %v8753_v23, %v4496_v0  ;;  %v4771_v15 = vmul.f32 %v10172_v36, %v4497_v19  ;;  %v5120_v6 = vcombine.low %v4768_v17, %v4769_v21 }
 0x277   : > { %v5458_v32 = vmul.f32 %v4769_v21, %v4495_v4  ;;  %v6424_v51 = vrot.slane %v6410_v41, %v8703_v62  ;;  %v6432_v49 = vrot.slane %v4496_v0, %v8703_v62  ;;  %v2926_v28 = vadd.f32 %v10192_v63, %v10191_v35 }
 0x278   : > { %v4772_v27 = vmul.f32 %v8713_v34, %v4498_v10  ;;  %v5134_v33 = vrot.slane %v5120_v6, %v8703_v62  ;;  %v5142_v8 = vrot.slane %v4770_v30, %v8703_v62  ;;  %v5459_v61 = vmul.f32 %v4770_v30, %v4496_v0 }
 0x279   : > { %v5460_v46 = vmul.f32 %v4771_v15, %v4497_v19  ;;  %v5809_v59 = vcombine.low %v5457_v26, %v5458_v32  ;;  %v6425_v52 = vcombine.low %v6417_v40, %v6424_v51  ;;  %v6433_v53 = vcombine.low %v4497_v19, %v4498_v10 }
 0x27a   : > { %v5135_v17 = vcombine.low %v5127_v58, %v5134_v33  ;;  %v5143_v4 = vcombine.low %v4771_v15, %v4772_v27  ;;  %v5385_v16 = vsel %vm5375_vm9, %v5142_v8, 0.0  ;;  %v5461_v21 = vmul.f32 %v4772_v27, %v4498_v10 }
 0x27b   : > { %v9635_v7 = vadd.f32 %v5385_v16, %v9355_v24  ;;  %v5823_v41 = vrot.slane %v5809_v59, %v8703_v62  ;;  %v5831_v6 = vrot.slane %v5459_v61, %v8703_v62  ;;  %v6441_v35 = vrot.slane %v6433_v53, %v8703_v62  ;;  %v10193_v61 = vld [vmem:[#allocation4_spill] sm:$0xff]  ;;  %v10195_v53 = vld [vmem:[#allocation31_spill] sm:$0xff] }
 0x27c   : > { %v5151_v0 = vrot.slane %v5143_v4, %v8703_v62  ;;  %v5365_v40 = vsel %vm724_vm3, %v5135_v17, 0.0  ;;  %v5832_v19 = vcombine.low %v5460_v46, %v5461_v21  ;;  %v7055_v58 = vpack.c.bf16 %v6425_v52, %v6425_v52  ;;  %v10194_v46 = vld [vmem:[#allocation36_spill] sm:$0xff] }
 0x27d   : > { %v9642_v26 = vadd.f32 %v5365_v40, %v5364_v12  ;;  %v5824_v10 = vcombine.low %v5816_v14, %v5823_v41  ;;  %v6073_v24 = vsel %vm5375_vm9, %v5831_v6, 0.0  ;;  %v6449_v30 = vcombine.low %v6441_v35, %v6448_v48 }
 0x27e   : > { %v5159_v15 = vcombine.low %v5151_v0, %v9575_v44  ;;  %v5840_v32 = vrot.slane %v5832_v19, %v8703_v62  ;;  %v9648_v51 = vadd.f32 %v6073_v24, %v9367_v25  ;;  %v7056_v63 = vpack.c.bf16 %v6432_v49, %v6432_v49  ;;  %6775 = vst.msk [vmem:[%s8745_s9 + $0x40] sm:$0xf] %vm6757_vm10, %v7055_v58 }
 0x27f   : > { %v4291_v27 = vrot.slane %v4277_v29, %v8703_v62  ;;  %v6054_v12 = vsel %vm724_vm3, %v5824_v10, 0.0  ;;  %v7057_v33 = vpack.c.bf16 %v6449_v30, %v6449_v30  ;;  %v3276_v14 = vcombine.high %v2926_v28, %v2926_v28 }
 0x280   : > { %v5848_v8 = vcombine.low %v5840_v32, %v9581_v11  ;;  %v9655_v48 = vadd.f32 %v6054_v12, %v6053_v55  ;;  %6776 = vst.msk [vmem:[%s8745_s9 + $0x44] sm:$0x1] %vm6760_vm7, %v7056_v63  ;;  %v3283_v44 = vrot.slane %v2926_v28, %v8703_v62  ;;  %v4242_v25 = vcombine.high %v9514_v3, %v9514_v3 }
 0x281   : > { %v3241_v49 = vcombine.high %v9532_v9, %v9532_v9  ;;  %6777 = vst.msk [vmem:[%s8745_s9 + $0x48] sm:$0xf] %vm6757_vm10, %v7057_v33  ;;  %v3290_v29 = vrot.slane %v3276_v14, %v8703_v62  ;;  %v2918_v59 = vadd.f32 %v10194_v46, %v10193_v61  ;;  %v5183_v11 = vrot.slane %v9613_v38, %v8703_v62 }
 0x282   : > { %v4292_v55 = vcombine.high %v9622_v50, %v9622_v50  ;;  %v5348_v28 = vsel %vm724_vm3, %v5159_v15, 0.0  ;;  %v3291_v52 = vcombine.high %v3283_v44, %v3283_v44  ;;  %v4293_v3 = vcombine.high %v4291_v27, %v4291_v27  ;;  %v10196_v15 = vld [vmem:[#allocation33_spill] sm:$0xff] }
 0x283   : > { %v4243_v9 = vcombine.high %v10195_v53, %v10195_v53  ;;  %v4250_v17 = vrot.slane %v10195_v53, %v8703_v62  ;;  %v3292_v4 = vcombine.high %v3290_v29, %v3290_v29  ;;  %v4515_v16 = vadd.f32 %v9622_v50, %v3283_v44 }
 0x284   : > { %v4516_v21 = vadd.f32 %v4292_v55, %v3291_v52  ;;  %v3242_v41 = vcombine.high %v2918_v59, %v2918_v59  ;;  %v3249_v6 = vrot.slane %v2918_v59, %v8703_v62  ;;  %v9682_v35 = vmul.f32 %v9613_v38, %v9546_v31 }
 0x285   : > { %v4517_v0 = vadd.f32 %v4291_v27, %v3290_v29  ;;  %v4518_v40 = vadd.f32 %v4293_v3, %v3292_v4  ;;  %v9685_v19 = vadd.f32 %v5348_v28, %v9550_v43  ;;  %v4506_v50 = vadd.f32 %v4242_v25, %v3241_v49 }
 0x286   : > { %v4790_v58 = vmul.f32 %v8713_v34, %v4516_v21  ;;  %v6515_v10 = vcombine.low %v4515_v16, %v4516_v21  ;;  %v9689_v24 = vrot.slane %v3242_v41, %v8703_v62  ;;  %v4294_v32 = vcombine.high %v10196_v15, %v10196_v15 }
 0x287   : > { %v6516_v30 = vcombine.low %v4517_v0, %v4518_v40  ;;  %v3257_v63 = vcombine.high %v3249_v6, %v3249_v6  ;;  %v9694_v31 = vsel %vm5375_vm9, %v5183_v11, 0.0  ;;  %v9697_v38 = vrot.slane %v4243_v9, %v8703_v62 }
 0x288   : > { %v4258_v43 = vcombine.high %v4250_v17, %v4250_v17  ;;  %v4789_v27 = vmul.f32 %v10172_v36, %v4515_v16  ;;  %v5872_v12 = vrot.slane %v9682_v35, %v8703_v62  ;;  %v4792_v33 = vmul.f32 %v10181_v56, %v4518_v40 }
 0x289   : > { %v6523_v14 = vrot.slane %v6515_v10, %v8703_v62  ;;  %v6530_v44 = vrot.slane %v6516_v30, %v8703_v62  ;;  %v5479_v25 = vmul.f32 %v4790_v58, %v4516_v21  ;;  %v4507_v49 = vadd.f32 %v4250_v17, %v3249_v6 }
 0x28a   : > { %v4508_v29 = vadd.f32 %v4258_v43, %v3257_v63  ;;  %v4509_v61 = vadd.f32 %v9697_v38, %v9689_v24  ;;  %v4791_v46 = vmul.f32 %v8731_v1, %v4517_v0  ;;  %v9710_v11 = vrot.slane %v10196_v15, %v8703_v62 }
 0x28b   : > { %v6531_v59 = vcombine.low %v6523_v14, %v6530_v44  ;;  %v9713_v55 = vrot.slane %v4294_v32, %v8703_v62  ;;  %v6037_v28 = vsel %vm724_vm3, %v5848_v8, 0.0  ;;  %v5478_v52 = vmul.f32 %v4789_v27, %v4515_v16  ;;  %v10198_v14 = vld [vmem:[#allocation38_spill] sm:$0xff] }
 0x28c   : > { %v4782_v3 = vmul.f32 %v8731_v1, %v4508_v29  ;;  %v4783_v53 = vmul.f32 %v10181_v56, %v4509_v61  ;;  %v5367_v9 = vsel %vm724_vm3, %v5176_v18, 0.0  ;;  %v4259_v17 = vcombine.high %v9697_v38, %v9697_v38 }
 0x28d   : > { %v5226_v4 = vcombine.low %v4791_v46, %v4792_v33  ;;  %v7063_v21 = vpack.c.bf16 %v6531_v59, %v6531_v59  ;;  %v5225_v41 = vcombine.low %v4789_v27, %v4790_v58  ;;  %v5481_v6 = vmul.f32 %v4792_v33, %v4518_v40  ;;  %v10197_v33 = vld [vmem:[#allocation3_spill] sm:$0xff] }
 0x28e   : > { %v5914_v10 = vcombine.low %v5478_v52, %v5479_v25  ;;  %v4781_v8 = vmul.f32 %v8713_v34, %v4507_v49  ;;  %v4309_v1 = vcombine.high %v9710_v11, %v9710_v11  ;;  %v4310_v56 = vcombine.high %v9713_v55, %v9713_v55  ;;  %v10199_v59 = vld [vmem:[#allocation35_spill] sm:$0xff] }
 0x28f   : > { %6783 = vst.msk [vmem:[%s8745_s9 + $0x60] sm:$0xf] %vm6757_vm10, %v7063_v21  ;;  %v4780_v57 = vmul.f32 %v10172_v36, %v4506_v50  ;;  %v9733_v54 = vadd.f32 %v6037_v28, %v9560_v37  ;;  %v5480_v18 = vmul.f32 %v4791_v46, %v4517_v0  ;;  %v5471_v16 = vmul.f32 %v4782_v3, %v4508_v29 }
 0x290   : > { %v5472_v58 = vmul.f32 %v4783_v53, %v4509_v61  ;;  %v6474_v40 = vcombine.low %v4506_v50, %v4507_v49  ;;  %v5240_v30 = vrot.slane %v5226_v4, %v8703_v62  ;;  %v3258_v34 = vcombine.high %v9689_v24, %v9689_v24 }
 0x291   : > { %v5185_v15 = vcombine.low %v4782_v3, %v4783_v53  ;;  %v6475_v32 = vcombine.low %v4508_v29, %v4509_v61  ;;  %v5233_v63 = vrot.slane %v5225_v41, %v8703_v62  ;;  %v5915_v38 = vcombine.low %v5480_v18, %v5481_v6  ;;  %v10200_v29 = vld [vmem:[#allocation12_spill] sm:$0xff] }
 0x292   : > { %v5922_v43 = vrot.slane %v5914_v10, %v8703_v62  ;;  %v5470_v36 = vmul.f32 %v4781_v8, %v4507_v49  ;;  %v5184_v27 = vcombine.low %v4780_v57, %v4781_v8  ;;  %v6482_v37 = vrot.slane %v6474_v40, %v8703_v62 }
 0x293   : > { %v6489_v0 = vrot.slane %v6475_v32, %v8703_v62  ;;  %v2929_v44 = vadd.f32 %v10198_v14, %v10197_v33  ;;  %v5469_v25 = vmul.f32 %v4780_v57, %v4506_v50  ;;  %v5874_v46 = vcombine.low %v5471_v16, %v5472_v58 }
 0x294   : > { %v4260_v24 = vcombine.high %v10199_v59, %v10199_v59  ;;  %v2921_v61 = vadd.f32 %v9193_v39, %v10200_v29  ;;  %v5241_v28 = vcombine.low %v5233_v63, %v5240_v30  ;;  %v5199_v49 = vrot.slane %v5185_v15, %v8703_v62 }
 0x295   : > { %v6490_v52 = vcombine.low %v6482_v37, %v6489_v0  ;;  %v4267_v3 = vrot.slane %v10199_v59, %v8703_v62  ;;  %v5873_v53 = vcombine.low %v5469_v25, %v5470_v36  ;;  %v3293_v4 = vcombine.high %v2929_v44, %v2929_v44 }
 0x296   : > { %v3300_v21 = vrot.slane %v2929_v44, %v8703_v62  ;;  %v3259_v50 = vcombine.high %v2921_v61, %v2921_v61  ;;  %v5929_v41 = vrot.slane %v5915_v38, %v8703_v62  ;;  %v5192_v6 = vrot.slane %v5184_v27, %v8703_v62 }
 0x297   : > { %v7060_v10 = vpack.c.bf16 %v6490_v52, %v6490_v52  ;;  %v3266_v39 = vrot.slane %v2921_v61, %v8703_v62  ;;  %v5888_v8 = vrot.slane %v5874_v46, %v8703_v62  ;;  %v4274_v57 = vrot.slane %v4260_v24, %v8703_v62 }
 0x298   : > { %v3307_v18 = vrot.slane %v3293_v4, %v8703_v62  ;;  %v3308_v16 = vcombine.high %v3300_v21, %v3300_v21  ;;  %v4275_v58 = vcombine.high %v4267_v3, %v4267_v3  ;;  %v3273_v40 = vrot.slane %v3259_v50, %v8703_v62 }
 0x299   : > { %6780 = vst.msk [vmem:[%s8745_s9 + $0x54] sm:$0xf] %vm6757_vm10, %v7060_v10  ;;  %v3274_v30 = vcombine.high %v3266_v39, %v3266_v39  ;;  %v9762_v15 = vadd.f32 %v5367_v9, %v9642_v26  ;;  %v5200_v32 = vcombine.low %v5192_v6, %v5199_v49  ;;  %v5881_v63 = vrot.slane %v5873_v53, %v8703_v62 }
 0x29a   : > { %v3309_v38 = vcombine.high %v3307_v18, %v3307_v18  ;;  %v4520_v36 = vadd.f32 %v4309_v1, %v3308_v16  ;;  %v5930_v27 = vcombine.low %v5922_v43, %v5929_v41  ;;  %v4519_v37 = vadd.f32 %v9710_v11, %v3300_v21 }
 0x29b   : > { %v4512_v0 = vadd.f32 %v4275_v58, %v3274_v30  ;;  %v4513_v33 = vadd.f32 %v4274_v57, %v3273_v40  ;;  %v4510_v14 = vadd.f32 %v4259_v17, %v3258_v34  ;;  %v5889_v44 = vcombine.low %v5881_v63, %v5888_v8  ;;  %v10201_v17 = vld [vmem:[#allocation37_spill] sm:$0xff] }
 0x29c   : > { %v4522_v25 = vadd.f32 %v4310_v56, %v3309_v38  ;;  %v4511_v46 = vadd.f32 %v4267_v3, %v3266_v39  ;;  %v6056_v26 = vsel %vm724_vm3, %v5865_v60, 0.0  ;;  %v9774_v9 = vsel %vm5375_vm9, %v5872_v12, 0.0 }
 0x29d   : > { %v4521_v1 = vadd.f32 %v9713_v55, %v3307_v18  ;;  %v6532_v11 = vcombine.low %v4519_v37, %v4520_v36  ;;  %v5350_v43 = vsel %vm724_vm3, %v5200_v32, 0.0  ;;  %v9780_v56 = vrot.slane %v10201_v17, %v8703_v62 }
 0x29e   : > { %v4786_v34 = vmul.f32 %v8735_v13, %v4512_v0  ;;  %v4787_v2 = vmul.f32 %v8740_v20, %v4513_v33  ;;  %v9785_v22 = vsel %vm724_vm3, %v5241_v28, 0.0  ;;  %v9788_v60 = vsel %vm724_vm3, %v5930_v27, 0.0 }
 0x29f   : > { %v6533_v35 = vcombine.low %v4521_v1, %v4522_v25  ;;  %v3275_v12 = vcombine.high %v3273_v40, %v3273_v40  ;;  %v6039_v55 = vsel %vm724_vm3, %v5889_v44, 0.0  ;;  %v4794_v59 = vmul.f32 %v8725_v42, %v4520_v36 }
 0x2a0   : > { %v4784_v24 = vmul.f32 %v8718_v5, %v4510_v14  ;;  %v4785_v29 = vmul.f32 %v8725_v42, %v4511_v46  ;;  %v9795_v61 = vadd.f32 %v5350_v43, %v9685_v19  ;;  %v4276_v49 = vcombine.high %v4274_v57, %v4274_v57 }
 0x2a1   : > { %v6540_v28 = vrot.slane %v6532_v11, %v8703_v62  ;;  %v6547_v52 = vrot.slane %v6533_v35, %v8703_v62  ;;  %v4793_v3 = vmul.f32 %v8718_v5, %v4519_v37  ;;  %v4795_v53 = vmul.f32 %v8735_v13, %v4521_v1  ;;  %v10204_v35 = vld [vmem:[#allocation8_spill] sm:$0xff] }
 0x2a2   : > { %v4352_v4 = vcombine.high %v9780_v56, %v9780_v56  ;;  %v5202_v21 = vcombine.low %v4786_v34, %v4787_v2  ;;  %v9804_v50 = vadd.f32 %v6039_v55, %v9733_v54  ;;  %v4514_v19 = vadd.f32 %v4276_v49, %v3275_v12 }
 0x2a3   : > { %v6548_v42 = vcombine.low %v6540_v28, %v6547_v52  ;;  %v5475_v41 = vmul.f32 %v4786_v34, %v4512_v0  ;;  %v4796_v6 = vmul.f32 %v8740_v20, %v4522_v25  ;;  %v5242_v10 = vcombine.low %v4793_v3, %v4794_v59  ;;  %v10202_v34 = vld [vmem:[#allocation11_spill] sm:$0xff] }
 0x2a4   : > { %v5201_v39 = vcombine.low %v4784_v24, %v4785_v29  ;;  %v5476_v8 = vmul.f32 %v4787_v2, %v4513_v33  ;;  %v5473_v5 = vmul.f32 %v4784_v24, %v4510_v14  ;;  %v5474_v18 = vmul.f32 %v4785_v29, %v4511_v46 }
 0x2a5   : > { %v7064_v57 = vpack.c.bf16 %v6548_v42, %v6548_v42  ;;  %v9808_v13 = vadd.f32 %v6056_v26, %v9655_v48  ;;  %v5482_v16 = vmul.f32 %v4793_v3, %v4519_v37  ;;  %v5483_v58 = vmul.f32 %v4794_v59, %v4520_v36 }
 0x2a6   : > { %v5484_v40 = vmul.f32 %v4795_v53, %v4521_v1  ;;  %v5216_v54 = vrot.slane %v5202_v21, %v8703_v62  ;;  %v9814_v30 = vmul.f32 %v8753_v23, %v4514_v19  ;;  %v5891_v20 = vcombine.low %v5475_v41, %v5476_v8 }
 0x2a7   : > { %6784 = vst.msk [vmem:[%s8745_s9 + $0x64] sm:$0xf] %vm6757_vm10, %v7064_v57  ;;  %v6491_v32 = vcombine.low %v4510_v14, %v4511_v46  ;;  %v6492_v63 = vcombine.low %v4512_v0, %v4513_v33  ;;  %v5243_v38 = vcombine.low %v4795_v53, %v4796_v6  ;;  %v5250_v27 = vrot.slane %v5242_v10, %v8703_v62  ;;  %v10203_v46 = vld [vmem:[#allocation39_spill] sm:$0xff] }
 0x2a8   : > { %v5209_v48 = vrot.slane %v5201_v39, %v8703_v62  ;;  %v6514_v37 = vrot.slane %v4514_v19, %v8703_v62  ;;  %v5485_v36 = vmul.f32 %v4796_v6, %v4522_v25  ;;  %v5890_v44 = vcombine.low %v5473_v5, %v5474_v18 }
 0x2a9   : > { %v6499_v26 = vrot.slane %v6491_v32, %v8703_v62  ;;  %v6506_v1 = vrot.slane %v6492_v63, %v8703_v62  ;;  %v5931_v11 = vcombine.low %v5482_v16, %v5483_v58  ;;  %v2942_v0 = vadd.f32 %v9212_v45, %v10202_v34  ;;  %v10205_v32 = vld [vmem:[#allocation9_spill] sm:$0xff] }
 0x2aa   : > { %v5217_v43 = vcombine.low %v5209_v48, %v5216_v54  ;;  %v7062_v17 = vpack.c.bf16 %v6514_v37, %v6514_v37  ;;  %v5905_v33 = vrot.slane %v5891_v20, %v8703_v62  ;;  %v4311_v2 = vcombine.high %v10203_v46, %v10203_v46  ;;  %v3937_v20 = vpop.f32.mrf.mxu0  ;;  %v10207_v34 = vld [vmem:[#allocation17_spill] sm:$0xff] }
 0x2ab   : > { %v6507_v14 = vcombine.low %v6499_v26, %v6506_v1  ;;  %v2934_v25 = vadd.f32 %v9230_v47, %v10204_v35  ;;  %v5257_v12 = vrot.slane %v5243_v38, %v8703_v62  ;;  %v4318_v55 = vrot.slane %v10203_v46, %v8703_v62 }
 0x2ac   : > { %6782 = vst.msk [vmem:[%s8745_s9 + $0x5c] sm:$0x1] %vm6760_vm7, %v7062_v17  ;;  %v3350_v59 = vrot.slane %v2942_v0, %v8703_v62  ;;  %v5388_v45 = vadd.f32 %v9694_v31, %v9635_v7  ;;  %v5932_v24 = vcombine.low %v5484_v40, %v5485_v36  ;;  %v5898_v29 = vrot.slane %v5890_v44, %v8703_v62  ;;  %v10206_v44 = vld [vmem:[#allocation14_spill] sm:$0xff] }
 0x2ad   : > { %v7061_v49 = vpack.c.bf16 %v6507_v14, %v6507_v14  ;;  %v3310_v28 = vcombine.high %v2934_v25, %v2934_v25  ;;  %v5369_v52 = vsel %vm724_vm3, %v5217_v43, 0.0  ;;  %v5477_v47 = vmul.f32 %v9814_v30, %v4514_v19  ;;  %v2936_v43 = vpop.f32.mrf.mxu1 }
 0x2ae   : > { %v3351_v3 = vcombine.high %v3350_v59, %v3350_v59  ;;  %v3317_v53 = vrot.slane %v2934_v25, %v8703_v62  ;;  %v5906_v21 = vcombine.low %v5898_v29, %v5905_v33  ;;  %v4325_v42 = vrot.slane %v4311_v2, %v8703_v62 }
 0x2af   : > { %6781 = vst.msk [vmem:[%s8745_s9 + $0x58] sm:$0xf] %vm6757_vm10, %v7061_v49  ;;  %v3324_v41 = vrot.slane %v3310_v28, %v8703_v62  ;;  %v6076_v7 = vadd.f32 %v9774_v9, %v9648_v51  ;;  %v4326_v31 = vcombine.high %v4318_v55, %v4318_v55  ;;  %v5258_v8 = vcombine.low %v5250_v27, %v5257_v12 }
 0x2b0   : > { %v4532_v6 = vadd.f32 %v4352_v4, %v3351_v3  ;;  %v3325_v10 = vcombine.high %v3317_v53, %v3317_v53  ;;  %v4523_v39 = vadd.f32 %v4318_v55, %v3317_v53  ;;  %v9847_v19 = vrot.slane %v5931_v11, %v8703_v62  ;;  %v10208_v55 = vld [vmem:[#allocation7_spill] sm:$0xff] }
 0x2b1   : > { %v9850_v57 = vrot.slane %v5932_v24, %v8703_v62  ;;  %v5224_v5 = vrot.slane %v9814_v30, %v8703_v62  ;;  %v5913_v18 = vrot.slane %v5477_v47, %v8703_v62  ;;  %v4525_v9 = vadd.f32 %v4325_v42, %v3324_v41 }
 0x2b2   : > { %v6596_v16 = vrot.slane %v4532_v6, %v8703_v62  ;;  %v4524_v51 = vadd.f32 %v4326_v31, %v3325_v10  ;;  %v5370_v4 = vadd.f32 %v5369_v52, %v9762_v15  ;;  %v6058_v58 = vsel %vm724_vm3, %v5906_v21, 0.0 }
 0x2b3   : > { %v9859_v40 = vadd.f32 %v9780_v56, %v3350_v59  ;;  %v6555_v54 = vrot.slane %v4523_v39, %v8703_v62  ;;  %v9863_v63 = vmul.f32 %v10205_v32, %v4532_v6  ;;  %v3326_v38 = vcombine.high %v3324_v41, %v3324_v41  ;;  %v10209_v41 = vld [vmem:[#allocation16_spill] sm:$0xff] }
 0x2b4   : > { %v7068_v30 = vpack.c.bf16 %v6596_v16, %v6596_v16  ;;  %v4797_v27 = vmul.f32 %v8753_v23, %v4523_v39  ;;  %v5371_v48 = vsel %vm724_vm3, %v5258_v8, 0.0  ;;  %v5947_v15 = vcombine.low %v9847_v19, %v9850_v57 }
 0x2b5   : > { %v4327_v37 = vcombine.high %v4325_v42, %v4325_v42  ;;  %v5389_v36 = vsel %vm5375_vm9, %v5224_v5, 0.0  ;;  %v4798_v56 = vmul.f32 %v10205_v32, %v4524_v51  ;;  %v4799_v26 = vmul.f32 %v10206_v44, %v4525_v9 }
 0x2b6   : > { %6788 = vst.msk [vmem:[%s8745_s9 + $0x74] sm:$0x1] %vm6760_vm7, %v7068_v30  ;;  %v6077_v1 = vsel %vm5375_vm9, %v5913_v18, 0.0  ;;  %v4328_v11 = vcombine.high %v3937_v20, %v3937_v20  ;;  %v9875_v23 = vadd.f32 %v5371_v48, %v5370_v4  ;;  %v9878_v17 = vadd.f32 %v6058_v58, %v9808_v13 }
 0x2b7   : > { %v9882_v0 = vmul.f32 %v10207_v34, %v9859_v40  ;;  %v7065_v33 = vpack.c.bf16 %v6555_v54, %v6555_v54  ;;  %v9885_v14 = vmul.f32 %v9863_v63, %v4532_v6  ;;  %v4526_v46 = vadd.f32 %v4327_v37, %v3326_v38 }
 0x2b8   : > { %v5265_v2 = vrot.slane %v4797_v27, %v8703_v62  ;;  %v5390_v35 = vadd.f32 %v5389_v36, %v5388_v45  ;;  %v5486_v25 = vmul.f32 %v4797_v27, %v4523_v39  ;;  %v9888_v12 = vadd.f32 %v6077_v1, %v6076_v7 }
 0x2b9   : > { %6785 = vst.msk [vmem:[%s8745_s9 + $0x68] sm:$0x1] %vm6760_vm7, %v7065_v33  ;;  %v4335_v13 = vrot.slane %v3937_v20, %v8703_v62  ;;  %v2937_v59 = vadd.f32 %v2936_v43, %v10208_v55  ;;  %v5487_v24 = vmul.f32 %v4798_v56, %v4524_v51  ;;  %v5488_v29 = vmul.f32 %v4799_v26, %v4525_v9 }
 0x2ba   : > { %v6556_v49 = vcombine.low %v4524_v51, %v4525_v9  ;;  %v4342_v28 = vrot.slane %v4328_v11, %v8703_v62  ;;  %v5306_v52 = vrot.slane %v9863_v63, %v8703_v62  ;;  %v5494_v45 = vmul.f32 %v9882_v0, %v9859_v40 }
 0x2bb   : > { %v3327_v47 = vcombine.high %v2937_v59, %v2937_v59  ;;  %v3334_v3 = vrot.slane %v2937_v59, %v8703_v62  ;;  %v5995_v53 = vrot.slane %v9885_v14, %v8703_v62  ;;  %v5266_v21 = vcombine.low %v4798_v56, %v4799_v26 }
 0x2bc   : > { %v5391_v42 = vsel %vm5375_vm9, %v5265_v2, 0.0  ;;  %v4800_v7 = vmul.f32 %v10209_v41, %v4526_v46  ;;  %v4343_v31 = vcombine.high %v4335_v13, %v4335_v13  ;;  %v5954_v8 = vrot.slane %v5486_v25, %v8703_v62 }
 0x2bd   : > { %v3341_v6 = vrot.slane %v3327_v47, %v8703_v62  ;;  %v3342_v10 = vcombine.high %v3334_v3, %v3334_v3  ;;  %v4527_v39 = vadd.f32 %v4335_v13, %v3334_v3  ;;  %v5955_v5 = vcombine.low %v5487_v24, %v5488_v29 }
 0x2be   : > { %v6564_v18 = vrot.slane %v6556_v49, %v8703_v62  ;;  %v4344_v16 = vcombine.high %v4342_v28, %v4342_v28  ;;  %v5274_v54 = vrot.slane %v5266_v21, %v8703_v62  ;;  %v5392_v20 = vadd.f32 %v5391_v42, %v5390_v35 }
 0x2bf   : > { %v3343_v51 = vcombine.high %v3341_v6, %v3341_v6  ;;  %v4528_v9 = vadd.f32 %v4343_v31, %v3342_v10  ;;  %v4529_v4 = vadd.f32 %v4342_v28, %v3341_v6  ;;  %v4801_v58 = vmul.f32 %v10207_v34, %v4527_v39 }
 0x2c0   : > { %v5489_v30 = vmul.f32 %v4800_v7, %v4526_v46  ;;  %v6557_v38 = vcombine.low %v4526_v46, %v4527_v39  ;;  %v5963_v56 = vrot.slane %v5955_v5, %v8703_v62  ;;  %v6079_v42 = vsel %vm5375_vm9, %v5954_v8, 0.0 }
 0x2c1   : > { %v4530_v27 = vadd.f32 %v4344_v16, %v3343_v51  ;;  %v4802_v48 = vmul.f32 %v10205_v32, %v4528_v9  ;;  %v4803_v37 = vmul.f32 %v10206_v44, %v4529_v4  ;;  %v5267_v36 = vcombine.low %v4800_v7, %v4801_v58 }
 0x2c2   : > { %v5490_v26 = vmul.f32 %v4801_v58, %v4527_v39  ;;  %v6571_v1 = vrot.slane %v6557_v38, %v8703_v62  ;;  %v6573_v11 = vcombine.low %v4528_v9, %v4529_v4  ;;  %v6080_v31 = vadd.f32 %v6079_v42, %v9888_v12 }
 0x2c3   : > { %v4804_v43 = vmul.f32 %v10209_v41, %v4530_v27  ;;  %v5281_v34 = vrot.slane %v5267_v36, %v8703_v62  ;;  %v5283_v33 = vcombine.low %v4802_v48, %v4803_v37  ;;  %v5491_v2 = vmul.f32 %v4802_v48, %v4528_v9 }
 0x2c4   : > { %v5492_v35 = vmul.f32 %v4803_v37, %v4529_v4  ;;  %v5956_v46 = vcombine.low %v5489_v30, %v5490_v26  ;;  %v6572_v25 = vcombine.low %v6564_v18, %v6571_v1  ;;  %v6574_v32 = vcombine.low %v4530_v27, %v9859_v40 }
 0x2c5   : > { %v5282_v13 = vcombine.low %v5274_v54, %v5281_v34  ;;  %v5284_v44 = vcombine.low %v4804_v43, %v9882_v0  ;;  %v5291_v55 = vrot.slane %v5283_v33, %v8703_v62  ;;  %v5493_v59 = vmul.f32 %v4804_v43, %v4530_v27 }
 0x2c6   : > { %v5970_v24 = vrot.slane %v5956_v46, %v8703_v62  ;;  %v5972_v29 = vcombine.low %v5491_v2, %v5492_v35  ;;  %v6581_v49 = vrot.slane %v6573_v11, %v8703_v62  ;;  %v6588_v28 = vrot.slane %v6574_v32, %v8703_v62 }
 0x2c7   : > { %v5298_v47 = vrot.slane %v5284_v44, %v8703_v62  ;;  %v5354_v3 = vsel %vm724_vm3, %v5282_v13, 0.0  ;;  %v5973_v21 = vcombine.low %v5493_v59, %v5494_v45  ;;  %v7066_v40 = vpack.c.bf16 %v6572_v25, %v6572_v25 }
 0x2c8   : > { %v5353_v0 = vadd.f32 %v9785_v22, %v9795_v61  ;;  %v5971_v41 = vcombine.low %v5963_v56, %v5970_v24  ;;  %v6589_v7 = vcombine.low %v6581_v49, %v6588_v28  ;;  %v5980_v10 = vrot.slane %v5972_v29, %v8703_v62 }
 0x2c9   : > { %v5299_v6 = vcombine.low %v5291_v55, %v5298_v47  ;;  %v5987_v39 = vrot.slane %v5973_v21, %v8703_v62  ;;  %6786 = vst.msk [vmem:[%s8745_s9 + $0x6c] sm:$0xf] %vm6757_vm10, %v7066_v40  ;;  %v6042_v45 = vadd.f32 %v9788_v60, %v9804_v50  ;;  %v6060_v22 = vsel %vm724_vm3, %v5947_v15, 0.0 }
 0x2ca   : > { %v5355_v5 = vadd.f32 %v5354_v3, %v5353_v0  ;;  %v6043_v8 = vsel %vm724_vm3, %v5971_v41, 0.0  ;;  %v7067_v18 = vpack.c.bf16 %v6589_v7, %v6589_v7  ;;  %v5393_v61 = vsel %vm5375_vm9, %v5306_v52, 0.0 }
 0x2cb   : > { %v5373_v12 = vsel %vm724_vm3, %v5299_v6, 0.0  ;;  %v5988_v16 = vcombine.low %v5980_v10, %v5987_v39  ;;  %v6061_v51 = vadd.f32 %v6060_v22, %v9878_v17  ;;  %v5394_v9 = vadd.f32 %v5393_v61, %v5392_v20 }
 0x2cc   : > { %v5374_v60 = vadd.f32 %v5373_v12, %v9875_v23  ;;  %v6044_v50 = vadd.f32 %v6043_v8, %v6042_v45  ;;  %6787 = vst.msk [vmem:[%s8745_s9 + $0x70] sm:$0xf] %vm6757_vm10, %v7067_v18  ;;  %v6081_v19 = vsel %vm5375_vm9, %v5995_v53, 0.0  ;;  %v5395_v15 = vsel %vm724_vm3, %v5355_v5, 0.0 }
 0x2cd   : > { %v6062_v57 = vsel %vm724_vm3, %v5988_v16, 0.0  ;;  %v6082_v63 = vadd.f32 %v6081_v19, %v6080_v31  ;;  %v5398_v58 = vsel %vm5375_vm9, %v5394_v9, 0.0 }
 0x2ce   : > { %v5396_v52 = vsel %vm724_vm3, %v5374_v60, 0.0  ;;  %v6063_v4 = vadd.f32 %v6062_v57, %v6061_v51  ;;  %v6083_v23 = vsel %vm724_vm3, %v6044_v50, 0.0 }
 0x2cf   : > { %v5397_v17 = vadd.f32 %v5396_v52, %v5395_v15  ;;  %v6086_v14 = vsel %vm5375_vm9, %v6082_v63, 0.0 }
 0x2d0   : > { %v6084_v54 = vsel %vm724_vm3, %v6063_v4, 0.0 }
 0x2d1   : > { %v5399_v20 = vadd.f32 %v5398_v58, %v5397_v17  ;;  %v6085_v62 = vadd.f32 %v6084_v54, %v6083_v23 }
 0x2d3   : > { %v5400_v53 = vrot.slane %v5399_v20, 4  ;;  %v6087_v30 = vadd.f32 %v6086_v14, %v6085_v62 }
 0x2d5   : > { %v5401_v38 = vadd.f32 %v5400_v53, %v5399_v20  ;;  %v6088_v27 = vrot.slane %v6087_v30, 4 }
 0x2d7   : > { %v5402_v48 = vrot.slane %v5401_v38, 2  ;;  %v6089_v37 = vadd.f32 %v6088_v27, %v6087_v30 }
 0x2d9   : > { %v5403_v36 = vadd.f32 %v5402_v48, %v5401_v38  ;;  %v6090_v56 = vrot.slane %v6089_v37, 2 }
 0x2db   : > { %v5404_v26 = vrot.slane %v5403_v36, 1  ;;  %v6091_v1 = vadd.f32 %v6090_v56, %v6089_v37 }
 0x2dd   : > { %v6092_v11 = vrot.slane %v6091_v1, 1  ;;  %v5405_v43 = vadd.f32 %v5404_v26, %v5403_v36 }
 0x2df   : > { %v6093_v34 = vadd.f32 %v6092_v11, %v6091_v1 }
 0x2e1   : > { %v6095_v33 = vsel %vm6094_vm11, %v5405_v43, %v6093_v34 }
 0x2e2   : > { %6096 = vst.msk [vmem:[%s225_s13] sm:$0x3] %vm5375_vm9, %v6095_v33 }
 0x2e3 PF: > { %s14_s16 = sadd.s32 1, %s7314_s16   ;;  %s10210_s12 = smov %s7306_s14 }
 0x2e4   : > { %p11_p6 = scmp.ge.s32.totalorder %s14_s16, 6   ;;  %s10211_s13 = smov %s7310_s15 }
 0x2e5   : > { %s10212_s14 = smov %s10215_s17  ;;  %s10213_s15 = smov %s10219_s18 }
 0x2e6   :  { %13 = sbr.rel (!%p11_p6) target bundleno = 3 (0x3), region = 72 }

</bundles_post_ra>
